<compile_context>
chip_gen: v6e
topology: v6e:2x2x1
jax: 0.10.0
libtpu: 0.0.40
codegen_flags: <defaults>
</compile_context>

<pallas_src>
import math
import numpy as np

import jax
import jax.numpy as jnp
from jax import lax
from jax.experimental import pallas as pl
from jax.experimental.pallas import tpu as pltpu


# ----------------------------------------------------------------------------
# Small helpers
# ----------------------------------------------------------------------------
def det_3x3(m):
    return (m[:, 0, 0] * m[:, 1, 1] * m[:, 2, 2]
            + m[:, 0, 1] * m[:, 1, 2] * m[:, 2, 0]
            + m[:, 0, 2] * m[:, 1, 0] * m[:, 2, 1]
            - m[:, 0, 2] * m[:, 1, 1] * m[:, 2, 0]
            - m[:, 0, 0] * m[:, 1, 2] * m[:, 2, 1]
            - m[:, 0, 1] * m[:, 1, 0] * m[:, 2, 2])


def _round_up(a, b):
    return (a + b - 1) // b * b


def _layer_norm(y, g, b, eps=1e-5):
    mu = jnp.mean(y, axis=-1, keepdims=True)
    var = jnp.mean((y - mu) ** 2, axis=-1, keepdims=True)
    return (y - mu) * lax.rsqrt(var + eps) * g + b


# ----------------------------------------------------------------------------
# Pallas kernel 1: lattice-attention bias pre-pass (run ONCE, shared by layers)
#   bias[h, i, j] = log sum_l exp(-gamma_h * || pos_j - pos_i + lat_i[l] ||^2)
#                   + (0 if same crystal else -1e30)
# ----------------------------------------------------------------------------
def lattice_bias_kernel(gamma_ref,                  # (1, H) f32
                        kx_ref, ky_ref, kz_ref,     # (1, Npad) key positions
                        ax_ref, ay_ref, az_ref,     # (TQ, L)   lat_i[l] - pos_i
                        bq_ref,                     # (TQ, 1)   int32 query crystal id
                        bk_ref,                     # (1, Npad) int32 key crystal id
                        out_ref):                   # (H, TQ, Npad) f32
    f32 = jnp.float32
    H, TQ, N = out_ref.shape
    L = ax_ref.shape[1]

    kx = kx_ref[...]                                # (1, N)
    ky = ky_ref[...]
    kz = kz_ref[...]
    ax = ax_ref[...]                                # (TQ, L)
    ay = ay_ref[...]
    az = az_ref[...]
    gam = gamma_ref[...]                            # (1, H)

    # Additive crystal mask (padded atoms carry id -1 => excluded for real rows).
    maskf = jnp.where(bq_ref[...] == bk_ref[...], 0.0, -1e30)          # (TQ, N)

    # Accumulate over lattice offsets without ever materializing a (TQ, L, N)
    # tensor: only a few (TQ, N) f32 buffers are live at once.
    accs = [jnp.zeros((TQ, N), f32) for _ in range(H)]
    for l in range(L):                              # static unroll (L = 27)
        dx = kx + ax[:, l:l + 1]                    # (TQ, N)
        dy = ky + ay[:, l:l + 1]
        dz = kz + az[:, l:l + 1]
        d2 = dx * dx + dy * dy + dz * dz
        for h in range(H):
            accs[h] = accs[h] + jnp.exp(d2 * (-gam[0:1, h:h + 1]))

    # exp(-gamma*d2) <= 1 and the l == 0 diagonal term equals 1, so log() is
    # overflow-safe and every row has at least one finite logit.
    for h in range(H):
        out_ref[h, :, :] = jnp.log(accs[h]) + maskf


def precompute_lattice_bias(pos, batch, trans, gamma, lattice_range, Npad, tile_q):
    N = pos.shape[0]
    H = gamma.shape[0]
    pad = Npad - N

    R = lattice_range
    g = jnp.arange(-R, R + 1, dtype=pos.dtype)
    grids = jnp.stack(jnp.meshgrid(g, g, g, indexing="ij"), axis=-1).reshape(-1, 3)
    L = grids.shape[0]
    lat = jnp.einsum("ld,bde->ble", grids, trans)[batch]        # (N, L, 3)
    a = lat - pos[:, None, :]                                   # lat_i[l] - pos_i

    posp = jnp.pad(pos, ((0, pad), (0, 0)))
    ap = jnp.pad(a, ((0, pad), (0, 0), (0, 0)))
    bid = jnp.pad(batch.astype(jnp.int32), (0, pad), constant_values=-1)

    kx = posp[:, 0][None, :]                                    # (1, Npad)
    ky = posp[:, 1][None, :]
    kz = posp[:, 2][None, :]
    ax = ap[:, :, 0]                                            # (Npad, L) lane-dense
    ay = ap[:, :, 1]
    az = ap[:, :, 2]
    bq = bid[:, None]                                           # (Npad, 1) int32
    bk = bid[None, :]                                           # (1, Npad) int32
    gam = gamma.astype(jnp.float32)[None, :]                    # (1, H)

    qtile = lambda i: (i, 0)
    full2 = lambda i: (0, 0)

    return pl.pallas_call(
        lattice_bias_kernel,
        out_shape=jax.ShapeDtypeStruct((H, Npad, Npad), jnp.float32),
        grid=(Npad // tile_q,),
        in_specs=[
            pl.BlockSpec((1, H), full2),            # gamma
            pl.BlockSpec((1, Npad), full2),         # key pos x
            pl.BlockSpec((1, Npad), full2),         # key pos y
            pl.BlockSpec((1, Npad), full2),         # key pos z
            pl.BlockSpec((tile_q, L), qtile),       # a_x (query tile)
            pl.BlockSpec((tile_q, L), qtile),       # a_y
            pl.BlockSpec((tile_q, L), qtile),       # a_z
            pl.BlockSpec((tile_q, 1), qtile),       # query crystal ids
            pl.BlockSpec((1, Npad), full2),         # key crystal ids
        ],
        out_specs=pl.BlockSpec((H, tile_q, Npad), lambda i: (0, i, 0)),
        compiler_params=pltpu.CompilerParams(
            dimension_semantics=("parallel",),
            vmem_limit_bytes=48 * 1024 * 1024),
    )(gam, kx, ky, kz, ax, ay, az, bq, bk)


# ----------------------------------------------------------------------------
# Pallas kernel 2: one fused encoder layer for one query-row tile
# ----------------------------------------------------------------------------
def encoder_layer_kernel(x_ref, q_ref,              # (TQ, D) residual input, projected queries
                         k_ref, v_ref,              # (Npad, D) projected keys/values (resident)
                         bias_ref,                  # (H, TQ, Npad) precomputed lattice bias
                         wo_ref, bo_ref,            # (D, D) bf16, (1, D) f32
                         w1_ref, b1_ref,            # (D, F) bf16, (1, F)
                         w2_ref, b2_ref,            # (F, D) bf16, (1, D)
                         g1_ref, t1_ref, g2_ref, t2_ref,
                         out_ref):                  # (TQ, D) f32
    f32 = jnp.float32
    bf16 = jnp.bfloat16

    TQ, D = out_ref.shape
    N = k_ref.shape[0]
    H = bias_ref.shape[0]
    Dh = D // H
    scale = 1.0 / math.sqrt(Dh)

    x_q = x_ref[...]                                # (TQ, D) residual
    q = q_ref[...]                                  # (TQ, D)
    k = k_ref[...]                                  # (N, D)
    v = v_ref[...]                                  # (N, D)

    # Per-head column masks built in-kernel (no DMA'd mask array, no int div).
    cid = lax.broadcasted_iota(jnp.int32, (TQ, D), 1)
    head_masks = [((cid >= h * Dh) & (cid < (h + 1) * Dh)).astype(f32)
                  for h in range(H)]

    # Head-major row stacking: logical row h*TQ + i carries q_h[i] with other
    # heads' feature columns zeroed, so ONE MXU contraction gives all heads'
    # score blocks (contraction dim folded into the MXU operand, no k.T copy).
    q_heads = jnp.concatenate([q * head_masks[h] for h in range(H)], axis=0)   # (H*TQ, D)
    s = lax.dot_general(q_heads.astype(bf16), k.astype(bf16),
                        dimension_numbers=(((1,), (1,)), ((), ())),
                        preferred_element_type=f32)                 # (H*TQ, N)

    bias = jnp.reshape(bias_ref[...], (H * TQ, N))  # merge major dims (layout no-op)
    s = s * scale + bias
    s = s - jnp.max(s, axis=-1, keepdims=True)
    p = jnp.exp(s)
    p = p * pl.reciprocal(jnp.sum(p, axis=-1, keepdims=True), approx=True)

    o = jnp.dot(p.astype(bf16), v.astype(bf16),
                preferred_element_type=f32)         # (H*TQ, D)
    # Fold head blocks back to (TQ, D): keep only head-h columns of block h
    # (equivalent to concatenating the per-head outputs along features).
    attn = o[0:TQ, :] * head_masks[0]
    for h in range(1, H):
        attn = attn + o[h * TQ:(h + 1) * TQ, :] * head_masks[h]

    attn = jnp.dot(attn.astype(bf16), wo_ref[...],
                   preferred_element_type=f32) + bo_ref[...]

    # ---- residual + LayerNorm1 (post-norm), feed-forward, LayerNorm2 ----
    y = _layer_norm(x_q + attn, g1_ref[...], t1_ref[...])

    h1 = jnp.dot(y.astype(bf16), w1_ref[...], preferred_element_type=f32) + b1_ref[...]
    h1 = jnp.maximum(h1, 0.0)
    ff = jnp.dot(h1.astype(bf16), w2_ref[...], preferred_element_type=f32) + b2_ref[...]

    z = _layer_norm(y + ff, g2_ref[...], t2_ref[...])
    out_ref[...] = z.astype(out_ref.dtype)


def run_encoder_layer(x, bias, params, tile_q):
    """One IndexedLatticeformerEncoderLayer forward, gridded over query tiles."""
    wqkv, bqkv, wo, bo, w1, b1, w2, b2, g1, t1, g2, t2 = params
    Npad, D = x.shape
    H = bias.shape[0]
    assert Npad % tile_q == 0

    # Q/K/V projection ONCE per layer (plain XLA matmul; bf16 MXU, f32 accum):
    # no redundant per-query-tile K/V recompute inside the kernel.
    qkv = jnp.dot(x.astype(jnp.bfloat16), wqkv,
                  preferred_element_type=jnp.float32) + bqkv            # (Npad, 3D)
    q, k, v = qkv[:, :D], qkv[:, D:2 * D], qkv[:, 2 * D:]

    qtile = lambda i: (i, 0)
    full2 = lambda i: (0, 0)
    weights = [wo, bo, w1, b1, w2, b2, g1, t1, g2, t2]

    in_specs = [
        pl.BlockSpec((tile_q, D), qtile),                    # x (residual, query tile)
        pl.BlockSpec((tile_q, D), qtile),                    # q (query tile)
        pl.BlockSpec((Npad, D), full2),                      # k (resident)
        pl.BlockSpec((Npad, D), full2),                      # v (resident)
        pl.BlockSpec((H, tile_q, Npad), lambda i: (0, i, 0)),  # lattice bias tile
    ] + [pl.BlockSpec(w.shape, full2) for w in weights]

    return pl.pallas_call(
        encoder_layer_kernel,
        out_shape=jax.ShapeDtypeStruct((Npad, D), jnp.float32),
        grid=(Npad // tile_q,),
        in_specs=in_specs,
        out_specs=pl.BlockSpec((tile_q, D), qtile),
        compiler_params=pltpu.CompilerParams(
            dimension_semantics=("parallel",),   # megacore-shard query tiles (v7x)
            vmem_limit_bytes=48 * 1024 * 1024),
    )(x, q, k, v, bias, *weights)


# ----------------------------------------------------------------------------
# Parameter initialization (xavier-uniform-like, fused QKV weight, bf16 weights)
# ----------------------------------------------------------------------------
def _xavier(key, fan_in, fan_out):
    limit = math.sqrt(6.0 / (fan_in + fan_out))
    return jax.random.uniform(key, (fan_in, fan_out), jnp.float32, -limit, limit)


def init_layer_params(key, d_model, dim_ff):
    ks = jax.random.split(key, 6)
    wq = _xavier(ks[0], d_model, d_model)
    wk = _xavier(ks[1], d_model, d_model)
    wv = _xavier(ks[2], d_model, d_model)
    wqkv = jnp.concatenate([wq, wk, wv], axis=1).astype(jnp.bfloat16)   # (D, 3D)
    wo = _xavier(ks[3], d_model, d_model).astype(jnp.bfloat16)
    w1 = _xavier(ks[4], d_model, dim_ff).astype(jnp.bfloat16)
    w2 = _xavier(ks[5], dim_ff, d_model).astype(jnp.bfloat16)
    z_d = jnp.zeros((1, d_model), jnp.float32)
    z_3d = jnp.zeros((1, 3 * d_model), jnp.float32)
    z_f = jnp.zeros((1, dim_ff), jnp.float32)
    ones_d = jnp.ones((1, d_model), jnp.float32)
    return [wqkv, z_3d,            # W_qkv, b_qkv (used in the XLA pre-projection)
            wo, z_d,               # W_o, b_o
            w1, z_f, w2, z_d,      # linear1, linear2
            ones_d, z_d, ones_d, z_d]   # norm1 gamma/beta, norm2 gamma/beta


# ----------------------------------------------------------------------------
# Full encoder forward (mirrors IndexedLatticeformerEncoder.forward)
# ----------------------------------------------------------------------------
def indexed_latticeformer_encoder(src, pos, batch, trans, sizes,
                                  layer_params, gamma, lattice_range,
                                  final_norm, tile_q=128):
    batch = batch - batch[0]
    vcell = det_3x3(trans)      # computed as in the reference; unused in 'real' domain
    del vcell, sizes
    N, D = src.shape

    npad8 = _round_up(N, 8)
    TQ = tile_q if npad8 >= tile_q else npad8
    Npad = _round_up(N, TQ)

    x = jnp.pad(src, ((0, Npad - N), (0, 0)))

    # Lattice bias precomputed ONCE and shared by all layers.
    bias = precompute_lattice_bias(pos, batch, trans, gamma, lattice_range, Npad, TQ)

    for params in layer_params:
        x = run_encoder_layer(x, bias, params, TQ)
    out = x[:N]

    g, b = final_norm
    return _layer_norm(out, g, b)


# ----------------------------------------------------------------------------
# Pure-JAX reference (f32, per-head loops) for a correctness self-check
# ----------------------------------------------------------------------------
def reference_forward(src, pos, batch, trans, layer_params, gamma, lattice_range,
                      final_norm):
    batch = batch - batch[0]
    R = lattice_range
    g = jnp.arange(-R, R + 1, dtype=pos.dtype)
    grids = jnp.stack(jnp.meshgrid(g, g, g, indexing="ij"), axis=-1).reshape(-1, 3)
    lat = jnp.einsum("ld,bde->ble", grids, trans)[batch]
    rel = pos[None, :, :] - pos[:, None, :]
    pql = rel[:, :, None, :] + lat[:, None, :, :]
    d2 = jnp.sum(pql * pql, axis=-1)
    lse = jax.nn.logsumexp(-gamma[:, None, None, None] * d2[None], axis=-1)
    same = (batch[:, None] == batch[None, :])[None]
    bias = jnp.where(same, lse, -1e30)

    H = gamma.shape[0]
    x = src
    for prm in layer_params:
        (wqkv, bqkv, wo, bo, w1, b1, w2, b2, g1, t1, g2, t2) = [
            jnp.asarray(p, jnp.float32) for p in prm]
        D = x.shape[-1]
        Dh = D // H
        qkv = x @ wqkv + bqkv
        q, k, v = qkv[:, :D], qkv[:, D:2 * D], qkv[:, 2 * D:]
        heads = []
        for h in range(H):
            qh = q[:, h * Dh:(h + 1) * Dh]
            kh = k[:, h * Dh:(h + 1) * Dh]
            vh = v[:, h * Dh:(h + 1) * Dh]
            s = qh @ kh.T / math.sqrt(Dh) + bias[h]
            heads.append(jax.nn.softmax(s, axis=-1) @ vh)
        attn = jnp.concatenate(heads, axis=-1) @ wo + bo
        y = _layer_norm(x + attn, g1, t1)
        ff = jnp.maximum(y @ w1 + b1, 0.0) @ w2 + b2
        x = _layer_norm(y + ff, g2, t2)
    gn, bn = final_norm
    return _layer_norm(x, gn, bn)


# ----------------------------------------------------------------------------
# Example
# ----------------------------------------------------------------------------
if __name__ == "__main__":
    key = jax.random.PRNGKey(0)

    d_model = 32
    nhead = 4
    num_layers = 2
    dim_ff = 64
    lattice_range = 1                       # -> (2R+1)^3 = 27 lattice translations

    sizes_np = np.array([3, 4], dtype=np.int32)          # atoms per crystal (N=7)
    B = sizes_np.shape[0]
    N = int(sizes_np.sum())
    batch = jnp.asarray(np.repeat(np.arange(B, dtype=np.int32), sizes_np))

    k_src, k_pos, k_trans, k_layers = jax.random.split(key, 4)
    src = jax.random.normal(k_src, (N, d_model), jnp.float32)
    pos = jax.random.uniform(k_pos, (N, 3), jnp.float32) * 2.0
    trans = (3.0 * jnp.eye(3, dtype=jnp.float32)[None].repeat(B, axis=0)
             + 0.1 * jax.random.normal(k_trans, (B, 3, 3), jnp.float32))
    sizes = jnp.asarray(sizes_np)

    # deterministic per-head Gaussian attention widths (stand-in parameters)
    gamma = jnp.array([0.25, 0.5, 1.0, 2.0], dtype=jnp.float32)
    assert gamma.shape[0] == nhead

    layer_keys = jax.random.split(k_layers, num_layers)
    layer_params = [init_layer_params(layer_keys[i], d_model, dim_ff)
                    for i in range(num_layers)]
    final_norm = (jnp.ones((d_model,), jnp.float32), jnp.zeros((d_model,), jnp.float32))

    out = indexed_latticeformer_encoder(src, pos, batch, trans, sizes,
                                        layer_params, gamma, lattice_range,
                                        final_norm)
    out = jax.block_until_ready(out)
    assert out.shape == (N, d_model)
    assert bool(jnp.all(jnp.isfinite(out)))

    # correctness self-check against the f32 pure-JAX reference
    # (loose tolerance: kernel uses bf16 MXU inputs + approx reciprocal)
    ref = reference_forward(src, pos, batch, trans, layer_params, gamma,
                            lattice_range, final_norm)
    max_err = float(jnp.max(jnp.abs(out - ref)))
    assert max_err < 0.2, f"mismatch vs reference: {max_err}"

    print("KERNEL_OK")
</pallas_src>

<mosaic_0001>
module attributes {stable_mosaic.version = 11 : i64} {
  func.func @lattice_bias_kernel(%arg0: i32, %arg1: memref<1x4xf32, #tpu.memory_space<vmem>>, %arg2: memref<1x8xf32, #tpu.memory_space<vmem>>, %arg3: memref<1x8xf32, #tpu.memory_space<vmem>>, %arg4: memref<1x8xf32, #tpu.memory_space<vmem>>, %arg5: memref<8x27xf32, #tpu.memory_space<vmem>>, %arg6: memref<8x27xf32, #tpu.memory_space<vmem>>, %arg7: memref<8x27xf32, #tpu.memory_space<vmem>>, %arg8: memref<8x1xi32, #tpu.memory_space<vmem>>, %arg9: memref<1x8xi32, #tpu.memory_space<vmem>>, %arg10: memref<4x8x8xf32, #tpu.memory_space<vmem>>) attributes {dimension_semantics = [#tpu.dimension_semantics<parallel>], iteration_bounds = array<i64: 1>, scalar_prefetch = 0 : i64, scratch_operands = 0 : i64, tpu.core_type = #tpu.core_type<tc>, window_params = [{pipeline_mode = #tpu.pipeline_mode<synchronous>, transform_indices = @transform_0, window_bounds = array<i64: 1, 4>}, {pipeline_mode = #tpu.pipeline_mode<synchronous>, transform_indices = @transform_1, window_bounds = array<i64: 1, 8>}, {pipeline_mode = #tpu.pipeline_mode<synchronous>, transform_indices = @transform_2, window_bounds = array<i64: 1, 8>}, {pipeline_mode = #tpu.pipeline_mode<synchronous>, transform_indices = @transform_3, window_bounds = array<i64: 1, 8>}, {transform_indices = @transform_4, window_bounds = array<i64: 8, 27>}, {transform_indices = @transform_5, window_bounds = array<i64: 8, 27>}, {transform_indices = @transform_6, window_bounds = array<i64: 8, 27>}, {transform_indices = @transform_7, window_bounds = array<i64: 8, 1>}, {pipeline_mode = #tpu.pipeline_mode<synchronous>, transform_indices = @transform_8, window_bounds = array<i64: 1, 8>}, {transform_indices = @transform_9, window_bounds = array<i64: 4, 8, 8>}]} {
    %c0 = arith.constant 0 : index
    %c0_0 = arith.constant 0 : index
    %0 = vector.load %arg2[%c0, %c0_0] : memref<1x8xf32, #tpu.memory_space<vmem>>, vector<1x8xf32>
    %c0_1 = arith.constant 0 : index
    %c0_2 = arith.constant 0 : index
    %1 = vector.load %arg3[%c0_1, %c0_2] : memref<1x8xf32, #tpu.memory_space<vmem>>, vector<1x8xf32>
    %c0_3 = arith.constant 0 : index
    %c0_4 = arith.constant 0 : index
    %2 = vector.load %arg4[%c0_3, %c0_4] : memref<1x8xf32, #tpu.memory_space<vmem>>, vector<1x8xf32>
    %c0_5 = arith.constant 0 : index
    %c0_6 = arith.constant 0 : index
    %3 = vector.load %arg5[%c0_5, %c0_6] : memref<8x27xf32, #tpu.memory_space<vmem>>, vector<8x27xf32>
    %c0_7 = arith.constant 0 : index
    %c0_8 = arith.constant 0 : index
    %4 = vector.load %arg6[%c0_7, %c0_8] : memref<8x27xf32, #tpu.memory_space<vmem>>, vector<8x27xf32>
    %c0_9 = arith.constant 0 : index
    %c0_10 = arith.constant 0 : index
    %5 = vector.load %arg7[%c0_9, %c0_10] : memref<8x27xf32, #tpu.memory_space<vmem>>, vector<8x27xf32>
    %c0_11 = arith.constant 0 : index
    %c0_12 = arith.constant 0 : index
    %6 = vector.load %arg1[%c0_11, %c0_12] : memref<1x4xf32, #tpu.memory_space<vmem>>, vector<1x4xf32>
    %c0_13 = arith.constant 0 : index
    %c0_14 = arith.constant 0 : index
    %7 = vector.load %arg8[%c0_13, %c0_14] : memref<8x1xi32, #tpu.memory_space<vmem>>, vector<8x1xi32>
    %c0_15 = arith.constant 0 : index
    %c0_16 = arith.constant 0 : index
    %8 = vector.load %arg9[%c0_15, %c0_16] : memref<1x8xi32, #tpu.memory_space<vmem>>, vector<1x8xi32>
    %9 = vector.broadcast %7 : vector<8x1xi32> to vector<8x8xi32>
    %10 = vector.broadcast %8 : vector<1x8xi32> to vector<8x8xi32>
    %11 = arith.cmpi eq, %9, %10 : vector<8x8xi32>
    %cst = arith.constant 0.000000e+00 : f32
    %cst_17 = arith.constant -1.000000e+30 : f32
    %12 = vector.broadcast %cst : f32 to vector<8x8xf32>
    %13 = vector.broadcast %cst_17 : f32 to vector<8x8xf32>
    %14 = arith.select %11, %12, %13 : vector<8x8xi1>, vector<8x8xf32>
    %cst_18 = arith.constant 0.000000e+00 : f32
    %15 = vector.broadcast %cst_18 : f32 to vector<8x8xf32>
    %cst_19 = arith.constant 0.000000e+00 : f32
    %16 = vector.broadcast %cst_19 : f32 to vector<8x8xf32>
    %cst_20 = arith.constant 0.000000e+00 : f32
    %17 = vector.broadcast %cst_20 : f32 to vector<8x8xf32>
    %cst_21 = arith.constant 0.000000e+00 : f32
    %18 = vector.broadcast %cst_21 : f32 to vector<8x8xf32>
    %19 = vector.extract_strided_slice %3 {offsets = [0, 0], sizes = [8, 1], strides = [1, 1]} : vector<8x27xf32> to vector<8x1xf32>
    %20 = vector.broadcast %0 : vector<1x8xf32> to vector<8x8xf32>
    %21 = vector.broadcast %19 : vector<8x1xf32> to vector<8x8xf32>
    %22 = arith.addf %20, %21 : vector<8x8xf32>
    %23 = vector.extract_strided_slice %4 {offsets = [0, 0], sizes = [8, 1], strides = [1, 1]} : vector<8x27xf32> to vector<8x1xf32>
    %24 = vector.broadcast %1 : vector<1x8xf32> to vector<8x8xf32>
    %25 = vector.broadcast %23 : vector<8x1xf32> to vector<8x8xf32>
    %26 = arith.addf %24, %25 : vector<8x8xf32>
    %27 = vector.extract_strided_slice %5 {offsets = [0, 0], sizes = [8, 1], strides = [1, 1]} : vector<8x27xf32> to vector<8x1xf32>
    %28 = vector.broadcast %2 : vector<1x8xf32> to vector<8x8xf32>
    %29 = vector.broadcast %27 : vector<8x1xf32> to vector<8x8xf32>
    %30 = arith.addf %28, %29 : vector<8x8xf32>
    %31 = arith.mulf %22, %22 : vector<8x8xf32>
    %32 = arith.mulf %26, %26 : vector<8x8xf32>
    %33 = arith.addf %31, %32 : vector<8x8xf32>
    %34 = arith.mulf %30, %30 : vector<8x8xf32>
    %35 = arith.addf %33, %34 : vector<8x8xf32>
    %36 = vector.extract_strided_slice %6 {offsets = [0, 0], sizes = [1, 1], strides = [1, 1]} : vector<1x4xf32> to vector<1x1xf32>
    %cst_22 = arith.constant 0.000000e+00 : f32
    %37 = vector.broadcast %cst_22 : f32 to vector<1x1xf32>
    %38 = arith.subf %37, %36 : vector<1x1xf32>
    %39 = vector.broadcast %38 : vector<1x1xf32> to vector<8x8xf32>
    %40 = arith.mulf %35, %39 : vector<8x8xf32>
    %41 = math.exp %40 : vector<8x8xf32>
    %42 = arith.addf %15, %41 : vector<8x8xf32>
    %43 = vector.extract_strided_slice %6 {offsets = [0, 1], sizes = [1, 1], strides = [1, 1]} : vector<1x4xf32> to vector<1x1xf32>
    %cst_23 = arith.constant 0.000000e+00 : f32
    %44 = vector.broadcast %cst_23 : f32 to vector<1x1xf32>
    %45 = arith.subf %44, %43 : vector<1x1xf32>
    %46 = vector.broadcast %45 : vector<1x1xf32> to vector<8x8xf32>
    %47 = arith.mulf %35, %46 : vector<8x8xf32>
    %48 = math.exp %47 : vector<8x8xf32>
    %49 = arith.addf %16, %48 : vector<8x8xf32>
    %50 = vector.extract_strided_slice %6 {offsets = [0, 2], sizes = [1, 1], strides = [1, 1]} : vector<1x4xf32> to vector<1x1xf32>
    %cst_24 = arith.constant 0.000000e+00 : f32
    %51 = vector.broadcast %cst_24 : f32 to vector<1x1xf32>
    %52 = arith.subf %51, %50 : vector<1x1xf32>
    %53 = vector.broadcast %52 : vector<1x1xf32> to vector<8x8xf32>
    %54 = arith.mulf %35, %53 : vector<8x8xf32>
    %55 = math.exp %54 : vector<8x8xf32>
    %56 = arith.addf %17, %55 : vector<8x8xf32>
    %57 = vector.extract_strided_slice %6 {offsets = [0, 3], sizes = [1, 1], strides = [1, 1]} : vector<1x4xf32> to vector<1x1xf32>
    %cst_25 = arith.constant 0.000000e+00 : f32
    %58 = vector.broadcast %cst_25 : f32 to vector<1x1xf32>
    %59 = arith.subf %58, %57 : vector<1x1xf32>
    %60 = vector.broadcast %59 : vector<1x1xf32> to vector<8x8xf32>
    %61 = arith.mulf %35, %60 : vector<8x8xf32>
    %62 = math.exp %61 : vector<8x8xf32>
    %63 = arith.addf %18, %62 : vector<8x8xf32>
    %64 = vector.extract_strided_slice %3 {offsets = [0, 1], sizes = [8, 1], strides = [1, 1]} : vector<8x27xf32> to vector<8x1xf32>
    %65 = vector.broadcast %0 : vector<1x8xf32> to vector<8x8xf32>
    %66 = vector.broadcast %64 : vector<8x1xf32> to vector<8x8xf32>
    %67 = arith.addf %65, %66 : vector<8x8xf32>
    %68 = vector.extract_strided_slice %4 {offsets = [0, 1], sizes = [8, 1], strides = [1, 1]} : vector<8x27xf32> to vector<8x1xf32>
    %69 = vector.broadcast %1 : vector<1x8xf32> to vector<8x8xf32>
    %70 = vector.broadcast %68 : vector<8x1xf32> to vector<8x8xf32>
    %71 = arith.addf %69, %70 : vector<8x8xf32>
    %72 = vector.extract_strided_slice %5 {offsets = [0, 1], sizes = [8, 1], strides = [1, 1]} : vector<8x27xf32> to vector<8x1xf32>
    %73 = vector.broadcast %2 : vector<1x8xf32> to vector<8x8xf32>
    %74 = vector.broadcast %72 : vector<8x1xf32> to vector<8x8xf32>
    %75 = arith.addf %73, %74 : vector<8x8xf32>
    %76 = arith.mulf %67, %67 : vector<8x8xf32>
    %77 = arith.mulf %71, %71 : vector<8x8xf32>
    %78 = arith.addf %76, %77 : vector<8x8xf32>
    %79 = arith.mulf %75, %75 : vector<8x8xf32>
    %80 = arith.addf %78, %79 : vector<8x8xf32>
    %81 = vector.extract_strided_slice %6 {offsets = [0, 0], sizes = [1, 1], strides = [1, 1]} : vector<1x4xf32> to vector<1x1xf32>
    %cst_26 = arith.constant 0.000000e+00 : f32
    %82 = vector.broadcast %cst_26 : f32 to vector<1x1xf32>
    %83 = arith.subf %82, %81 : vector<1x1xf32>
    %84 = vector.broadcast %83 : vector<1x1xf32> to vector<8x8xf32>
    %85 = arith.mulf %80, %84 : vector<8x8xf32>
    %86 = math.exp %85 : vector<8x8xf32>
    %87 = arith.addf %42, %86 : vector<8x8xf32>
    %88 = vector.extract_strided_slice %6 {offsets = [0, 1], sizes = [1, 1], strides = [1, 1]} : vector<1x4xf32> to vector<1x1xf32>
    %cst_27 = arith.constant 0.000000e+00 : f32
    %89 = vector.broadcast %cst_27 : f32 to vector<1x1xf32>
    %90 = arith.subf %89, %88 : vector<1x1xf32>
    %91 = vector.broadcast %90 : vector<1x1xf32> to vector<8x8xf32>
    %92 = arith.mulf %80, %91 : vector<8x8xf32>
    %93 = math.exp %92 : vector<8x8xf32>
    %94 = arith.addf %49, %93 : vector<8x8xf32>
    %95 = vector.extract_strided_slice %6 {offsets = [0, 2], sizes = [1, 1], strides = [1, 1]} : vector<1x4xf32> to vector<1x1xf32>
    %cst_28 = arith.constant 0.000000e+00 : f32
    %96 = vector.broadcast %cst_28 : f32 to vector<1x1xf32>
    %97 = arith.subf %96, %95 : vector<1x1xf32>
    %98 = vector.broadcast %97 : vector<1x1xf32> to vector<8x8xf32>
    %99 = arith.mulf %80, %98 : vector<8x8xf32>
    %100 = math.exp %99 : vector<8x8xf32>
    %101 = arith.addf %56, %100 : vector<8x8xf32>
    %102 = vector.extract_strided_slice %6 {offsets = [0, 3], sizes = [1, 1], strides = [1, 1]} : vector<1x4xf32> to vector<1x1xf32>
    %cst_29 = arith.constant 0.000000e+00 : f32
    %103 = vector.broadcast %cst_29 : f32 to vector<1x1xf32>
    %104 = arith.subf %103, %102 : vector<1x1xf32>
    %105 = vector.broadcast %104 : vector<1x1xf32> to vector<8x8xf32>
    %106 = arith.mulf %80, %105 : vector<8x8xf32>
    %107 = math.exp %106 : vector<8x8xf32>
    %108 = arith.addf %63, %107 : vector<8x8xf32>
    %109 = vector.extract_strided_slice %3 {offsets = [0, 2], sizes = [8, 1], strides = [1, 1]} : vector<8x27xf32> to vector<8x1xf32>
    %110 = vector.broadcast %0 : vector<1x8xf32> to vector<8x8xf32>
    %111 = vector.broadcast %109 : vector<8x1xf32> to vector<8x8xf32>
    %112 = arith.addf %110, %111 : vector<8x8xf32>
    %113 = vector.extract_strided_slice %4 {offsets = [0, 2], sizes = [8, 1], strides = [1, 1]} : vector<8x27xf32> to vector<8x1xf32>
    %114 = vector.broadcast %1 : vector<1x8xf32> to vector<8x8xf32>
    %115 = vector.broadcast %113 : vector<8x1xf32> to vector<8x8xf32>
    %116 = arith.addf %114, %115 : vector<8x8xf32>
    %117 = vector.extract_strided_slice %5 {offsets = [0, 2], sizes = [8, 1], strides = [1, 1]} : vector<8x27xf32> to vector<8x1xf32>
    %118 = vector.broadcast %2 : vector<1x8xf32> to vector<8x8xf32>
    %119 = vector.broadcast %117 : vector<8x1xf32> to vector<8x8xf32>
    %120 = arith.addf %118, %119 : vector<8x8xf32>
    %121 = arith.mulf %112, %112 : vector<8x8xf32>
    %122 = arith.mulf %116, %116 : vector<8x8xf32>
    %123 = arith.addf %121, %122 : vector<8x8xf32>
    %124 = arith.mulf %120, %120 : vector<8x8xf32>
    %125 = arith.addf %123, %124 : vector<8x8xf32>
    %126 = vector.extract_strided_slice %6 {offsets = [0, 0], sizes = [1, 1], strides = [1, 1]} : vector<1x4xf32> to vector<1x1xf32>
    %cst_30 = arith.constant 0.000000e+00 : f32
    %127 = vector.broadcast %cst_30 : f32 to vector<1x1xf32>
    %128 = arith.subf %127, %126 : vector<1x1xf32>
    %129 = vector.broadcast %128 : vector<1x1xf32> to vector<8x8xf32>
    %130 = arith.mulf %125, %129 : vector<8x8xf32>
    %131 = math.exp %130 : vector<8x8xf32>
    %132 = arith.addf %87, %131 : vector<8x8xf32>
    %133 = vector.extract_strided_slice %6 {offsets = [0, 1], sizes = [1, 1], strides = [1, 1]} : vector<1x4xf32> to vector<1x1xf32>
    %cst_31 = arith.constant 0.000000e+00 : f32
    %134 = vector.broadcast %cst_31 : f32 to vector<1x1xf32>
    %135 = arith.subf %134, %133 : vector<1x1xf32>
    %136 = vector.broadcast %135 : vector<1x1xf32> to vector<8x8xf32>
    %137 = arith.mulf %125, %136 : vector<8x8xf32>
    %138 = math.exp %137 : vector<8x8xf32>
    %139 = arith.addf %94, %138 : vector<8x8xf32>
    %140 = vector.extract_strided_slice %6 {offsets = [0, 2], sizes = [1, 1], strides = [1, 1]} : vector<1x4xf32> to vector<1x1xf32>
    %cst_32 = arith.constant 0.000000e+00 : f32
    %141 = vector.broadcast %cst_32 : f32 to vector<1x1xf32>
    %142 = arith.subf %141, %140 : vector<1x1xf32>
    %143 = vector.broadcast %142 : vector<1x1xf32> to vector<8x8xf32>
    %144 = arith.mulf %125, %143 : vector<8x8xf32>
    %145 = math.exp %144 : vector<8x8xf32>
    %146 = arith.addf %101, %145 : vector<8x8xf32>
    %147 = vector.extract_strided_slice %6 {offsets = [0, 3], sizes = [1, 1], strides = [1, 1]} : vector<1x4xf32> to vector<1x1xf32>
    %cst_33 = arith.constant 0.000000e+00 : f32
    %148 = vector.broadcast %cst_33 : f32 to vector<1x1xf32>
    %149 = arith.subf %148, %147 : vector<1x1xf32>
    %150 = vector.broadcast %149 : vector<1x1xf32> to vector<8x8xf32>
    %151 = arith.mulf %125, %150 : vector<8x8xf32>
    %152 = math.exp %151 : vector<8x8xf32>
    %153 = arith.addf %108, %152 : vector<8x8xf32>
    %154 = vector.extract_strided_slice %3 {offsets = [0, 3], sizes = [8, 1], strides = [1, 1]} : vector<8x27xf32> to vector<8x1xf32>
    %155 = vector.broadcast %0 : vector<1x8xf32> to vector<8x8xf32>
    %156 = vector.broadcast %154 : vector<8x1xf32> to vector<8x8xf32>
    %157 = arith.addf %155, %156 : vector<8x8xf32>
    %158 = vector.extract_strided_slice %4 {offsets = [0, 3], sizes = [8, 1], strides = [1, 1]} : vector<8x27xf32> to vector<8x1xf32>
    %159 = vector.broadcast %1 : vector<1x8xf32> to vector<8x8xf32>
    %160 = vector.broadcast %158 : vector<8x1xf32> to vector<8x8xf32>
    %161 = arith.addf %159, %160 : vector<8x8xf32>
    %162 = vector.extract_strided_slice %5 {offsets = [0, 3], sizes = [8, 1], strides = [1, 1]} : vector<8x27xf32> to vector<8x1xf32>
    %163 = vector.broadcast %2 : vector<1x8xf32> to vector<8x8xf32>
    %164 = vector.broadcast %162 : vector<8x1xf32> to vector<8x8xf32>
    %165 = arith.addf %163, %164 : vector<8x8xf32>
    %166 = arith.mulf %157, %157 : vector<8x8xf32>
    %167 = arith.mulf %161, %161 : vector<8x8xf32>
    %168 = arith.addf %166, %167 : vector<8x8xf32>
    %169 = arith.mulf %165, %165 : vector<8x8xf32>
    %170 = arith.addf %168, %169 : vector<8x8xf32>
    %171 = vector.extract_strided_slice %6 {offsets = [0, 0], sizes = [1, 1], strides = [1, 1]} : vector<1x4xf32> to vector<1x1xf32>
    %cst_34 = arith.constant 0.000000e+00 : f32
    %172 = vector.broadcast %cst_34 : f32 to vector<1x1xf32>
    %173 = arith.subf %172, %171 : vector<1x1xf32>
    %174 = vector.broadcast %173 : vector<1x1xf32> to vector<8x8xf32>
    %175 = arith.mulf %170, %174 : vector<8x8xf32>
    %176 = math.exp %175 : vector<8x8xf32>
    %177 = arith.addf %132, %176 : vector<8x8xf32>
    %178 = vector.extract_strided_slice %6 {offsets = [0, 1], sizes = [1, 1], strides = [1, 1]} : vector<1x4xf32> to vector<1x1xf32>
    %cst_35 = arith.constant 0.000000e+00 : f32
    %179 = vector.broadcast %cst_35 : f32 to vector<1x1xf32>
    %180 = arith.subf %179, %178 : vector<1x1xf32>
    %181 = vector.broadcast %180 : vector<1x1xf32> to vector<8x8xf32>
    %182 = arith.mulf %170, %181 : vector<8x8xf32>
    %183 = math.exp %182 : vector<8x8xf32>
    %184 = arith.addf %139, %183 : vector<8x8xf32>
    %185 = vector.extract_strided_slice %6 {offsets = [0, 2], sizes = [1, 1], strides = [1, 1]} : vector<1x4xf32> to vector<1x1xf32>
    %cst_36 = arith.constant 0.000000e+00 : f32
    %186 = vector.broadcast %cst_36 : f32 to vector<1x1xf32>
    %187 = arith.subf %186, %185 : vector<1x1xf32>
    %188 = vector.broadcast %187 : vector<1x1xf32> to vector<8x8xf32>
    %189 = arith.mulf %170, %188 : vector<8x8xf32>
    %190 = math.exp %189 : vector<8x8xf32>
    %191 = arith.addf %146, %190 : vector<8x8xf32>
    %192 = vector.extract_strided_slice %6 {offsets = [0, 3], sizes = [1, 1], strides = [1, 1]} : vector<1x4xf32> to vector<1x1xf32>
    %cst_37 = arith.constant 0.000000e+00 : f32
    %193 = vector.broadcast %cst_37 : f32 to vector<1x1xf32>
    %194 = arith.subf %193, %192 : vector<1x1xf32>
    %195 = vector.broadcast %194 : vector<1x1xf32> to vector<8x8xf32>
    %196 = arith.mulf %170, %195 : vector<8x8xf32>
    %197 = math.exp %196 : vector<8x8xf32>
    %198 = arith.addf %153, %197 : vector<8x8xf32>
    %199 = vector.extract_strided_slice %3 {offsets = [0, 4], sizes = [8, 1], strides = [1, 1]} : vector<8x27xf32> to vector<8x1xf32>
    %200 = vector.broadcast %0 : vector<1x8xf32> to vector<8x8xf32>
    %201 = vector.broadcast %199 : vector<8x1xf32> to vector<8x8xf32>
    %202 = arith.addf %200, %201 : vector<8x8xf32>
    %203 = vector.extract_strided_slice %4 {offsets = [0, 4], sizes = [8, 1], strides = [1, 1]} : vector<8x27xf32> to vector<8x1xf32>
    %204 = vector.broadcast %1 : vector<1x8xf32> to vector<8x8xf32>
    %205 = vector.broadcast %203 : vector<8x1xf32> to vector<8x8xf32>
    %206 = arith.addf %204, %205 : vector<8x8xf32>
    %207 = vector.extract_strided_slice %5 {offsets = [0, 4], sizes = [8, 1], strides = [1, 1]} : vector<8x27xf32> to vector<8x1xf32>
    %208 = vector.broadcast %2 : vector<1x8xf32> to vector<8x8xf32>
    %209 = vector.broadcast %207 : vector<8x1xf32> to vector<8x8xf32>
    %210 = arith.addf %208, %209 : vector<8x8xf32>
    %211 = arith.mulf %202, %202 : vector<8x8xf32>
    %212 = arith.mulf %206, %206 : vector<8x8xf32>
    %213 = arith.addf %211, %212 : vector<8x8xf32>
    %214 = arith.mulf %210, %210 : vector<8x8xf32>
    %215 = arith.addf %213, %214 : vector<8x8xf32>
    %216 = vector.extract_strided_slice %6 {offsets = [0, 0], sizes = [1, 1], strides = [1, 1]} : vector<1x4xf32> to vector<1x1xf32>
    %cst_38 = arith.constant 0.000000e+00 : f32
    %217 = vector.broadcast %cst_38 : f32 to vector<1x1xf32>
    %218 = arith.subf %217, %216 : vector<1x1xf32>
    %219 = vector.broadcast %218 : vector<1x1xf32> to vector<8x8xf32>
    %220 = arith.mulf %215, %219 : vector<8x8xf32>
    %221 = math.exp %220 : vector<8x8xf32>
    %222 = arith.addf %177, %221 : vector<8x8xf32>
    %223 = vector.extract_strided_slice %6 {offsets = [0, 1], sizes = [1, 1], strides = [1, 1]} : vector<1x4xf32> to vector<1x1xf32>
    %cst_39 = arith.constant 0.000000e+00 : f32
    %224 = vector.broadcast %cst_39 : f32 to vector<1x1xf32>
    %225 = arith.subf %224, %223 : vector<1x1xf32>
    %226 = vector.broadcast %225 : vector<1x1xf32> to vector<8x8xf32>
    %227 = arith.mulf %215, %226 : vector<8x8xf32>
    %228 = math.exp %227 : vector<8x8xf32>
    %229 = arith.addf %184, %228 : vector<8x8xf32>
    %230 = vector.extract_strided_slice %6 {offsets = [0, 2], sizes = [1, 1], strides = [1, 1]} : vector<1x4xf32> to vector<1x1xf32>
    %cst_40 = arith.constant 0.000000e+00 : f32
    %231 = vector.broadcast %cst_40 : f32 to vector<1x1xf32>
    %232 = arith.subf %231, %230 : vector<1x1xf32>
    %233 = vector.broadcast %232 : vector<1x1xf32> to vector<8x8xf32>
    %234 = arith.mulf %215, %233 : vector<8x8xf32>
    %235 = math.exp %234 : vector<8x8xf32>
    %236 = arith.addf %191, %235 : vector<8x8xf32>
    %237 = vector.extract_strided_slice %6 {offsets = [0, 3], sizes = [1, 1], strides = [1, 1]} : vector<1x4xf32> to vector<1x1xf32>
    %cst_41 = arith.constant 0.000000e+00 : f32
    %238 = vector.broadcast %cst_41 : f32 to vector<1x1xf32>
    %239 = arith.subf %238, %237 : vector<1x1xf32>
    %240 = vector.broadcast %239 : vector<1x1xf32> to vector<8x8xf32>
    %241 = arith.mulf %215, %240 : vector<8x8xf32>
    %242 = math.exp %241 : vector<8x8xf32>
    %243 = arith.addf %198, %242 : vector<8x8xf32>
    %244 = vector.extract_strided_slice %3 {offsets = [0, 5], sizes = [8, 1], strides = [1, 1]} : vector<8x27xf32> to vector<8x1xf32>
    %245 = vector.broadcast %0 : vector<1x8xf32> to vector<8x8xf32>
    %246 = vector.broadcast %244 : vector<8x1xf32> to vector<8x8xf32>
    %247 = arith.addf %245, %246 : vector<8x8xf32>
    %248 = vector.extract_strided_slice %4 {offsets = [0, 5], sizes = [8, 1], strides = [1, 1]} : vector<8x27xf32> to vector<8x1xf32>
    %249 = vector.broadcast %1 : vector<1x8xf32> to vector<8x8xf32>
    %250 = vector.broadcast %248 : vector<8x1xf32> to vector<8x8xf32>
    %251 = arith.addf %249, %250 : vector<8x8xf32>
    %252 = vector.extract_strided_slice %5 {offsets = [0, 5], sizes = [8, 1], strides = [1, 1]} : vector<8x27xf32> to vector<8x1xf32>
    %253 = vector.broadcast %2 : vector<1x8xf32> to vector<8x8xf32>
    %254 = vector.broadcast %252 : vector<8x1xf32> to vector<8x8xf32>
    %255 = arith.addf %253, %254 : vector<8x8xf32>
    %256 = arith.mulf %247, %247 : vector<8x8xf32>
    %257 = arith.mulf %251, %251 : vector<8x8xf32>
    %258 = arith.addf %256, %257 : vector<8x8xf32>
    %259 = arith.mulf %255, %255 : vector<8x8xf32>
    %260 = arith.addf %258, %259 : vector<8x8xf32>
    %261 = vector.extract_strided_slice %6 {offsets = [0, 0], sizes = [1, 1], strides = [1, 1]} : vector<1x4xf32> to vector<1x1xf32>
    %cst_42 = arith.constant 0.000000e+00 : f32
    %262 = vector.broadcast %cst_42 : f32 to vector<1x1xf32>
    %263 = arith.subf %262, %261 : vector<1x1xf32>
    %264 = vector.broadcast %263 : vector<1x1xf32> to vector<8x8xf32>
    %265 = arith.mulf %260, %264 : vector<8x8xf32>
    %266 = math.exp %265 : vector<8x8xf32>
    %267 = arith.addf %222, %266 : vector<8x8xf32>
    %268 = vector.extract_strided_slice %6 {offsets = [0, 1], sizes = [1, 1], strides = [1, 1]} : vector<1x4xf32> to vector<1x1xf32>
    %cst_43 = arith.constant 0.000000e+00 : f32
    %269 = vector.broadcast %cst_43 : f32 to vector<1x1xf32>
    %270 = arith.subf %269, %268 : vector<1x1xf32>
    %271 = vector.broadcast %270 : vector<1x1xf32> to vector<8x8xf32>
    %272 = arith.mulf %260, %271 : vector<8x8xf32>
    %273 = math.exp %272 : vector<8x8xf32>
    %274 = arith.addf %229, %273 : vector<8x8xf32>
    %275 = vector.extract_strided_slice %6 {offsets = [0, 2], sizes = [1, 1], strides = [1, 1]} : vector<1x4xf32> to vector<1x1xf32>
    %cst_44 = arith.constant 0.000000e+00 : f32
    %276 = vector.broadcast %cst_44 : f32 to vector<1x1xf32>
    %277 = arith.subf %276, %275 : vector<1x1xf32>
    %278 = vector.broadcast %277 : vector<1x1xf32> to vector<8x8xf32>
    %279 = arith.mulf %260, %278 : vector<8x8xf32>
    %280 = math.exp %279 : vector<8x8xf32>
    %281 = arith.addf %236, %280 : vector<8x8xf32>
    %282 = vector.extract_strided_slice %6 {offsets = [0, 3], sizes = [1, 1], strides = [1, 1]} : vector<1x4xf32> to vector<1x1xf32>
    %cst_45 = arith.constant 0.000000e+00 : f32
    %283 = vector.broadcast %cst_45 : f32 to vector<1x1xf32>
    %284 = arith.subf %283, %282 : vector<1x1xf32>
    %285 = vector.broadcast %284 : vector<1x1xf32> to vector<8x8xf32>
    %286 = arith.mulf %260, %285 : vector<8x8xf32>
    %287 = math.exp %286 : vector<8x8xf32>
    %288 = arith.addf %243, %287 : vector<8x8xf32>
    %289 = vector.extract_strided_slice %3 {offsets = [0, 6], sizes = [8, 1], strides = [1, 1]} : vector<8x27xf32> to vector<8x1xf32>
    %290 = vector.broadcast %0 : vector<1x8xf32> to vector<8x8xf32>
    %291 = vector.broadcast %289 : vector<8x1xf32> to vector<8x8xf32>
    %292 = arith.addf %290, %291 : vector<8x8xf32>
    %293 = vector.extract_strided_slice %4 {offsets = [0, 6], sizes = [8, 1], strides = [1, 1]} : vector<8x27xf32> to vector<8x1xf32>
    %294 = vector.broadcast %1 : vector<1x8xf32> to vector<8x8xf32>
    %295 = vector.broadcast %293 : vector<8x1xf32> to vector<8x8xf32>
    %296 = arith.addf %294, %295 : vector<8x8xf32>
    %297 = vector.extract_strided_slice %5 {offsets = [0, 6], sizes = [8, 1], strides = [1, 1]} : vector<8x27xf32> to vector<8x1xf32>
    %298 = vector.broadcast %2 : vector<1x8xf32> to vector<8x8xf32>
    %299 = vector.broadcast %297 : vector<8x1xf32> to vector<8x8xf32>
    %300 = arith.addf %298, %299 : vector<8x8xf32>
    %301 = arith.mulf %292, %292 : vector<8x8xf32>
    %302 = arith.mulf %296, %296 : vector<8x8xf32>
    %303 = arith.addf %301, %302 : vector<8x8xf32>
    %304 = arith.mulf %300, %300 : vector<8x8xf32>
    %305 = arith.addf %303, %304 : vector<8x8xf32>
    %306 = vector.extract_strided_slice %6 {offsets = [0, 0], sizes = [1, 1], strides = [1, 1]} : vector<1x4xf32> to vector<1x1xf32>
    %cst_46 = arith.constant 0.000000e+00 : f32
    %307 = vector.broadcast %cst_46 : f32 to vector<1x1xf32>
    %308 = arith.subf %307, %306 : vector<1x1xf32>
    %309 = vector.broadcast %308 : vector<1x1xf32> to vector<8x8xf32>
    %310 = arith.mulf %305, %309 : vector<8x8xf32>
    %311 = math.exp %310 : vector<8x8xf32>
    %312 = arith.addf %267, %311 : vector<8x8xf32>
    %313 = vector.extract_strided_slice %6 {offsets = [0, 1], sizes = [1, 1], strides = [1, 1]} : vector<1x4xf32> to vector<1x1xf32>
    %cst_47 = arith.constant 0.000000e+00 : f32
    %314 = vector.broadcast %cst_47 : f32 to vector<1x1xf32>
    %315 = arith.subf %314, %313 : vector<1x1xf32>
    %316 = vector.broadcast %315 : vector<1x1xf32> to vector<8x8xf32>
    %317 = arith.mulf %305, %316 : vector<8x8xf32>
    %318 = math.exp %317 : vector<8x8xf32>
    %319 = arith.addf %274, %318 : vector<8x8xf32>
    %320 = vector.extract_strided_slice %6 {offsets = [0, 2], sizes = [1, 1], strides = [1, 1]} : vector<1x4xf32> to vector<1x1xf32>
    %cst_48 = arith.constant 0.000000e+00 : f32
    %321 = vector.broadcast %cst_48 : f32 to vector<1x1xf32>
    %322 = arith.subf %321, %320 : vector<1x1xf32>
    %323 = vector.broadcast %322 : vector<1x1xf32> to vector<8x8xf32>
    %324 = arith.mulf %305, %323 : vector<8x8xf32>
    %325 = math.exp %324 : vector<8x8xf32>
    %326 = arith.addf %281, %325 : vector<8x8xf32>
    %327 = vector.extract_strided_slice %6 {offsets = [0, 3], sizes = [1, 1], strides = [1, 1]} : vector<1x4xf32> to vector<1x1xf32>
    %cst_49 = arith.constant 0.000000e+00 : f32
    %328 = vector.broadcast %cst_49 : f32 to vector<1x1xf32>
    %329 = arith.subf %328, %327 : vector<1x1xf32>
    %330 = vector.broadcast %329 : vector<1x1xf32> to vector<8x8xf32>
    %331 = arith.mulf %305, %330 : vector<8x8xf32>
    %332 = math.exp %331 : vector<8x8xf32>
    %333 = arith.addf %288, %332 : vector<8x8xf32>
    %334 = vector.extract_strided_slice %3 {offsets = [0, 7], sizes = [8, 1], strides = [1, 1]} : vector<8x27xf32> to vector<8x1xf32>
    %335 = vector.broadcast %0 : vector<1x8xf32> to vector<8x8xf32>
    %336 = vector.broadcast %334 : vector<8x1xf32> to vector<8x8xf32>
    %337 = arith.addf %335, %336 : vector<8x8xf32>
    %338 = vector.extract_strided_slice %4 {offsets = [0, 7], sizes = [8, 1], strides = [1, 1]} : vector<8x27xf32> to vector<8x1xf32>
    %339 = vector.broadcast %1 : vector<1x8xf32> to vector<8x8xf32>
    %340 = vector.broadcast %338 : vector<8x1xf32> to vector<8x8xf32>
    %341 = arith.addf %339, %340 : vector<8x8xf32>
    %342 = vector.extract_strided_slice %5 {offsets = [0, 7], sizes = [8, 1], strides = [1, 1]} : vector<8x27xf32> to vector<8x1xf32>
    %343 = vector.broadcast %2 : vector<1x8xf32> to vector<8x8xf32>
    %344 = vector.broadcast %342 : vector<8x1xf32> to vector<8x8xf32>
    %345 = arith.addf %343, %344 : vector<8x8xf32>
    %346 = arith.mulf %337, %337 : vector<8x8xf32>
    %347 = arith.mulf %341, %341 : vector<8x8xf32>
    %348 = arith.addf %346, %347 : vector<8x8xf32>
    %349 = arith.mulf %345, %345 : vector<8x8xf32>
    %350 = arith.addf %348, %349 : vector<8x8xf32>
    %351 = vector.extract_strided_slice %6 {offsets = [0, 0], sizes = [1, 1], strides = [1, 1]} : vector<1x4xf32> to vector<1x1xf32>
    %cst_50 = arith.constant 0.000000e+00 : f32
    %352 = vector.broadcast %cst_50 : f32 to vector<1x1xf32>
    %353 = arith.subf %352, %351 : vector<1x1xf32>
    %354 = vector.broadcast %353 : vector<1x1xf32> to vector<8x8xf32>
    %355 = arith.mulf %350, %354 : vector<8x8xf32>
    %356 = math.exp %355 : vector<8x8xf32>
    %357 = arith.addf %312, %356 : vector<8x8xf32>
    %358 = vector.extract_strided_slice %6 {offsets = [0, 1], sizes = [1, 1], strides = [1, 1]} : vector<1x4xf32> to vector<1x1xf32>
    %cst_51 = arith.constant 0.000000e+00 : f32
    %359 = vector.broadcast %cst_51 : f32 to vector<1x1xf32>
    %360 = arith.subf %359, %358 : vector<1x1xf32>
    %361 = vector.broadcast %360 : vector<1x1xf32> to vector<8x8xf32>
    %362 = arith.mulf %350, %361 : vector<8x8xf32>
    %363 = math.exp %362 : vector<8x8xf32>
    %364 = arith.addf %319, %363 : vector<8x8xf32>
    %365 = vector.extract_strided_slice %6 {offsets = [0, 2], sizes = [1, 1], strides = [1, 1]} : vector<1x4xf32> to vector<1x1xf32>
    %cst_52 = arith.constant 0.000000e+00 : f32
    %366 = vector.broadcast %cst_52 : f32 to vector<1x1xf32>
    %367 = arith.subf %366, %365 : vector<1x1xf32>
    %368 = vector.broadcast %367 : vector<1x1xf32> to vector<8x8xf32>
    %369 = arith.mulf %350, %368 : vector<8x8xf32>
    %370 = math.exp %369 : vector<8x8xf32>
    %371 = arith.addf %326, %370 : vector<8x8xf32>
    %372 = vector.extract_strided_slice %6 {offsets = [0, 3], sizes = [1, 1], strides = [1, 1]} : vector<1x4xf32> to vector<1x1xf32>
    %cst_53 = arith.constant 0.000000e+00 : f32
    %373 = vector.broadcast %cst_53 : f32 to vector<1x1xf32>
    %374 = arith.subf %373, %372 : vector<1x1xf32>
    %375 = vector.broadcast %374 : vector<1x1xf32> to vector<8x8xf32>
    %376 = arith.mulf %350, %375 : vector<8x8xf32>
    %377 = math.exp %376 : vector<8x8xf32>
    %378 = arith.addf %333, %377 : vector<8x8xf32>
    %379 = vector.extract_strided_slice %3 {offsets = [0, 8], sizes = [8, 1], strides = [1, 1]} : vector<8x27xf32> to vector<8x1xf32>
    %380 = vector.broadcast %0 : vector<1x8xf32> to vector<8x8xf32>
    %381 = vector.broadcast %379 : vector<8x1xf32> to vector<8x8xf32>
    %382 = arith.addf %380, %381 : vector<8x8xf32>
    %383 = vector.extract_strided_slice %4 {offsets = [0, 8], sizes = [8, 1], strides = [1, 1]} : vector<8x27xf32> to vector<8x1xf32>
    %384 = vector.broadcast %1 : vector<1x8xf32> to vector<8x8xf32>
    %385 = vector.broadcast %383 : vector<8x1xf32> to vector<8x8xf32>
    %386 = arith.addf %384, %385 : vector<8x8xf32>
    %387 = vector.extract_strided_slice %5 {offsets = [0, 8], sizes = [8, 1], strides = [1, 1]} : vector<8x27xf32> to vector<8x1xf32>
    %388 = vector.broadcast %2 : vector<1x8xf32> to vector<8x8xf32>
    %389 = vector.broadcast %387 : vector<8x1xf32> to vector<8x8xf32>
    %390 = arith.addf %388, %389 : vector<8x8xf32>
    %391 = arith.mulf %382, %382 : vector<8x8xf32>
    %392 = arith.mulf %386, %386 : vector<8x8xf32>
    %393 = arith.addf %391, %392 : vector<8x8xf32>
    %394 = arith.mulf %390, %390 : vector<8x8xf32>
    %395 = arith.addf %393, %394 : vector<8x8xf32>
    %396 = vector.extract_strided_slice %6 {offsets = [0, 0], sizes = [1, 1], strides = [1, 1]} : vector<1x4xf32> to vector<1x1xf32>
    %cst_54 = arith.constant 0.000000e+00 : f32
    %397 = vector.broadcast %cst_54 : f32 to vector<1x1xf32>
    %398 = arith.subf %397, %396 : vector<1x1xf32>
    %399 = vector.broadcast %398 : vector<1x1xf32> to vector<8x8xf32>
    %400 = arith.mulf %395, %399 : vector<8x8xf32>
    %401 = math.exp %400 : vector<8x8xf32>
    %402 = arith.addf %357, %401 : vector<8x8xf32>
    %403 = vector.extract_strided_slice %6 {offsets = [0, 1], sizes = [1, 1], strides = [1, 1]} : vector<1x4xf32> to vector<1x1xf32>
    %cst_55 = arith.constant 0.000000e+00 : f32
    %404 = vector.broadcast %cst_55 : f32 to vector<1x1xf32>
    %405 = arith.subf %404, %403 : vector<1x1xf32>
    %406 = vector.broadcast %405 : vector<1x1xf32> to vector<8x8xf32>
    %407 = arith.mulf %395, %406 : vector<8x8xf32>
    %408 = math.exp %407 : vector<8x8xf32>
    %409 = arith.addf %364, %408 : vector<8x8xf32>
    %410 = vector.extract_strided_slice %6 {offsets = [0, 2], sizes = [1, 1], strides = [1, 1]} : vector<1x4xf32> to vector<1x1xf32>
    %cst_56 = arith.constant 0.000000e+00 : f32
    %411 = vector.broadcast %cst_56 : f32 to vector<1x1xf32>
    %412 = arith.subf %411, %410 : vector<1x1xf32>
    %413 = vector.broadcast %412 : vector<1x1xf32> to vector<8x8xf32>
    %414 = arith.mulf %395, %413 : vector<8x8xf32>
    %415 = math.exp %414 : vector<8x8xf32>
    %416 = arith.addf %371, %415 : vector<8x8xf32>
    %417 = vector.extract_strided_slice %6 {offsets = [0, 3], sizes = [1, 1], strides = [1, 1]} : vector<1x4xf32> to vector<1x1xf32>
    %cst_57 = arith.constant 0.000000e+00 : f32
    %418 = vector.broadcast %cst_57 : f32 to vector<1x1xf32>
    %419 = arith.subf %418, %417 : vector<1x1xf32>
    %420 = vector.broadcast %419 : vector<1x1xf32> to vector<8x8xf32>
    %421 = arith.mulf %395, %420 : vector<8x8xf32>
    %422 = math.exp %421 : vector<8x8xf32>
    %423 = arith.addf %378, %422 : vector<8x8xf32>
    %424 = vector.extract_strided_slice %3 {offsets = [0, 9], sizes = [8, 1], strides = [1, 1]} : vector<8x27xf32> to vector<8x1xf32>
    %425 = vector.broadcast %0 : vector<1x8xf32> to vector<8x8xf32>
    %426 = vector.broadcast %424 : vector<8x1xf32> to vector<8x8xf32>
    %427 = arith.addf %425, %426 : vector<8x8xf32>
    %428 = vector.extract_strided_slice %4 {offsets = [0, 9], sizes = [8, 1], strides = [1, 1]} : vector<8x27xf32> to vector<8x1xf32>
    %429 = vector.broadcast %1 : vector<1x8xf32> to vector<8x8xf32>
    %430 = vector.broadcast %428 : vector<8x1xf32> to vector<8x8xf32>
    %431 = arith.addf %429, %430 : vector<8x8xf32>
    %432 = vector.extract_strided_slice %5 {offsets = [0, 9], sizes = [8, 1], strides = [1, 1]} : vector<8x27xf32> to vector<8x1xf32>
    %433 = vector.broadcast %2 : vector<1x8xf32> to vector<8x8xf32>
    %434 = vector.broadcast %432 : vector<8x1xf32> to vector<8x8xf32>
    %435 = arith.addf %433, %434 : vector<8x8xf32>
    %436 = arith.mulf %427, %427 : vector<8x8xf32>
    %437 = arith.mulf %431, %431 : vector<8x8xf32>
    %438 = arith.addf %436, %437 : vector<8x8xf32>
    %439 = arith.mulf %435, %435 : vector<8x8xf32>
    %440 = arith.addf %438, %439 : vector<8x8xf32>
    %441 = vector.extract_strided_slice %6 {offsets = [0, 0], sizes = [1, 1], strides = [1, 1]} : vector<1x4xf32> to vector<1x1xf32>
    %cst_58 = arith.constant 0.000000e+00 : f32
    %442 = vector.broadcast %cst_58 : f32 to vector<1x1xf32>
    %443 = arith.subf %442, %441 : vector<1x1xf32>
    %444 = vector.broadcast %443 : vector<1x1xf32> to vector<8x8xf32>
    %445 = arith.mulf %440, %444 : vector<8x8xf32>
    %446 = math.exp %445 : vector<8x8xf32>
    %447 = arith.addf %402, %446 : vector<8x8xf32>
    %448 = vector.extract_strided_slice %6 {offsets = [0, 1], sizes = [1, 1], strides = [1, 1]} : vector<1x4xf32> to vector<1x1xf32>
    %cst_59 = arith.constant 0.000000e+00 : f32
    %449 = vector.broadcast %cst_59 : f32 to vector<1x1xf32>
    %450 = arith.subf %449, %448 : vector<1x1xf32>
    %451 = vector.broadcast %450 : vector<1x1xf32> to vector<8x8xf32>
    %452 = arith.mulf %440, %451 : vector<8x8xf32>
    %453 = math.exp %452 : vector<8x8xf32>
    %454 = arith.addf %409, %453 : vector<8x8xf32>
    %455 = vector.extract_strided_slice %6 {offsets = [0, 2], sizes = [1, 1], strides = [1, 1]} : vector<1x4xf32> to vector<1x1xf32>
    %cst_60 = arith.constant 0.000000e+00 : f32
    %456 = vector.broadcast %cst_60 : f32 to vector<1x1xf32>
    %457 = arith.subf %456, %455 : vector<1x1xf32>
    %458 = vector.broadcast %457 : vector<1x1xf32> to vector<8x8xf32>
    %459 = arith.mulf %440, %458 : vector<8x8xf32>
    %460 = math.exp %459 : vector<8x8xf32>
    %461 = arith.addf %416, %460 : vector<8x8xf32>
    %462 = vector.extract_strided_slice %6 {offsets = [0, 3], sizes = [1, 1], strides = [1, 1]} : vector<1x4xf32> to vector<1x1xf32>
    %cst_61 = arith.constant 0.000000e+00 : f32
    %463 = vector.broadcast %cst_61 : f32 to vector<1x1xf32>
    %464 = arith.subf %463, %462 : vector<1x1xf32>
    %465 = vector.broadcast %464 : vector<1x1xf32> to vector<8x8xf32>
    %466 = arith.mulf %440, %465 : vector<8x8xf32>
    %467 = math.exp %466 : vector<8x8xf32>
    %468 = arith.addf %423, %467 : vector<8x8xf32>
    %469 = vector.extract_strided_slice %3 {offsets = [0, 10], sizes = [8, 1], strides = [1, 1]} : vector<8x27xf32> to vector<8x1xf32>
    %470 = vector.broadcast %0 : vector<1x8xf32> to vector<8x8xf32>
    %471 = vector.broadcast %469 : vector<8x1xf32> to vector<8x8xf32>
    %472 = arith.addf %470, %471 : vector<8x8xf32>
    %473 = vector.extract_strided_slice %4 {offsets = [0, 10], sizes = [8, 1], strides = [1, 1]} : vector<8x27xf32> to vector<8x1xf32>
    %474 = vector.broadcast %1 : vector<1x8xf32> to vector<8x8xf32>
    %475 = vector.broadcast %473 : vector<8x1xf32> to vector<8x8xf32>
    %476 = arith.addf %474, %475 : vector<8x8xf32>
    %477 = vector.extract_strided_slice %5 {offsets = [0, 10], sizes = [8, 1], strides = [1, 1]} : vector<8x27xf32> to vector<8x1xf32>
    %478 = vector.broadcast %2 : vector<1x8xf32> to vector<8x8xf32>
    %479 = vector.broadcast %477 : vector<8x1xf32> to vector<8x8xf32>
    %480 = arith.addf %478, %479 : vector<8x8xf32>
    %481 = arith.mulf %472, %472 : vector<8x8xf32>
    %482 = arith.mulf %476, %476 : vector<8x8xf32>
    %483 = arith.addf %481, %482 : vector<8x8xf32>
    %484 = arith.mulf %480, %480 : vector<8x8xf32>
    %485 = arith.addf %483, %484 : vector<8x8xf32>
    %486 = vector.extract_strided_slice %6 {offsets = [0, 0], sizes = [1, 1], strides = [1, 1]} : vector<1x4xf32> to vector<1x1xf32>
    %cst_62 = arith.constant 0.000000e+00 : f32
    %487 = vector.broadcast %cst_62 : f32 to vector<1x1xf32>
    %488 = arith.subf %487, %486 : vector<1x1xf32>
    %489 = vector.broadcast %488 : vector<1x1xf32> to vector<8x8xf32>
    %490 = arith.mulf %485, %489 : vector<8x8xf32>
    %491 = math.exp %490 : vector<8x8xf32>
    %492 = arith.addf %447, %491 : vector<8x8xf32>
    %493 = vector.extract_strided_slice %6 {offsets = [0, 1], sizes = [1, 1], strides = [1, 1]} : vector<1x4xf32> to vector<1x1xf32>
    %cst_63 = arith.constant 0.000000e+00 : f32
    %494 = vector.broadcast %cst_63 : f32 to vector<1x1xf32>
    %495 = arith.subf %494, %493 : vector<1x1xf32>
    %496 = vector.broadcast %495 : vector<1x1xf32> to vector<8x8xf32>
    %497 = arith.mulf %485, %496 : vector<8x8xf32>
    %498 = math.exp %497 : vector<8x8xf32>
    %499 = arith.addf %454, %498 : vector<8x8xf32>
    %500 = vector.extract_strided_slice %6 {offsets = [0, 2], sizes = [1, 1], strides = [1, 1]} : vector<1x4xf32> to vector<1x1xf32>
    %cst_64 = arith.constant 0.000000e+00 : f32
    %501 = vector.broadcast %cst_64 : f32 to vector<1x1xf32>
    %502 = arith.subf %501, %500 : vector<1x1xf32>
    %503 = vector.broadcast %502 : vector<1x1xf32> to vector<8x8xf32>
    %504 = arith.mulf %485, %503 : vector<8x8xf32>
    %505 = math.exp %504 : vector<8x8xf32>
    %506 = arith.addf %461, %505 : vector<8x8xf32>
    %507 = vector.extract_strided_slice %6 {offsets = [0, 3], sizes = [1, 1], strides = [1, 1]} : vector<1x4xf32> to vector<1x1xf32>
    %cst_65 = arith.constant 0.000000e+00 : f32
    %508 = vector.broadcast %cst_65 : f32 to vector<1x1xf32>
    %509 = arith.subf %508, %507 : vector<1x1xf32>
    %510 = vector.broadcast %509 : vector<1x1xf32> to vector<8x8xf32>
    %511 = arith.mulf %485, %510 : vector<8x8xf32>
    %512 = math.exp %511 : vector<8x8xf32>
    %513 = arith.addf %468, %512 : vector<8x8xf32>
    %514 = vector.extract_strided_slice %3 {offsets = [0, 11], sizes = [8, 1], strides = [1, 1]} : vector<8x27xf32> to vector<8x1xf32>
    %515 = vector.broadcast %0 : vector<1x8xf32> to vector<8x8xf32>
    %516 = vector.broadcast %514 : vector<8x1xf32> to vector<8x8xf32>
    %517 = arith.addf %515, %516 : vector<8x8xf32>
    %518 = vector.extract_strided_slice %4 {offsets = [0, 11], sizes = [8, 1], strides = [1, 1]} : vector<8x27xf32> to vector<8x1xf32>
    %519 = vector.broadcast %1 : vector<1x8xf32> to vector<8x8xf32>
    %520 = vector.broadcast %518 : vector<8x1xf32> to vector<8x8xf32>
    %521 = arith.addf %519, %520 : vector<8x8xf32>
    %522 = vector.extract_strided_slice %5 {offsets = [0, 11], sizes = [8, 1], strides = [1, 1]} : vector<8x27xf32> to vector<8x1xf32>
    %523 = vector.broadcast %2 : vector<1x8xf32> to vector<8x8xf32>
    %524 = vector.broadcast %522 : vector<8x1xf32> to vector<8x8xf32>
    %525 = arith.addf %523, %524 : vector<8x8xf32>
    %526 = arith.mulf %517, %517 : vector<8x8xf32>
    %527 = arith.mulf %521, %521 : vector<8x8xf32>
    %528 = arith.addf %526, %527 : vector<8x8xf32>
    %529 = arith.mulf %525, %525 : vector<8x8xf32>
    %530 = arith.addf %528, %529 : vector<8x8xf32>
    %531 = vector.extract_strided_slice %6 {offsets = [0, 0], sizes = [1, 1], strides = [1, 1]} : vector<1x4xf32> to vector<1x1xf32>
    %cst_66 = arith.constant 0.000000e+00 : f32
    %532 = vector.broadcast %cst_66 : f32 to vector<1x1xf32>
    %533 = arith.subf %532, %531 : vector<1x1xf32>
    %534 = vector.broadcast %533 : vector<1x1xf32> to vector<8x8xf32>
    %535 = arith.mulf %530, %534 : vector<8x8xf32>
    %536 = math.exp %535 : vector<8x8xf32>
    %537 = arith.addf %492, %536 : vector<8x8xf32>
    %538 = vector.extract_strided_slice %6 {offsets = [0, 1], sizes = [1, 1], strides = [1, 1]} : vector<1x4xf32> to vector<1x1xf32>
    %cst_67 = arith.constant 0.000000e+00 : f32
    %539 = vector.broadcast %cst_67 : f32 to vector<1x1xf32>
    %540 = arith.subf %539, %538 : vector<1x1xf32>
    %541 = vector.broadcast %540 : vector<1x1xf32> to vector<8x8xf32>
    %542 = arith.mulf %530, %541 : vector<8x8xf32>
    %543 = math.exp %542 : vector<8x8xf32>
    %544 = arith.addf %499, %543 : vector<8x8xf32>
    %545 = vector.extract_strided_slice %6 {offsets = [0, 2], sizes = [1, 1], strides = [1, 1]} : vector<1x4xf32> to vector<1x1xf32>
    %cst_68 = arith.constant 0.000000e+00 : f32
    %546 = vector.broadcast %cst_68 : f32 to vector<1x1xf32>
    %547 = arith.subf %546, %545 : vector<1x1xf32>
    %548 = vector.broadcast %547 : vector<1x1xf32> to vector<8x8xf32>
    %549 = arith.mulf %530, %548 : vector<8x8xf32>
    %550 = math.exp %549 : vector<8x8xf32>
    %551 = arith.addf %506, %550 : vector<8x8xf32>
    %552 = vector.extract_strided_slice %6 {offsets = [0, 3], sizes = [1, 1], strides = [1, 1]} : vector<1x4xf32> to vector<1x1xf32>
    %cst_69 = arith.constant 0.000000e+00 : f32
    %553 = vector.broadcast %cst_69 : f32 to vector<1x1xf32>
    %554 = arith.subf %553, %552 : vector<1x1xf32>
    %555 = vector.broadcast %554 : vector<1x1xf32> to vector<8x8xf32>
    %556 = arith.mulf %530, %555 : vector<8x8xf32>
    %557 = math.exp %556 : vector<8x8xf32>
    %558 = arith.addf %513, %557 : vector<8x8xf32>
    %559 = vector.extract_strided_slice %3 {offsets = [0, 12], sizes = [8, 1], strides = [1, 1]} : vector<8x27xf32> to vector<8x1xf32>
    %560 = vector.broadcast %0 : vector<1x8xf32> to vector<8x8xf32>
    %561 = vector.broadcast %559 : vector<8x1xf32> to vector<8x8xf32>
    %562 = arith.addf %560, %561 : vector<8x8xf32>
    %563 = vector.extract_strided_slice %4 {offsets = [0, 12], sizes = [8, 1], strides = [1, 1]} : vector<8x27xf32> to vector<8x1xf32>
    %564 = vector.broadcast %1 : vector<1x8xf32> to vector<8x8xf32>
    %565 = vector.broadcast %563 : vector<8x1xf32> to vector<8x8xf32>
    %566 = arith.addf %564, %565 : vector<8x8xf32>
    %567 = vector.extract_strided_slice %5 {offsets = [0, 12], sizes = [8, 1], strides = [1, 1]} : vector<8x27xf32> to vector<8x1xf32>
    %568 = vector.broadcast %2 : vector<1x8xf32> to vector<8x8xf32>
    %569 = vector.broadcast %567 : vector<8x1xf32> to vector<8x8xf32>
    %570 = arith.addf %568, %569 : vector<8x8xf32>
    %571 = arith.mulf %562, %562 : vector<8x8xf32>
    %572 = arith.mulf %566, %566 : vector<8x8xf32>
    %573 = arith.addf %571, %572 : vector<8x8xf32>
    %574 = arith.mulf %570, %570 : vector<8x8xf32>
    %575 = arith.addf %573, %574 : vector<8x8xf32>
    %576 = vector.extract_strided_slice %6 {offsets = [0, 0], sizes = [1, 1], strides = [1, 1]} : vector<1x4xf32> to vector<1x1xf32>
    %cst_70 = arith.constant 0.000000e+00 : f32
    %577 = vector.broadcast %cst_70 : f32 to vector<1x1xf32>
    %578 = arith.subf %577, %576 : vector<1x1xf32>
    %579 = vector.broadcast %578 : vector<1x1xf32> to vector<8x8xf32>
    %580 = arith.mulf %575, %579 : vector<8x8xf32>
    %581 = math.exp %580 : vector<8x8xf32>
    %582 = arith.addf %537, %581 : vector<8x8xf32>
    %583 = vector.extract_strided_slice %6 {offsets = [0, 1], sizes = [1, 1], strides = [1, 1]} : vector<1x4xf32> to vector<1x1xf32>
    %cst_71 = arith.constant 0.000000e+00 : f32
    %584 = vector.broadcast %cst_71 : f32 to vector<1x1xf32>
    %585 = arith.subf %584, %583 : vector<1x1xf32>
    %586 = vector.broadcast %585 : vector<1x1xf32> to vector<8x8xf32>
    %587 = arith.mulf %575, %586 : vector<8x8xf32>
    %588 = math.exp %587 : vector<8x8xf32>
    %589 = arith.addf %544, %588 : vector<8x8xf32>
    %590 = vector.extract_strided_slice %6 {offsets = [0, 2], sizes = [1, 1], strides = [1, 1]} : vector<1x4xf32> to vector<1x1xf32>
    %cst_72 = arith.constant 0.000000e+00 : f32
    %591 = vector.broadcast %cst_72 : f32 to vector<1x1xf32>
    %592 = arith.subf %591, %590 : vector<1x1xf32>
    %593 = vector.broadcast %592 : vector<1x1xf32> to vector<8x8xf32>
    %594 = arith.mulf %575, %593 : vector<8x8xf32>
    %595 = math.exp %594 : vector<8x8xf32>
    %596 = arith.addf %551, %595 : vector<8x8xf32>
    %597 = vector.extract_strided_slice %6 {offsets = [0, 3], sizes = [1, 1], strides = [1, 1]} : vector<1x4xf32> to vector<1x1xf32>
    %cst_73 = arith.constant 0.000000e+00 : f32
    %598 = vector.broadcast %cst_73 : f32 to vector<1x1xf32>
    %599 = arith.subf %598, %597 : vector<1x1xf32>
    %600 = vector.broadcast %599 : vector<1x1xf32> to vector<8x8xf32>
    %601 = arith.mulf %575, %600 : vector<8x8xf32>
    %602 = math.exp %601 : vector<8x8xf32>
    %603 = arith.addf %558, %602 : vector<8x8xf32>
    %604 = vector.extract_strided_slice %3 {offsets = [0, 13], sizes = [8, 1], strides = [1, 1]} : vector<8x27xf32> to vector<8x1xf32>
    %605 = vector.broadcast %0 : vector<1x8xf32> to vector<8x8xf32>
    %606 = vector.broadcast %604 : vector<8x1xf32> to vector<8x8xf32>
    %607 = arith.addf %605, %606 : vector<8x8xf32>
    %608 = vector.extract_strided_slice %4 {offsets = [0, 13], sizes = [8, 1], strides = [1, 1]} : vector<8x27xf32> to vector<8x1xf32>
    %609 = vector.broadcast %1 : vector<1x8xf32> to vector<8x8xf32>
    %610 = vector.broadcast %608 : vector<8x1xf32> to vector<8x8xf32>
    %611 = arith.addf %609, %610 : vector<8x8xf32>
    %612 = vector.extract_strided_slice %5 {offsets = [0, 13], sizes = [8, 1], strides = [1, 1]} : vector<8x27xf32> to vector<8x1xf32>
    %613 = vector.broadcast %2 : vector<1x8xf32> to vector<8x8xf32>
    %614 = vector.broadcast %612 : vector<8x1xf32> to vector<8x8xf32>
    %615 = arith.addf %613, %614 : vector<8x8xf32>
    %616 = arith.mulf %607, %607 : vector<8x8xf32>
    %617 = arith.mulf %611, %611 : vector<8x8xf32>
    %618 = arith.addf %616, %617 : vector<8x8xf32>
    %619 = arith.mulf %615, %615 : vector<8x8xf32>
    %620 = arith.addf %618, %619 : vector<8x8xf32>
    %621 = vector.extract_strided_slice %6 {offsets = [0, 0], sizes = [1, 1], strides = [1, 1]} : vector<1x4xf32> to vector<1x1xf32>
    %cst_74 = arith.constant 0.000000e+00 : f32
    %622 = vector.broadcast %cst_74 : f32 to vector<1x1xf32>
    %623 = arith.subf %622, %621 : vector<1x1xf32>
    %624 = vector.broadcast %623 : vector<1x1xf32> to vector<8x8xf32>
    %625 = arith.mulf %620, %624 : vector<8x8xf32>
    %626 = math.exp %625 : vector<8x8xf32>
    %627 = arith.addf %582, %626 : vector<8x8xf32>
    %628 = vector.extract_strided_slice %6 {offsets = [0, 1], sizes = [1, 1], strides = [1, 1]} : vector<1x4xf32> to vector<1x1xf32>
    %cst_75 = arith.constant 0.000000e+00 : f32
    %629 = vector.broadcast %cst_75 : f32 to vector<1x1xf32>
    %630 = arith.subf %629, %628 : vector<1x1xf32>
    %631 = vector.broadcast %630 : vector<1x1xf32> to vector<8x8xf32>
    %632 = arith.mulf %620, %631 : vector<8x8xf32>
    %633 = math.exp %632 : vector<8x8xf32>
    %634 = arith.addf %589, %633 : vector<8x8xf32>
    %635 = vector.extract_strided_slice %6 {offsets = [0, 2], sizes = [1, 1], strides = [1, 1]} : vector<1x4xf32> to vector<1x1xf32>
    %cst_76 = arith.constant 0.000000e+00 : f32
    %636 = vector.broadcast %cst_76 : f32 to vector<1x1xf32>
    %637 = arith.subf %636, %635 : vector<1x1xf32>
    %638 = vector.broadcast %637 : vector<1x1xf32> to vector<8x8xf32>
    %639 = arith.mulf %620, %638 : vector<8x8xf32>
    %640 = math.exp %639 : vector<8x8xf32>
    %641 = arith.addf %596, %640 : vector<8x8xf32>
    %642 = vector.extract_strided_slice %6 {offsets = [0, 3], sizes = [1, 1], strides = [1, 1]} : vector<1x4xf32> to vector<1x1xf32>
    %cst_77 = arith.constant 0.000000e+00 : f32
    %643 = vector.broadcast %cst_77 : f32 to vector<1x1xf32>
    %644 = arith.subf %643, %642 : vector<1x1xf32>
    %645 = vector.broadcast %644 : vector<1x1xf32> to vector<8x8xf32>
    %646 = arith.mulf %620, %645 : vector<8x8xf32>
    %647 = math.exp %646 : vector<8x8xf32>
    %648 = arith.addf %603, %647 : vector<8x8xf32>
    %649 = vector.extract_strided_slice %3 {offsets = [0, 14], sizes = [8, 1], strides = [1, 1]} : vector<8x27xf32> to vector<8x1xf32>
    %650 = vector.broadcast %0 : vector<1x8xf32> to vector<8x8xf32>
    %651 = vector.broadcast %649 : vector<8x1xf32> to vector<8x8xf32>
    %652 = arith.addf %650, %651 : vector<8x8xf32>
    %653 = vector.extract_strided_slice %4 {offsets = [0, 14], sizes = [8, 1], strides = [1, 1]} : vector<8x27xf32> to vector<8x1xf32>
    %654 = vector.broadcast %1 : vector<1x8xf32> to vector<8x8xf32>
    %655 = vector.broadcast %653 : vector<8x1xf32> to vector<8x8xf32>
    %656 = arith.addf %654, %655 : vector<8x8xf32>
    %657 = vector.extract_strided_slice %5 {offsets = [0, 14], sizes = [8, 1], strides = [1, 1]} : vector<8x27xf32> to vector<8x1xf32>
    %658 = vector.broadcast %2 : vector<1x8xf32> to vector<8x8xf32>
    %659 = vector.broadcast %657 : vector<8x1xf32> to vector<8x8xf32>
    %660 = arith.addf %658, %659 : vector<8x8xf32>
    %661 = arith.mulf %652, %652 : vector<8x8xf32>
    %662 = arith.mulf %656, %656 : vector<8x8xf32>
    %663 = arith.addf %661, %662 : vector<8x8xf32>
    %664 = arith.mulf %660, %660 : vector<8x8xf32>
    %665 = arith.addf %663, %664 : vector<8x8xf32>
    %666 = vector.extract_strided_slice %6 {offsets = [0, 0], sizes = [1, 1], strides = [1, 1]} : vector<1x4xf32> to vector<1x1xf32>
    %cst_78 = arith.constant 0.000000e+00 : f32
    %667 = vector.broadcast %cst_78 : f32 to vector<1x1xf32>
    %668 = arith.subf %667, %666 : vector<1x1xf32>
    %669 = vector.broadcast %668 : vector<1x1xf32> to vector<8x8xf32>
    %670 = arith.mulf %665, %669 : vector<8x8xf32>
    %671 = math.exp %670 : vector<8x8xf32>
    %672 = arith.addf %627, %671 : vector<8x8xf32>
    %673 = vector.extract_strided_slice %6 {offsets = [0, 1], sizes = [1, 1], strides = [1, 1]} : vector<1x4xf32> to vector<1x1xf32>
    %cst_79 = arith.constant 0.000000e+00 : f32
    %674 = vector.broadcast %cst_79 : f32 to vector<1x1xf32>
    %675 = arith.subf %674, %673 : vector<1x1xf32>
    %676 = vector.broadcast %675 : vector<1x1xf32> to vector<8x8xf32>
    %677 = arith.mulf %665, %676 : vector<8x8xf32>
    %678 = math.exp %677 : vector<8x8xf32>
    %679 = arith.addf %634, %678 : vector<8x8xf32>
    %680 = vector.extract_strided_slice %6 {offsets = [0, 2], sizes = [1, 1], strides = [1, 1]} : vector<1x4xf32> to vector<1x1xf32>
    %cst_80 = arith.constant 0.000000e+00 : f32
    %681 = vector.broadcast %cst_80 : f32 to vector<1x1xf32>
    %682 = arith.subf %681, %680 : vector<1x1xf32>
    %683 = vector.broadcast %682 : vector<1x1xf32> to vector<8x8xf32>
    %684 = arith.mulf %665, %683 : vector<8x8xf32>
    %685 = math.exp %684 : vector<8x8xf32>
    %686 = arith.addf %641, %685 : vector<8x8xf32>
    %687 = vector.extract_strided_slice %6 {offsets = [0, 3], sizes = [1, 1], strides = [1, 1]} : vector<1x4xf32> to vector<1x1xf32>
    %cst_81 = arith.constant 0.000000e+00 : f32
    %688 = vector.broadcast %cst_81 : f32 to vector<1x1xf32>
    %689 = arith.subf %688, %687 : vector<1x1xf32>
    %690 = vector.broadcast %689 : vector<1x1xf32> to vector<8x8xf32>
    %691 = arith.mulf %665, %690 : vector<8x8xf32>
    %692 = math.exp %691 : vector<8x8xf32>
    %693 = arith.addf %648, %692 : vector<8x8xf32>
    %694 = vector.extract_strided_slice %3 {offsets = [0, 15], sizes = [8, 1], strides = [1, 1]} : vector<8x27xf32> to vector<8x1xf32>
    %695 = vector.broadcast %0 : vector<1x8xf32> to vector<8x8xf32>
    %696 = vector.broadcast %694 : vector<8x1xf32> to vector<8x8xf32>
    %697 = arith.addf %695, %696 : vector<8x8xf32>
    %698 = vector.extract_strided_slice %4 {offsets = [0, 15], sizes = [8, 1], strides = [1, 1]} : vector<8x27xf32> to vector<8x1xf32>
    %699 = vector.broadcast %1 : vector<1x8xf32> to vector<8x8xf32>
    %700 = vector.broadcast %698 : vector<8x1xf32> to vector<8x8xf32>
    %701 = arith.addf %699, %700 : vector<8x8xf32>
    %702 = vector.extract_strided_slice %5 {offsets = [0, 15], sizes = [8, 1], strides = [1, 1]} : vector<8x27xf32> to vector<8x1xf32>
    %703 = vector.broadcast %2 : vector<1x8xf32> to vector<8x8xf32>
    %704 = vector.broadcast %702 : vector<8x1xf32> to vector<8x8xf32>
    %705 = arith.addf %703, %704 : vector<8x8xf32>
    %706 = arith.mulf %697, %697 : vector<8x8xf32>
    %707 = arith.mulf %701, %701 : vector<8x8xf32>
    %708 = arith.addf %706, %707 : vector<8x8xf32>
    %709 = arith.mulf %705, %705 : vector<8x8xf32>
    %710 = arith.addf %708, %709 : vector<8x8xf32>
    %711 = vector.extract_strided_slice %6 {offsets = [0, 0], sizes = [1, 1], strides = [1, 1]} : vector<1x4xf32> to vector<1x1xf32>
    %cst_82 = arith.constant 0.000000e+00 : f32
    %712 = vector.broadcast %cst_82 : f32 to vector<1x1xf32>
    %713 = arith.subf %712, %711 : vector<1x1xf32>
    %714 = vector.broadcast %713 : vector<1x1xf32> to vector<8x8xf32>
    %715 = arith.mulf %710, %714 : vector<8x8xf32>
    %716 = math.exp %715 : vector<8x8xf32>
    %717 = arith.addf %672, %716 : vector<8x8xf32>
    %718 = vector.extract_strided_slice %6 {offsets = [0, 1], sizes = [1, 1], strides = [1, 1]} : vector<1x4xf32> to vector<1x1xf32>
    %cst_83 = arith.constant 0.000000e+00 : f32
    %719 = vector.broadcast %cst_83 : f32 to vector<1x1xf32>
    %720 = arith.subf %719, %718 : vector<1x1xf32>
    %721 = vector.broadcast %720 : vector<1x1xf32> to vector<8x8xf32>
    %722 = arith.mulf %710, %721 : vector<8x8xf32>
    %723 = math.exp %722 : vector<8x8xf32>
    %724 = arith.addf %679, %723 : vector<8x8xf32>
    %725 = vector.extract_strided_slice %6 {offsets = [0, 2], sizes = [1, 1], strides = [1, 1]} : vector<1x4xf32> to vector<1x1xf32>
    %cst_84 = arith.constant 0.000000e+00 : f32
    %726 = vector.broadcast %cst_84 : f32 to vector<1x1xf32>
    %727 = arith.subf %726, %725 : vector<1x1xf32>
    %728 = vector.broadcast %727 : vector<1x1xf32> to vector<8x8xf32>
    %729 = arith.mulf %710, %728 : vector<8x8xf32>
    %730 = math.exp %729 : vector<8x8xf32>
    %731 = arith.addf %686, %730 : vector<8x8xf32>
    %732 = vector.extract_strided_slice %6 {offsets = [0, 3], sizes = [1, 1], strides = [1, 1]} : vector<1x4xf32> to vector<1x1xf32>
    %cst_85 = arith.constant 0.000000e+00 : f32
    %733 = vector.broadcast %cst_85 : f32 to vector<1x1xf32>
    %734 = arith.subf %733, %732 : vector<1x1xf32>
    %735 = vector.broadcast %734 : vector<1x1xf32> to vector<8x8xf32>
    %736 = arith.mulf %710, %735 : vector<8x8xf32>
    %737 = math.exp %736 : vector<8x8xf32>
    %738 = arith.addf %693, %737 : vector<8x8xf32>
    %739 = vector.extract_strided_slice %3 {offsets = [0, 16], sizes = [8, 1], strides = [1, 1]} : vector<8x27xf32> to vector<8x1xf32>
    %740 = vector.broadcast %0 : vector<1x8xf32> to vector<8x8xf32>
    %741 = vector.broadcast %739 : vector<8x1xf32> to vector<8x8xf32>
    %742 = arith.addf %740, %741 : vector<8x8xf32>
    %743 = vector.extract_strided_slice %4 {offsets = [0, 16], sizes = [8, 1], strides = [1, 1]} : vector<8x27xf32> to vector<8x1xf32>
    %744 = vector.broadcast %1 : vector<1x8xf32> to vector<8x8xf32>
    %745 = vector.broadcast %743 : vector<8x1xf32> to vector<8x8xf32>
    %746 = arith.addf %744, %745 : vector<8x8xf32>
    %747 = vector.extract_strided_slice %5 {offsets = [0, 16], sizes = [8, 1], strides = [1, 1]} : vector<8x27xf32> to vector<8x1xf32>
    %748 = vector.broadcast %2 : vector<1x8xf32> to vector<8x8xf32>
    %749 = vector.broadcast %747 : vector<8x1xf32> to vector<8x8xf32>
    %750 = arith.addf %748, %749 : vector<8x8xf32>
    %751 = arith.mulf %742, %742 : vector<8x8xf32>
    %752 = arith.mulf %746, %746 : vector<8x8xf32>
    %753 = arith.addf %751, %752 : vector<8x8xf32>
    %754 = arith.mulf %750, %750 : vector<8x8xf32>
    %755 = arith.addf %753, %754 : vector<8x8xf32>
    %756 = vector.extract_strided_slice %6 {offsets = [0, 0], sizes = [1, 1], strides = [1, 1]} : vector<1x4xf32> to vector<1x1xf32>
    %cst_86 = arith.constant 0.000000e+00 : f32
    %757 = vector.broadcast %cst_86 : f32 to vector<1x1xf32>
    %758 = arith.subf %757, %756 : vector<1x1xf32>
    %759 = vector.broadcast %758 : vector<1x1xf32> to vector<8x8xf32>
    %760 = arith.mulf %755, %759 : vector<8x8xf32>
    %761 = math.exp %760 : vector<8x8xf32>
    %762 = arith.addf %717, %761 : vector<8x8xf32>
    %763 = vector.extract_strided_slice %6 {offsets = [0, 1], sizes = [1, 1], strides = [1, 1]} : vector<1x4xf32> to vector<1x1xf32>
    %cst_87 = arith.constant 0.000000e+00 : f32
    %764 = vector.broadcast %cst_87 : f32 to vector<1x1xf32>
    %765 = arith.subf %764, %763 : vector<1x1xf32>
    %766 = vector.broadcast %765 : vector<1x1xf32> to vector<8x8xf32>
    %767 = arith.mulf %755, %766 : vector<8x8xf32>
    %768 = math.exp %767 : vector<8x8xf32>
    %769 = arith.addf %724, %768 : vector<8x8xf32>
    %770 = vector.extract_strided_slice %6 {offsets = [0, 2], sizes = [1, 1], strides = [1, 1]} : vector<1x4xf32> to vector<1x1xf32>
    %cst_88 = arith.constant 0.000000e+00 : f32
    %771 = vector.broadcast %cst_88 : f32 to vector<1x1xf32>
    %772 = arith.subf %771, %770 : vector<1x1xf32>
    %773 = vector.broadcast %772 : vector<1x1xf32> to vector<8x8xf32>
    %774 = arith.mulf %755, %773 : vector<8x8xf32>
    %775 = math.exp %774 : vector<8x8xf32>
    %776 = arith.addf %731, %775 : vector<8x8xf32>
    %777 = vector.extract_strided_slice %6 {offsets = [0, 3], sizes = [1, 1], strides = [1, 1]} : vector<1x4xf32> to vector<1x1xf32>
    %cst_89 = arith.constant 0.000000e+00 : f32
    %778 = vector.broadcast %cst_89 : f32 to vector<1x1xf32>
    %779 = arith.subf %778, %777 : vector<1x1xf32>
    %780 = vector.broadcast %779 : vector<1x1xf32> to vector<8x8xf32>
    %781 = arith.mulf %755, %780 : vector<8x8xf32>
    %782 = math.exp %781 : vector<8x8xf32>
    %783 = arith.addf %738, %782 : vector<8x8xf32>
    %784 = vector.extract_strided_slice %3 {offsets = [0, 17], sizes = [8, 1], strides = [1, 1]} : vector<8x27xf32> to vector<8x1xf32>
    %785 = vector.broadcast %0 : vector<1x8xf32> to vector<8x8xf32>
    %786 = vector.broadcast %784 : vector<8x1xf32> to vector<8x8xf32>
    %787 = arith.addf %785, %786 : vector<8x8xf32>
    %788 = vector.extract_strided_slice %4 {offsets = [0, 17], sizes = [8, 1], strides = [1, 1]} : vector<8x27xf32> to vector<8x1xf32>
    %789 = vector.broadcast %1 : vector<1x8xf32> to vector<8x8xf32>
    %790 = vector.broadcast %788 : vector<8x1xf32> to vector<8x8xf32>
    %791 = arith.addf %789, %790 : vector<8x8xf32>
    %792 = vector.extract_strided_slice %5 {offsets = [0, 17], sizes = [8, 1], strides = [1, 1]} : vector<8x27xf32> to vector<8x1xf32>
    %793 = vector.broadcast %2 : vector<1x8xf32> to vector<8x8xf32>
    %794 = vector.broadcast %792 : vector<8x1xf32> to vector<8x8xf32>
    %795 = arith.addf %793, %794 : vector<8x8xf32>
    %796 = arith.mulf %787, %787 : vector<8x8xf32>
    %797 = arith.mulf %791, %791 : vector<8x8xf32>
    %798 = arith.addf %796, %797 : vector<8x8xf32>
    %799 = arith.mulf %795, %795 : vector<8x8xf32>
    %800 = arith.addf %798, %799 : vector<8x8xf32>
    %801 = vector.extract_strided_slice %6 {offsets = [0, 0], sizes = [1, 1], strides = [1, 1]} : vector<1x4xf32> to vector<1x1xf32>
    %cst_90 = arith.constant 0.000000e+00 : f32
    %802 = vector.broadcast %cst_90 : f32 to vector<1x1xf32>
    %803 = arith.subf %802, %801 : vector<1x1xf32>
    %804 = vector.broadcast %803 : vector<1x1xf32> to vector<8x8xf32>
    %805 = arith.mulf %800, %804 : vector<8x8xf32>
    %806 = math.exp %805 : vector<8x8xf32>
    %807 = arith.addf %762, %806 : vector<8x8xf32>
    %808 = vector.extract_strided_slice %6 {offsets = [0, 1], sizes = [1, 1], strides = [1, 1]} : vector<1x4xf32> to vector<1x1xf32>
    %cst_91 = arith.constant 0.000000e+00 : f32
    %809 = vector.broadcast %cst_91 : f32 to vector<1x1xf32>
    %810 = arith.subf %809, %808 : vector<1x1xf32>
    %811 = vector.broadcast %810 : vector<1x1xf32> to vector<8x8xf32>
    %812 = arith.mulf %800, %811 : vector<8x8xf32>
    %813 = math.exp %812 : vector<8x8xf32>
    %814 = arith.addf %769, %813 : vector<8x8xf32>
    %815 = vector.extract_strided_slice %6 {offsets = [0, 2], sizes = [1, 1], strides = [1, 1]} : vector<1x4xf32> to vector<1x1xf32>
    %cst_92 = arith.constant 0.000000e+00 : f32
    %816 = vector.broadcast %cst_92 : f32 to vector<1x1xf32>
    %817 = arith.subf %816, %815 : vector<1x1xf32>
    %818 = vector.broadcast %817 : vector<1x1xf32> to vector<8x8xf32>
    %819 = arith.mulf %800, %818 : vector<8x8xf32>
    %820 = math.exp %819 : vector<8x8xf32>
    %821 = arith.addf %776, %820 : vector<8x8xf32>
    %822 = vector.extract_strided_slice %6 {offsets = [0, 3], sizes = [1, 1], strides = [1, 1]} : vector<1x4xf32> to vector<1x1xf32>
    %cst_93 = arith.constant 0.000000e+00 : f32
    %823 = vector.broadcast %cst_93 : f32 to vector<1x1xf32>
    %824 = arith.subf %823, %822 : vector<1x1xf32>
    %825 = vector.broadcast %824 : vector<1x1xf32> to vector<8x8xf32>
    %826 = arith.mulf %800, %825 : vector<8x8xf32>
    %827 = math.exp %826 : vector<8x8xf32>
    %828 = arith.addf %783, %827 : vector<8x8xf32>
    %829 = vector.extract_strided_slice %3 {offsets = [0, 18], sizes = [8, 1], strides = [1, 1]} : vector<8x27xf32> to vector<8x1xf32>
    %830 = vector.broadcast %0 : vector<1x8xf32> to vector<8x8xf32>
    %831 = vector.broadcast %829 : vector<8x1xf32> to vector<8x8xf32>
    %832 = arith.addf %830, %831 : vector<8x8xf32>
    %833 = vector.extract_strided_slice %4 {offsets = [0, 18], sizes = [8, 1], strides = [1, 1]} : vector<8x27xf32> to vector<8x1xf32>
    %834 = vector.broadcast %1 : vector<1x8xf32> to vector<8x8xf32>
    %835 = vector.broadcast %833 : vector<8x1xf32> to vector<8x8xf32>
    %836 = arith.addf %834, %835 : vector<8x8xf32>
    %837 = vector.extract_strided_slice %5 {offsets = [0, 18], sizes = [8, 1], strides = [1, 1]} : vector<8x27xf32> to vector<8x1xf32>
    %838 = vector.broadcast %2 : vector<1x8xf32> to vector<8x8xf32>
    %839 = vector.broadcast %837 : vector<8x1xf32> to vector<8x8xf32>
    %840 = arith.addf %838, %839 : vector<8x8xf32>
    %841 = arith.mulf %832, %832 : vector<8x8xf32>
    %842 = arith.mulf %836, %836 : vector<8x8xf32>
    %843 = arith.addf %841, %842 : vector<8x8xf32>
    %844 = arith.mulf %840, %840 : vector<8x8xf32>
    %845 = arith.addf %843, %844 : vector<8x8xf32>
    %846 = vector.extract_strided_slice %6 {offsets = [0, 0], sizes = [1, 1], strides = [1, 1]} : vector<1x4xf32> to vector<1x1xf32>
    %cst_94 = arith.constant 0.000000e+00 : f32
    %847 = vector.broadcast %cst_94 : f32 to vector<1x1xf32>
    %848 = arith.subf %847, %846 : vector<1x1xf32>
    %849 = vector.broadcast %848 : vector<1x1xf32> to vector<8x8xf32>
    %850 = arith.mulf %845, %849 : vector<8x8xf32>
    %851 = math.exp %850 : vector<8x8xf32>
    %852 = arith.addf %807, %851 : vector<8x8xf32>
    %853 = vector.extract_strided_slice %6 {offsets = [0, 1], sizes = [1, 1], strides = [1, 1]} : vector<1x4xf32> to vector<1x1xf32>
    %cst_95 = arith.constant 0.000000e+00 : f32
    %854 = vector.broadcast %cst_95 : f32 to vector<1x1xf32>
    %855 = arith.subf %854, %853 : vector<1x1xf32>
    %856 = vector.broadcast %855 : vector<1x1xf32> to vector<8x8xf32>
    %857 = arith.mulf %845, %856 : vector<8x8xf32>
    %858 = math.exp %857 : vector<8x8xf32>
    %859 = arith.addf %814, %858 : vector<8x8xf32>
    %860 = vector.extract_strided_slice %6 {offsets = [0, 2], sizes = [1, 1], strides = [1, 1]} : vector<1x4xf32> to vector<1x1xf32>
    %cst_96 = arith.constant 0.000000e+00 : f32
    %861 = vector.broadcast %cst_96 : f32 to vector<1x1xf32>
    %862 = arith.subf %861, %860 : vector<1x1xf32>
    %863 = vector.broadcast %862 : vector<1x1xf32> to vector<8x8xf32>
    %864 = arith.mulf %845, %863 : vector<8x8xf32>
    %865 = math.exp %864 : vector<8x8xf32>
    %866 = arith.addf %821, %865 : vector<8x8xf32>
    %867 = vector.extract_strided_slice %6 {offsets = [0, 3], sizes = [1, 1], strides = [1, 1]} : vector<1x4xf32> to vector<1x1xf32>
    %cst_97 = arith.constant 0.000000e+00 : f32
    %868 = vector.broadcast %cst_97 : f32 to vector<1x1xf32>
    %869 = arith.subf %868, %867 : vector<1x1xf32>
    %870 = vector.broadcast %869 : vector<1x1xf32> to vector<8x8xf32>
    %871 = arith.mulf %845, %870 : vector<8x8xf32>
    %872 = math.exp %871 : vector<8x8xf32>
    %873 = arith.addf %828, %872 : vector<8x8xf32>
    %874 = vector.extract_strided_slice %3 {offsets = [0, 19], sizes = [8, 1], strides = [1, 1]} : vector<8x27xf32> to vector<8x1xf32>
    %875 = vector.broadcast %0 : vector<1x8xf32> to vector<8x8xf32>
    %876 = vector.broadcast %874 : vector<8x1xf32> to vector<8x8xf32>
    %877 = arith.addf %875, %876 : vector<8x8xf32>
    %878 = vector.extract_strided_slice %4 {offsets = [0, 19], sizes = [8, 1], strides = [1, 1]} : vector<8x27xf32> to vector<8x1xf32>
    %879 = vector.broadcast %1 : vector<1x8xf32> to vector<8x8xf32>
    %880 = vector.broadcast %878 : vector<8x1xf32> to vector<8x8xf32>
    %881 = arith.addf %879, %880 : vector<8x8xf32>
    %882 = vector.extract_strided_slice %5 {offsets = [0, 19], sizes = [8, 1], strides = [1, 1]} : vector<8x27xf32> to vector<8x1xf32>
    %883 = vector.broadcast %2 : vector<1x8xf32> to vector<8x8xf32>
    %884 = vector.broadcast %882 : vector<8x1xf32> to vector<8x8xf32>
    %885 = arith.addf %883, %884 : vector<8x8xf32>
    %886 = arith.mulf %877, %877 : vector<8x8xf32>
    %887 = arith.mulf %881, %881 : vector<8x8xf32>
    %888 = arith.addf %886, %887 : vector<8x8xf32>
    %889 = arith.mulf %885, %885 : vector<8x8xf32>
    %890 = arith.addf %888, %889 : vector<8x8xf32>
    %891 = vector.extract_strided_slice %6 {offsets = [0, 0], sizes = [1, 1], strides = [1, 1]} : vector<1x4xf32> to vector<1x1xf32>
    %cst_98 = arith.constant 0.000000e+00 : f32
    %892 = vector.broadcast %cst_98 : f32 to vector<1x1xf32>
    %893 = arith.subf %892, %891 : vector<1x1xf32>
    %894 = vector.broadcast %893 : vector<1x1xf32> to vector<8x8xf32>
    %895 = arith.mulf %890, %894 : vector<8x8xf32>
    %896 = math.exp %895 : vector<8x8xf32>
    %897 = arith.addf %852, %896 : vector<8x8xf32>
    %898 = vector.extract_strided_slice %6 {offsets = [0, 1], sizes = [1, 1], strides = [1, 1]} : vector<1x4xf32> to vector<1x1xf32>
    %cst_99 = arith.constant 0.000000e+00 : f32
    %899 = vector.broadcast %cst_99 : f32 to vector<1x1xf32>
    %900 = arith.subf %899, %898 : vector<1x1xf32>
    %901 = vector.broadcast %900 : vector<1x1xf32> to vector<8x8xf32>
    %902 = arith.mulf %890, %901 : vector<8x8xf32>
    %903 = math.exp %902 : vector<8x8xf32>
    %904 = arith.addf %859, %903 : vector<8x8xf32>
    %905 = vector.extract_strided_slice %6 {offsets = [0, 2], sizes = [1, 1], strides = [1, 1]} : vector<1x4xf32> to vector<1x1xf32>
    %cst_100 = arith.constant 0.000000e+00 : f32
    %906 = vector.broadcast %cst_100 : f32 to vector<1x1xf32>
    %907 = arith.subf %906, %905 : vector<1x1xf32>
    %908 = vector.broadcast %907 : vector<1x1xf32> to vector<8x8xf32>
    %909 = arith.mulf %890, %908 : vector<8x8xf32>
    %910 = math.exp %909 : vector<8x8xf32>
    %911 = arith.addf %866, %910 : vector<8x8xf32>
    %912 = vector.extract_strided_slice %6 {offsets = [0, 3], sizes = [1, 1], strides = [1, 1]} : vector<1x4xf32> to vector<1x1xf32>
    %cst_101 = arith.constant 0.000000e+00 : f32
    %913 = vector.broadcast %cst_101 : f32 to vector<1x1xf32>
    %914 = arith.subf %913, %912 : vector<1x1xf32>
    %915 = vector.broadcast %914 : vector<1x1xf32> to vector<8x8xf32>
    %916 = arith.mulf %890, %915 : vector<8x8xf32>
    %917 = math.exp %916 : vector<8x8xf32>
    %918 = arith.addf %873, %917 : vector<8x8xf32>
    %919 = vector.extract_strided_slice %3 {offsets = [0, 20], sizes = [8, 1], strides = [1, 1]} : vector<8x27xf32> to vector<8x1xf32>
    %920 = vector.broadcast %0 : vector<1x8xf32> to vector<8x8xf32>
    %921 = vector.broadcast %919 : vector<8x1xf32> to vector<8x8xf32>
    %922 = arith.addf %920, %921 : vector<8x8xf32>
    %923 = vector.extract_strided_slice %4 {offsets = [0, 20], sizes = [8, 1], strides = [1, 1]} : vector<8x27xf32> to vector<8x1xf32>
    %924 = vector.broadcast %1 : vector<1x8xf32> to vector<8x8xf32>
    %925 = vector.broadcast %923 : vector<8x1xf32> to vector<8x8xf32>
    %926 = arith.addf %924, %925 : vector<8x8xf32>
    %927 = vector.extract_strided_slice %5 {offsets = [0, 20], sizes = [8, 1], strides = [1, 1]} : vector<8x27xf32> to vector<8x1xf32>
    %928 = vector.broadcast %2 : vector<1x8xf32> to vector<8x8xf32>
    %929 = vector.broadcast %927 : vector<8x1xf32> to vector<8x8xf32>
    %930 = arith.addf %928, %929 : vector<8x8xf32>
    %931 = arith.mulf %922, %922 : vector<8x8xf32>
    %932 = arith.mulf %926, %926 : vector<8x8xf32>
    %933 = arith.addf %931, %932 : vector<8x8xf32>
    %934 = arith.mulf %930, %930 : vector<8x8xf32>
    %935 = arith.addf %933, %934 : vector<8x8xf32>
    %936 = vector.extract_strided_slice %6 {offsets = [0, 0], sizes = [1, 1], strides = [1, 1]} : vector<1x4xf32> to vector<1x1xf32>
    %cst_102 = arith.constant 0.000000e+00 : f32
    %937 = vector.broadcast %cst_102 : f32 to vector<1x1xf32>
    %938 = arith.subf %937, %936 : vector<1x1xf32>
    %939 = vector.broadcast %938 : vector<1x1xf32> to vector<8x8xf32>
    %940 = arith.mulf %935, %939 : vector<8x8xf32>
    %941 = math.exp %940 : vector<8x8xf32>
    %942 = arith.addf %897, %941 : vector<8x8xf32>
    %943 = vector.extract_strided_slice %6 {offsets = [0, 1], sizes = [1, 1], strides = [1, 1]} : vector<1x4xf32> to vector<1x1xf32>
    %cst_103 = arith.constant 0.000000e+00 : f32
    %944 = vector.broadcast %cst_103 : f32 to vector<1x1xf32>
    %945 = arith.subf %944, %943 : vector<1x1xf32>
    %946 = vector.broadcast %945 : vector<1x1xf32> to vector<8x8xf32>
    %947 = arith.mulf %935, %946 : vector<8x8xf32>
    %948 = math.exp %947 : vector<8x8xf32>
    %949 = arith.addf %904, %948 : vector<8x8xf32>
    %950 = vector.extract_strided_slice %6 {offsets = [0, 2], sizes = [1, 1], strides = [1, 1]} : vector<1x4xf32> to vector<1x1xf32>
    %cst_104 = arith.constant 0.000000e+00 : f32
    %951 = vector.broadcast %cst_104 : f32 to vector<1x1xf32>
    %952 = arith.subf %951, %950 : vector<1x1xf32>
    %953 = vector.broadcast %952 : vector<1x1xf32> to vector<8x8xf32>
    %954 = arith.mulf %935, %953 : vector<8x8xf32>
    %955 = math.exp %954 : vector<8x8xf32>
    %956 = arith.addf %911, %955 : vector<8x8xf32>
    %957 = vector.extract_strided_slice %6 {offsets = [0, 3], sizes = [1, 1], strides = [1, 1]} : vector<1x4xf32> to vector<1x1xf32>
    %cst_105 = arith.constant 0.000000e+00 : f32
    %958 = vector.broadcast %cst_105 : f32 to vector<1x1xf32>
    %959 = arith.subf %958, %957 : vector<1x1xf32>
    %960 = vector.broadcast %959 : vector<1x1xf32> to vector<8x8xf32>
    %961 = arith.mulf %935, %960 : vector<8x8xf32>
    %962 = math.exp %961 : vector<8x8xf32>
    %963 = arith.addf %918, %962 : vector<8x8xf32>
    %964 = vector.extract_strided_slice %3 {offsets = [0, 21], sizes = [8, 1], strides = [1, 1]} : vector<8x27xf32> to vector<8x1xf32>
    %965 = vector.broadcast %0 : vector<1x8xf32> to vector<8x8xf32>
    %966 = vector.broadcast %964 : vector<8x1xf32> to vector<8x8xf32>
    %967 = arith.addf %965, %966 : vector<8x8xf32>
    %968 = vector.extract_strided_slice %4 {offsets = [0, 21], sizes = [8, 1], strides = [1, 1]} : vector<8x27xf32> to vector<8x1xf32>
    %969 = vector.broadcast %1 : vector<1x8xf32> to vector<8x8xf32>
    %970 = vector.broadcast %968 : vector<8x1xf32> to vector<8x8xf32>
    %971 = arith.addf %969, %970 : vector<8x8xf32>
    %972 = vector.extract_strided_slice %5 {offsets = [0, 21], sizes = [8, 1], strides = [1, 1]} : vector<8x27xf32> to vector<8x1xf32>
    %973 = vector.broadcast %2 : vector<1x8xf32> to vector<8x8xf32>
    %974 = vector.broadcast %972 : vector<8x1xf32> to vector<8x8xf32>
    %975 = arith.addf %973, %974 : vector<8x8xf32>
    %976 = arith.mulf %967, %967 : vector<8x8xf32>
    %977 = arith.mulf %971, %971 : vector<8x8xf32>
    %978 = arith.addf %976, %977 : vector<8x8xf32>
    %979 = arith.mulf %975, %975 : vector<8x8xf32>
    %980 = arith.addf %978, %979 : vector<8x8xf32>
    %981 = vector.extract_strided_slice %6 {offsets = [0, 0], sizes = [1, 1], strides = [1, 1]} : vector<1x4xf32> to vector<1x1xf32>
    %cst_106 = arith.constant 0.000000e+00 : f32
    %982 = vector.broadcast %cst_106 : f32 to vector<1x1xf32>
    %983 = arith.subf %982, %981 : vector<1x1xf32>
    %984 = vector.broadcast %983 : vector<1x1xf32> to vector<8x8xf32>
    %985 = arith.mulf %980, %984 : vector<8x8xf32>
    %986 = math.exp %985 : vector<8x8xf32>
    %987 = arith.addf %942, %986 : vector<8x8xf32>
    %988 = vector.extract_strided_slice %6 {offsets = [0, 1], sizes = [1, 1], strides = [1, 1]} : vector<1x4xf32> to vector<1x1xf32>
    %cst_107 = arith.constant 0.000000e+00 : f32
    %989 = vector.broadcast %cst_107 : f32 to vector<1x1xf32>
    %990 = arith.subf %989, %988 : vector<1x1xf32>
    %991 = vector.broadcast %990 : vector<1x1xf32> to vector<8x8xf32>
    %992 = arith.mulf %980, %991 : vector<8x8xf32>
    %993 = math.exp %992 : vector<8x8xf32>
    %994 = arith.addf %949, %993 : vector<8x8xf32>
    %995 = vector.extract_strided_slice %6 {offsets = [0, 2], sizes = [1, 1], strides = [1, 1]} : vector<1x4xf32> to vector<1x1xf32>
    %cst_108 = arith.constant 0.000000e+00 : f32
    %996 = vector.broadcast %cst_108 : f32 to vector<1x1xf32>
    %997 = arith.subf %996, %995 : vector<1x1xf32>
    %998 = vector.broadcast %997 : vector<1x1xf32> to vector<8x8xf32>
    %999 = arith.mulf %980, %998 : vector<8x8xf32>
    %1000 = math.exp %999 : vector<8x8xf32>
    %1001 = arith.addf %956, %1000 : vector<8x8xf32>
    %1002 = vector.extract_strided_slice %6 {offsets = [0, 3], sizes = [1, 1], strides = [1, 1]} : vector<1x4xf32> to vector<1x1xf32>
    %cst_109 = arith.constant 0.000000e+00 : f32
    %1003 = vector.broadcast %cst_109 : f32 to vector<1x1xf32>
    %1004 = arith.subf %1003, %1002 : vector<1x1xf32>
    %1005 = vector.broadcast %1004 : vector<1x1xf32> to vector<8x8xf32>
    %1006 = arith.mulf %980, %1005 : vector<8x8xf32>
    %1007 = math.exp %1006 : vector<8x8xf32>
    %1008 = arith.addf %963, %1007 : vector<8x8xf32>
    %1009 = vector.extract_strided_slice %3 {offsets = [0, 22], sizes = [8, 1], strides = [1, 1]} : vector<8x27xf32> to vector<8x1xf32>
    %1010 = vector.broadcast %0 : vector<1x8xf32> to vector<8x8xf32>
    %1011 = vector.broadcast %1009 : vector<8x1xf32> to vector<8x8xf32>
    %1012 = arith.addf %1010, %1011 : vector<8x8xf32>
    %1013 = vector.extract_strided_slice %4 {offsets = [0, 22], sizes = [8, 1], strides = [1, 1]} : vector<8x27xf32> to vector<8x1xf32>
    %1014 = vector.broadcast %1 : vector<1x8xf32> to vector<8x8xf32>
    %1015 = vector.broadcast %1013 : vector<8x1xf32> to vector<8x8xf32>
    %1016 = arith.addf %1014, %1015 : vector<8x8xf32>
    %1017 = vector.extract_strided_slice %5 {offsets = [0, 22], sizes = [8, 1], strides = [1, 1]} : vector<8x27xf32> to vector<8x1xf32>
    %1018 = vector.broadcast %2 : vector<1x8xf32> to vector<8x8xf32>
    %1019 = vector.broadcast %1017 : vector<8x1xf32> to vector<8x8xf32>
    %1020 = arith.addf %1018, %1019 : vector<8x8xf32>
    %1021 = arith.mulf %1012, %1012 : vector<8x8xf32>
    %1022 = arith.mulf %1016, %1016 : vector<8x8xf32>
    %1023 = arith.addf %1021, %1022 : vector<8x8xf32>
    %1024 = arith.mulf %1020, %1020 : vector<8x8xf32>
    %1025 = arith.addf %1023, %1024 : vector<8x8xf32>
    %1026 = vector.extract_strided_slice %6 {offsets = [0, 0], sizes = [1, 1], strides = [1, 1]} : vector<1x4xf32> to vector<1x1xf32>
    %cst_110 = arith.constant 0.000000e+00 : f32
    %1027 = vector.broadcast %cst_110 : f32 to vector<1x1xf32>
    %1028 = arith.subf %1027, %1026 : vector<1x1xf32>
    %1029 = vector.broadcast %1028 : vector<1x1xf32> to vector<8x8xf32>
    %1030 = arith.mulf %1025, %1029 : vector<8x8xf32>
    %1031 = math.exp %1030 : vector<8x8xf32>
    %1032 = arith.addf %987, %1031 : vector<8x8xf32>
    %1033 = vector.extract_strided_slice %6 {offsets = [0, 1], sizes = [1, 1], strides = [1, 1]} : vector<1x4xf32> to vector<1x1xf32>
    %cst_111 = arith.constant 0.000000e+00 : f32
    %1034 = vector.broadcast %cst_111 : f32 to vector<1x1xf32>
    %1035 = arith.subf %1034, %1033 : vector<1x1xf32>
    %1036 = vector.broadcast %1035 : vector<1x1xf32> to vector<8x8xf32>
    %1037 = arith.mulf %1025, %1036 : vector<8x8xf32>
    %1038 = math.exp %1037 : vector<8x8xf32>
    %1039 = arith.addf %994, %1038 : vector<8x8xf32>
    %1040 = vector.extract_strided_slice %6 {offsets = [0, 2], sizes = [1, 1], strides = [1, 1]} : vector<1x4xf32> to vector<1x1xf32>
    %cst_112 = arith.constant 0.000000e+00 : f32
    %1041 = vector.broadcast %cst_112 : f32 to vector<1x1xf32>
    %1042 = arith.subf %1041, %1040 : vector<1x1xf32>
    %1043 = vector.broadcast %1042 : vector<1x1xf32> to vector<8x8xf32>
    %1044 = arith.mulf %1025, %1043 : vector<8x8xf32>
    %1045 = math.exp %1044 : vector<8x8xf32>
    %1046 = arith.addf %1001, %1045 : vector<8x8xf32>
    %1047 = vector.extract_strided_slice %6 {offsets = [0, 3], sizes = [1, 1], strides = [1, 1]} : vector<1x4xf32> to vector<1x1xf32>
    %cst_113 = arith.constant 0.000000e+00 : f32
    %1048 = vector.broadcast %cst_113 : f32 to vector<1x1xf32>
    %1049 = arith.subf %1048, %1047 : vector<1x1xf32>
    %1050 = vector.broadcast %1049 : vector<1x1xf32> to vector<8x8xf32>
    %1051 = arith.mulf %1025, %1050 : vector<8x8xf32>
    %1052 = math.exp %1051 : vector<8x8xf32>
    %1053 = arith.addf %1008, %1052 : vector<8x8xf32>
    %1054 = vector.extract_strided_slice %3 {offsets = [0, 23], sizes = [8, 1], strides = [1, 1]} : vector<8x27xf32> to vector<8x1xf32>
    %1055 = vector.broadcast %0 : vector<1x8xf32> to vector<8x8xf32>
    %1056 = vector.broadcast %1054 : vector<8x1xf32> to vector<8x8xf32>
    %1057 = arith.addf %1055, %1056 : vector<8x8xf32>
    %1058 = vector.extract_strided_slice %4 {offsets = [0, 23], sizes = [8, 1], strides = [1, 1]} : vector<8x27xf32> to vector<8x1xf32>
    %1059 = vector.broadcast %1 : vector<1x8xf32> to vector<8x8xf32>
    %1060 = vector.broadcast %1058 : vector<8x1xf32> to vector<8x8xf32>
    %1061 = arith.addf %1059, %1060 : vector<8x8xf32>
    %1062 = vector.extract_strided_slice %5 {offsets = [0, 23], sizes = [8, 1], strides = [1, 1]} : vector<8x27xf32> to vector<8x1xf32>
    %1063 = vector.broadcast %2 : vector<1x8xf32> to vector<8x8xf32>
    %1064 = vector.broadcast %1062 : vector<8x1xf32> to vector<8x8xf32>
    %1065 = arith.addf %1063, %1064 : vector<8x8xf32>
    %1066 = arith.mulf %1057, %1057 : vector<8x8xf32>
    %1067 = arith.mulf %1061, %1061 : vector<8x8xf32>
    %1068 = arith.addf %1066, %1067 : vector<8x8xf32>
    %1069 = arith.mulf %1065, %1065 : vector<8x8xf32>
    %1070 = arith.addf %1068, %1069 : vector<8x8xf32>
    %1071 = vector.extract_strided_slice %6 {offsets = [0, 0], sizes = [1, 1], strides = [1, 1]} : vector<1x4xf32> to vector<1x1xf32>
    %cst_114 = arith.constant 0.000000e+00 : f32
    %1072 = vector.broadcast %cst_114 : f32 to vector<1x1xf32>
    %1073 = arith.subf %1072, %1071 : vector<1x1xf32>
    %1074 = vector.broadcast %1073 : vector<1x1xf32> to vector<8x8xf32>
    %1075 = arith.mulf %1070, %1074 : vector<8x8xf32>
    %1076 = math.exp %1075 : vector<8x8xf32>
    %1077 = arith.addf %1032, %1076 : vector<8x8xf32>
    %1078 = vector.extract_strided_slice %6 {offsets = [0, 1], sizes = [1, 1], strides = [1, 1]} : vector<1x4xf32> to vector<1x1xf32>
    %cst_115 = arith.constant 0.000000e+00 : f32
    %1079 = vector.broadcast %cst_115 : f32 to vector<1x1xf32>
    %1080 = arith.subf %1079, %1078 : vector<1x1xf32>
    %1081 = vector.broadcast %1080 : vector<1x1xf32> to vector<8x8xf32>
    %1082 = arith.mulf %1070, %1081 : vector<8x8xf32>
    %1083 = math.exp %1082 : vector<8x8xf32>
    %1084 = arith.addf %1039, %1083 : vector<8x8xf32>
    %1085 = vector.extract_strided_slice %6 {offsets = [0, 2], sizes = [1, 1], strides = [1, 1]} : vector<1x4xf32> to vector<1x1xf32>
    %cst_116 = arith.constant 0.000000e+00 : f32
    %1086 = vector.broadcast %cst_116 : f32 to vector<1x1xf32>
    %1087 = arith.subf %1086, %1085 : vector<1x1xf32>
    %1088 = vector.broadcast %1087 : vector<1x1xf32> to vector<8x8xf32>
    %1089 = arith.mulf %1070, %1088 : vector<8x8xf32>
    %1090 = math.exp %1089 : vector<8x8xf32>
    %1091 = arith.addf %1046, %1090 : vector<8x8xf32>
    %1092 = vector.extract_strided_slice %6 {offsets = [0, 3], sizes = [1, 1], strides = [1, 1]} : vector<1x4xf32> to vector<1x1xf32>
    %cst_117 = arith.constant 0.000000e+00 : f32
    %1093 = vector.broadcast %cst_117 : f32 to vector<1x1xf32>
    %1094 = arith.subf %1093, %1092 : vector<1x1xf32>
    %1095 = vector.broadcast %1094 : vector<1x1xf32> to vector<8x8xf32>
    %1096 = arith.mulf %1070, %1095 : vector<8x8xf32>
    %1097 = math.exp %1096 : vector<8x8xf32>
    %1098 = arith.addf %1053, %1097 : vector<8x8xf32>
    %1099 = vector.extract_strided_slice %3 {offsets = [0, 24], sizes = [8, 1], strides = [1, 1]} : vector<8x27xf32> to vector<8x1xf32>
    %1100 = vector.broadcast %0 : vector<1x8xf32> to vector<8x8xf32>
    %1101 = vector.broadcast %1099 : vector<8x1xf32> to vector<8x8xf32>
    %1102 = arith.addf %1100, %1101 : vector<8x8xf32>
    %1103 = vector.extract_strided_slice %4 {offsets = [0, 24], sizes = [8, 1], strides = [1, 1]} : vector<8x27xf32> to vector<8x1xf32>
    %1104 = vector.broadcast %1 : vector<1x8xf32> to vector<8x8xf32>
    %1105 = vector.broadcast %1103 : vector<8x1xf32> to vector<8x8xf32>
    %1106 = arith.addf %1104, %1105 : vector<8x8xf32>
    %1107 = vector.extract_strided_slice %5 {offsets = [0, 24], sizes = [8, 1], strides = [1, 1]} : vector<8x27xf32> to vector<8x1xf32>
    %1108 = vector.broadcast %2 : vector<1x8xf32> to vector<8x8xf32>
    %1109 = vector.broadcast %1107 : vector<8x1xf32> to vector<8x8xf32>
    %1110 = arith.addf %1108, %1109 : vector<8x8xf32>
    %1111 = arith.mulf %1102, %1102 : vector<8x8xf32>
    %1112 = arith.mulf %1106, %1106 : vector<8x8xf32>
    %1113 = arith.addf %1111, %1112 : vector<8x8xf32>
    %1114 = arith.mulf %1110, %1110 : vector<8x8xf32>
    %1115 = arith.addf %1113, %1114 : vector<8x8xf32>
    %1116 = vector.extract_strided_slice %6 {offsets = [0, 0], sizes = [1, 1], strides = [1, 1]} : vector<1x4xf32> to vector<1x1xf32>
    %cst_118 = arith.constant 0.000000e+00 : f32
    %1117 = vector.broadcast %cst_118 : f32 to vector<1x1xf32>
    %1118 = arith.subf %1117, %1116 : vector<1x1xf32>
    %1119 = vector.broadcast %1118 : vector<1x1xf32> to vector<8x8xf32>
    %1120 = arith.mulf %1115, %1119 : vector<8x8xf32>
    %1121 = math.exp %1120 : vector<8x8xf32>
    %1122 = arith.addf %1077, %1121 : vector<8x8xf32>
    %1123 = vector.extract_strided_slice %6 {offsets = [0, 1], sizes = [1, 1], strides = [1, 1]} : vector<1x4xf32> to vector<1x1xf32>
    %cst_119 = arith.constant 0.000000e+00 : f32
    %1124 = vector.broadcast %cst_119 : f32 to vector<1x1xf32>
    %1125 = arith.subf %1124, %1123 : vector<1x1xf32>
    %1126 = vector.broadcast %1125 : vector<1x1xf32> to vector<8x8xf32>
    %1127 = arith.mulf %1115, %1126 : vector<8x8xf32>
    %1128 = math.exp %1127 : vector<8x8xf32>
    %1129 = arith.addf %1084, %1128 : vector<8x8xf32>
    %1130 = vector.extract_strided_slice %6 {offsets = [0, 2], sizes = [1, 1], strides = [1, 1]} : vector<1x4xf32> to vector<1x1xf32>
    %cst_120 = arith.constant 0.000000e+00 : f32
    %1131 = vector.broadcast %cst_120 : f32 to vector<1x1xf32>
    %1132 = arith.subf %1131, %1130 : vector<1x1xf32>
    %1133 = vector.broadcast %1132 : vector<1x1xf32> to vector<8x8xf32>
    %1134 = arith.mulf %1115, %1133 : vector<8x8xf32>
    %1135 = math.exp %1134 : vector<8x8xf32>
    %1136 = arith.addf %1091, %1135 : vector<8x8xf32>
    %1137 = vector.extract_strided_slice %6 {offsets = [0, 3], sizes = [1, 1], strides = [1, 1]} : vector<1x4xf32> to vector<1x1xf32>
    %cst_121 = arith.constant 0.000000e+00 : f32
    %1138 = vector.broadcast %cst_121 : f32 to vector<1x1xf32>
    %1139 = arith.subf %1138, %1137 : vector<1x1xf32>
    %1140 = vector.broadcast %1139 : vector<1x1xf32> to vector<8x8xf32>
    %1141 = arith.mulf %1115, %1140 : vector<8x8xf32>
    %1142 = math.exp %1141 : vector<8x8xf32>
    %1143 = arith.addf %1098, %1142 : vector<8x8xf32>
    %1144 = vector.extract_strided_slice %3 {offsets = [0, 25], sizes = [8, 1], strides = [1, 1]} : vector<8x27xf32> to vector<8x1xf32>
    %1145 = vector.broadcast %0 : vector<1x8xf32> to vector<8x8xf32>
    %1146 = vector.broadcast %1144 : vector<8x1xf32> to vector<8x8xf32>
    %1147 = arith.addf %1145, %1146 : vector<8x8xf32>
    %1148 = vector.extract_strided_slice %4 {offsets = [0, 25], sizes = [8, 1], strides = [1, 1]} : vector<8x27xf32> to vector<8x1xf32>
    %1149 = vector.broadcast %1 : vector<1x8xf32> to vector<8x8xf32>
    %1150 = vector.broadcast %1148 : vector<8x1xf32> to vector<8x8xf32>
    %1151 = arith.addf %1149, %1150 : vector<8x8xf32>
    %1152 = vector.extract_strided_slice %5 {offsets = [0, 25], sizes = [8, 1], strides = [1, 1]} : vector<8x27xf32> to vector<8x1xf32>
    %1153 = vector.broadcast %2 : vector<1x8xf32> to vector<8x8xf32>
    %1154 = vector.broadcast %1152 : vector<8x1xf32> to vector<8x8xf32>
    %1155 = arith.addf %1153, %1154 : vector<8x8xf32>
    %1156 = arith.mulf %1147, %1147 : vector<8x8xf32>
    %1157 = arith.mulf %1151, %1151 : vector<8x8xf32>
    %1158 = arith.addf %1156, %1157 : vector<8x8xf32>
    %1159 = arith.mulf %1155, %1155 : vector<8x8xf32>
    %1160 = arith.addf %1158, %1159 : vector<8x8xf32>
    %1161 = vector.extract_strided_slice %6 {offsets = [0, 0], sizes = [1, 1], strides = [1, 1]} : vector<1x4xf32> to vector<1x1xf32>
    %cst_122 = arith.constant 0.000000e+00 : f32
    %1162 = vector.broadcast %cst_122 : f32 to vector<1x1xf32>
    %1163 = arith.subf %1162, %1161 : vector<1x1xf32>
    %1164 = vector.broadcast %1163 : vector<1x1xf32> to vector<8x8xf32>
    %1165 = arith.mulf %1160, %1164 : vector<8x8xf32>
    %1166 = math.exp %1165 : vector<8x8xf32>
    %1167 = arith.addf %1122, %1166 : vector<8x8xf32>
    %1168 = vector.extract_strided_slice %6 {offsets = [0, 1], sizes = [1, 1], strides = [1, 1]} : vector<1x4xf32> to vector<1x1xf32>
    %cst_123 = arith.constant 0.000000e+00 : f32
    %1169 = vector.broadcast %cst_123 : f32 to vector<1x1xf32>
    %1170 = arith.subf %1169, %1168 : vector<1x1xf32>
    %1171 = vector.broadcast %1170 : vector<1x1xf32> to vector<8x8xf32>
    %1172 = arith.mulf %1160, %1171 : vector<8x8xf32>
    %1173 = math.exp %1172 : vector<8x8xf32>
    %1174 = arith.addf %1129, %1173 : vector<8x8xf32>
    %1175 = vector.extract_strided_slice %6 {offsets = [0, 2], sizes = [1, 1], strides = [1, 1]} : vector<1x4xf32> to vector<1x1xf32>
    %cst_124 = arith.constant 0.000000e+00 : f32
    %1176 = vector.broadcast %cst_124 : f32 to vector<1x1xf32>
    %1177 = arith.subf %1176, %1175 : vector<1x1xf32>
    %1178 = vector.broadcast %1177 : vector<1x1xf32> to vector<8x8xf32>
    %1179 = arith.mulf %1160, %1178 : vector<8x8xf32>
    %1180 = math.exp %1179 : vector<8x8xf32>
    %1181 = arith.addf %1136, %1180 : vector<8x8xf32>
    %1182 = vector.extract_strided_slice %6 {offsets = [0, 3], sizes = [1, 1], strides = [1, 1]} : vector<1x4xf32> to vector<1x1xf32>
    %cst_125 = arith.constant 0.000000e+00 : f32
    %1183 = vector.broadcast %cst_125 : f32 to vector<1x1xf32>
    %1184 = arith.subf %1183, %1182 : vector<1x1xf32>
    %1185 = vector.broadcast %1184 : vector<1x1xf32> to vector<8x8xf32>
    %1186 = arith.mulf %1160, %1185 : vector<8x8xf32>
    %1187 = math.exp %1186 : vector<8x8xf32>
    %1188 = arith.addf %1143, %1187 : vector<8x8xf32>
    %1189 = vector.extract_strided_slice %3 {offsets = [0, 26], sizes = [8, 1], strides = [1, 1]} : vector<8x27xf32> to vector<8x1xf32>
    %1190 = vector.broadcast %0 : vector<1x8xf32> to vector<8x8xf32>
    %1191 = vector.broadcast %1189 : vector<8x1xf32> to vector<8x8xf32>
    %1192 = arith.addf %1190, %1191 : vector<8x8xf32>
    %1193 = vector.extract_strided_slice %4 {offsets = [0, 26], sizes = [8, 1], strides = [1, 1]} : vector<8x27xf32> to vector<8x1xf32>
    %1194 = vector.broadcast %1 : vector<1x8xf32> to vector<8x8xf32>
    %1195 = vector.broadcast %1193 : vector<8x1xf32> to vector<8x8xf32>
    %1196 = arith.addf %1194, %1195 : vector<8x8xf32>
    %1197 = vector.extract_strided_slice %5 {offsets = [0, 26], sizes = [8, 1], strides = [1, 1]} : vector<8x27xf32> to vector<8x1xf32>
    %1198 = vector.broadcast %2 : vector<1x8xf32> to vector<8x8xf32>
    %1199 = vector.broadcast %1197 : vector<8x1xf32> to vector<8x8xf32>
    %1200 = arith.addf %1198, %1199 : vector<8x8xf32>
    %1201 = arith.mulf %1192, %1192 : vector<8x8xf32>
    %1202 = arith.mulf %1196, %1196 : vector<8x8xf32>
    %1203 = arith.addf %1201, %1202 : vector<8x8xf32>
    %1204 = arith.mulf %1200, %1200 : vector<8x8xf32>
    %1205 = arith.addf %1203, %1204 : vector<8x8xf32>
    %1206 = vector.extract_strided_slice %6 {offsets = [0, 0], sizes = [1, 1], strides = [1, 1]} : vector<1x4xf32> to vector<1x1xf32>
    %cst_126 = arith.constant 0.000000e+00 : f32
    %1207 = vector.broadcast %cst_126 : f32 to vector<1x1xf32>
    %1208 = arith.subf %1207, %1206 : vector<1x1xf32>
    %1209 = vector.broadcast %1208 : vector<1x1xf32> to vector<8x8xf32>
    %1210 = arith.mulf %1205, %1209 : vector<8x8xf32>
    %1211 = math.exp %1210 : vector<8x8xf32>
    %1212 = arith.addf %1167, %1211 : vector<8x8xf32>
    %1213 = vector.extract_strided_slice %6 {offsets = [0, 1], sizes = [1, 1], strides = [1, 1]} : vector<1x4xf32> to vector<1x1xf32>
    %cst_127 = arith.constant 0.000000e+00 : f32
    %1214 = vector.broadcast %cst_127 : f32 to vector<1x1xf32>
    %1215 = arith.subf %1214, %1213 : vector<1x1xf32>
    %1216 = vector.broadcast %1215 : vector<1x1xf32> to vector<8x8xf32>
    %1217 = arith.mulf %1205, %1216 : vector<8x8xf32>
    %1218 = math.exp %1217 : vector<8x8xf32>
    %1219 = arith.addf %1174, %1218 : vector<8x8xf32>
    %1220 = vector.extract_strided_slice %6 {offsets = [0, 2], sizes = [1, 1], strides = [1, 1]} : vector<1x4xf32> to vector<1x1xf32>
    %cst_128 = arith.constant 0.000000e+00 : f32
    %1221 = vector.broadcast %cst_128 : f32 to vector<1x1xf32>
    %1222 = arith.subf %1221, %1220 : vector<1x1xf32>
    %1223 = vector.broadcast %1222 : vector<1x1xf32> to vector<8x8xf32>
    %1224 = arith.mulf %1205, %1223 : vector<8x8xf32>
    %1225 = math.exp %1224 : vector<8x8xf32>
    %1226 = arith.addf %1181, %1225 : vector<8x8xf32>
    %1227 = vector.extract_strided_slice %6 {offsets = [0, 3], sizes = [1, 1], strides = [1, 1]} : vector<1x4xf32> to vector<1x1xf32>
    %cst_129 = arith.constant 0.000000e+00 : f32
    %1228 = vector.broadcast %cst_129 : f32 to vector<1x1xf32>
    %1229 = arith.subf %1228, %1227 : vector<1x1xf32>
    %1230 = vector.broadcast %1229 : vector<1x1xf32> to vector<8x8xf32>
    %1231 = arith.mulf %1205, %1230 : vector<8x8xf32>
    %1232 = math.exp %1231 : vector<8x8xf32>
    %1233 = arith.addf %1188, %1232 : vector<8x8xf32>
    %1234 = math.log %1212 : vector<8x8xf32>
    %1235 = arith.addf %1234, %14 : vector<8x8xf32>
    %c0_130 = arith.constant 0 : index
    %c0_131 = arith.constant 0 : index
    %c0_132 = arith.constant 0 : index
    %1236 = vector.load %arg10[%c0_130, %c0_131, %c0_132] : memref<4x8x8xf32, #tpu.memory_space<vmem>>, vector<1x8x8xf32>
    %1237 = vector.shape_cast %1236 : vector<1x8x8xf32> to vector<8x8xf32>
    %1238 = vector.shape_cast %1235 : vector<8x8xf32> to vector<1x8x8xf32>
    tpu.vector_store %arg10[%c0_130, %c0_131, %c0_132], %1238 {strides = array<i32>} : memref<4x8x8xf32, #tpu.memory_space<vmem>>, vector<1x8x8xf32>,
    %1239 = math.log %1219 : vector<8x8xf32>
    %1240 = arith.addf %1239, %14 : vector<8x8xf32>
    %c1 = arith.constant 1 : index
    %c0_133 = arith.constant 0 : index
    %c0_134 = arith.constant 0 : index
    %1241 = vector.load %arg10[%c1, %c0_133, %c0_134] : memref<4x8x8xf32, #tpu.memory_space<vmem>>, vector<1x8x8xf32>
    %1242 = vector.shape_cast %1241 : vector<1x8x8xf32> to vector<8x8xf32>
    %1243 = vector.shape_cast %1240 : vector<8x8xf32> to vector<1x8x8xf32>
    tpu.vector_store %arg10[%c1, %c0_133, %c0_134], %1243 {strides = array<i32>} : memref<4x8x8xf32, #tpu.memory_space<vmem>>, vector<1x8x8xf32>,
    %1244 = math.log %1226 : vector<8x8xf32>
    %1245 = arith.addf %1244, %14 : vector<8x8xf32>
    %c2 = arith.constant 2 : index
    %c0_135 = arith.constant 0 : index
    %c0_136 = arith.constant 0 : index
    %1246 = vector.load %arg10[%c2, %c0_135, %c0_136] : memref<4x8x8xf32, #tpu.memory_space<vmem>>, vector<1x8x8xf32>
    %1247 = vector.shape_cast %1246 : vector<1x8x8xf32> to vector<8x8xf32>
    %1248 = vector.shape_cast %1245 : vector<8x8xf32> to vector<1x8x8xf32>
    tpu.vector_store %arg10[%c2, %c0_135, %c0_136], %1248 {strides = array<i32>} : memref<4x8x8xf32, #tpu.memory_space<vmem>>, vector<1x8x8xf32>,
    %1249 = math.log %1233 : vector<8x8xf32>
    %1250 = arith.addf %1249, %14 : vector<8x8xf32>
    %c3 = arith.constant 3 : index
    %c0_137 = arith.constant 0 : index
    %c0_138 = arith.constant 0 : index
    %1251 = vector.load %arg10[%c3, %c0_137, %c0_138] : memref<4x8x8xf32, #tpu.memory_space<vmem>>, vector<1x8x8xf32>
    %1252 = vector.shape_cast %1251 : vector<1x8x8xf32> to vector<8x8xf32>
    %1253 = vector.shape_cast %1250 : vector<8x8xf32> to vector<1x8x8xf32>
    tpu.vector_store %arg10[%c3, %c0_137, %c0_138], %1253 {strides = array<i32>} : memref<4x8x8xf32, #tpu.memory_space<vmem>>, vector<1x8x8xf32>,
    return
  }
  func.func @transform_0(%arg0: i32) -> (i32, i32) {
    %c0_i32 = arith.constant 0 : i32
    %c0_i32_0 = arith.constant 0 : i32
    %c0_i32_1 = arith.constant 0 : i32
    return %c0_i32, %c0_i32_0 : i32, i32
  }
  func.func @transform_1(%arg0: i32) -> (i32, i32) {
    %c0_i32 = arith.constant 0 : i32
    %c0_i32_0 = arith.constant 0 : i32
    %c0_i32_1 = arith.constant 0 : i32
    return %c0_i32, %c0_i32_0 : i32, i32
  }
  func.func @transform_2(%arg0: i32) -> (i32, i32) {
    %c0_i32 = arith.constant 0 : i32
    %c0_i32_0 = arith.constant 0 : i32
    %c0_i32_1 = arith.constant 0 : i32
    return %c0_i32, %c0_i32_0 : i32, i32
  }
  func.func @transform_3(%arg0: i32) -> (i32, i32) {
    %c0_i32 = arith.constant 0 : i32
    %c0_i32_0 = arith.constant 0 : i32
    %c0_i32_1 = arith.constant 0 : i32
    return %c0_i32, %c0_i32_0 : i32, i32
  }
  func.func @transform_4(%arg0: i32) -> (i32, i32) {
    %c0_i32 = arith.constant 0 : i32
    %c0_i32_0 = arith.constant 0 : i32
    return %arg0, %c0_i32 : i32, i32
  }
  func.func @transform_5(%arg0: i32) -> (i32, i32) {
    %c0_i32 = arith.constant 0 : i32
    %c0_i32_0 = arith.constant 0 : i32
    return %arg0, %c0_i32 : i32, i32
  }
  func.func @transform_6(%arg0: i32) -> (i32, i32) {
    %c0_i32 = arith.constant 0 : i32
    %c0_i32_0 = arith.constant 0 : i32
    return %arg0, %c0_i32 : i32, i32
  }
  func.func @transform_7(%arg0: i32) -> (i32, i32) {
    %c0_i32 = arith.constant 0 : i32
    %c0_i32_0 = arith.constant 0 : i32
    return %arg0, %c0_i32 : i32, i32
  }
  func.func @transform_8(%arg0: i32) -> (i32, i32) {
    %c0_i32 = arith.constant 0 : i32
    %c0_i32_0 = arith.constant 0 : i32
    %c0_i32_1 = arith.constant 0 : i32
    return %c0_i32, %c0_i32_0 : i32, i32
  }
  func.func @transform_9(%arg0: i32) -> (i32, i32, i32) {
    %c0_i32 = arith.constant 0 : i32
    %c0_i32_0 = arith.constant 0 : i32
    %c0_i32_1 = arith.constant 0 : i32
    return %c0_i32, %arg0, %c0_i32_0 : i32, i32, i32
  }
}

</mosaic_0001>

<bundles_post_ra>
// kernel: tpu_custom_call.1
= control target key start
LH: loop header
LB: loop body
LE: loop exit
PB: predicated region body
PF: predicated region fallthrough
CT: control target
= control target key end

     0   :  { %14 = vsyncpa [#allocation3], 0  ;;  %s2131_s0 = inlined_call_operand.hbm [shape: f32[1,4], index: 0, kind: input, shape index: {}]   ;;  %s2132_s1 = inlined_call_operand.hbm [shape: f32[1,8], index: 1, kind: input, shape index: {}]   ;;  %s2133_s2 = inlined_call_operand.hbm [shape: f32[1,8], index: 2, kind: input, shape index: {}]   ;;  %s2134_s3 = inlined_call_operand.hbm [shape: f32[1,8], index: 3, kind: input, shape index: {}]   ;;  %s2135_s4 = inlined_call_operand.vmem [shape: f32[8,27], index: 4, kind: input, shape index: {}]   ;;  %s2136_s5 = inlined_call_operand.vmem [shape: f32[8,27], index: 5, kind: input, shape index: {}]   ;;  %s2137_s6 = inlined_call_operand.hbm [shape: f32[8,27], index: 6, kind: input, shape index: {}]   ;;  %s2138_s7 = inlined_call_operand.vmem [shape: s32[8,1], index: 7, kind: input, shape index: {}]   ;;  %s2139_s8 = inlined_call_operand.vmem [shape: s32[1,8], index: 8, kind: input, shape index: {}]   ;;  %s2140_s9 = inlined_call_operand.hbm [shape: f32[4,8,8], index: 9, kind: output, shape index: {}]  }
   0x1   :  { %15 = vsyncpa [#allocation6], 0 }
   0x2   :  { %16 = vsyncpa [#allocation9], 0 }
   0x3   :  { %17 = vsyncpa [#allocation4], 0  ;;  %s1616_s30 = smov [#allocation5]   ;;  %s1617_s11 = smov [#allocation8]  }
   0x4   :  { %s34_s10 = sshll.u32 %s1616_s30, 4  ;;  %s54_s12 = sshll.u32 %s1617_s11, 4  ;;  %s35_s10 = int_to_ptr.vmem [resolvable:$true] %s34_s10  ;;  %s55_s12 = int_to_ptr.vmem [resolvable:$true] %s54_s12 }
   0x5   :  { %s1496_s13 = scalar_lea.vmem %s35_s10, 16  ;;  %s1500_s14 = scalar_lea.vmem %s35_s10, 32 }
   0x6   :  { %p1497_p0 = scmp.ne.s32.totalorder %s35_s10, %s1496_s13  ;;  %p1501_p1 = scmp.lt.s32.totalorder %s35_s10, %s35_s10 }
   0x7   :  { %p1502_p2 = scmp.lt.s32.totalorder %s1500_s14, %s1496_s13 }
   0x9   :  { %p1503_p3 = por %p1502_p2, %p1501_p1 }
   0xb   :  { %p1504_p4 = pnand %p1503_p3, %p1497_p0 }
   0xd   :  { %1507 = shalt.err (!%p1504_p4)
}
   0xe   :  { %37 = dma.hbm_to_vmem [thread:$0]  %s2132_s1, 16, %s35_s10, [#allocation6]  }
   0xf   :  { %s1516_s17 = scalar_lea.vmem %s55_s12, 16  ;;  %s1520_s18 = scalar_lea.vmem %s55_s12, 32 }
  0x10   :  { %p1517_p5 = scmp.ne.s32.totalorder %s55_s12, %s1516_s17  ;;  %p1521_p6 = scmp.lt.s32.totalorder %s55_s12, %s55_s12 }
  0x11   :  { %p1522_p7 = scmp.lt.s32.totalorder %s1520_s18, %s1516_s17 }
  0x13   :  { %p1523_p8 = por %p1522_p7, %p1521_p6 }
  0x15   :  { %p1524_p9 = pnand %p1523_p8, %p1517_p5 }
  0x17   :  { %1527 = shalt.err (!%p1524_p9)
}
  0x18   :  { %57 = dma.hbm_to_vmem [thread:$0]  %s2134_s3, 16, %s55_s12, [#allocation9]  }
  0x19   :  { %s1618_s21 = smov [#allocation2]   ;;  %s1619_s23 = smov [#allocation7]  }
  0x1a   :  { %s24_s22 = sshll.u32 %s1618_s21, 4  ;;  %s44_s24 = sshll.u32 %s1619_s23, 4  ;;  %s25_s22 = int_to_ptr.vmem [resolvable:$true] %s24_s22  ;;  %s45_s24 = int_to_ptr.vmem [resolvable:$true] %s44_s24 }
  0x1b   :  { %s1536_s25 = scalar_lea.vmem %s25_s22, 16  ;;  %s1540_s1 = scalar_lea.vmem %s25_s22, 32 }
  0x1c   :  { %p1537_p10 = scmp.ne.s32.totalorder %s25_s22, %s1536_s25  ;;  %p1541_p11 = scmp.lt.s32.totalorder %s25_s22, %s25_s22 }
  0x1d   :  { %p1542_p12 = scmp.lt.s32.totalorder %s1540_s1, %s1536_s25 }
  0x1f   :  { %p1543_p13 = por %p1542_p12, %p1541_p11 }
  0x21   :  { %p1544_p0 = pnand %p1543_p13, %p1537_p10 }
  0x23   :  { %1547 = shalt.err (!%p1544_p0)
}
  0x24   :  { %27 = dma.hbm_to_vmem [thread:$0]  %s2131_s0, 16, %s25_s22, [#allocation3]  }
  0x25   :  { %s1556_s28 = scalar_lea.vmem %s45_s24, 16  ;;  %s1560_s3 = scalar_lea.vmem %s45_s24, 32 }
  0x26   :  { %p1557_p1 = scmp.ne.s32.totalorder %s45_s24, %s1556_s28  ;;  %p1561_p2 = scmp.lt.s32.totalorder %s45_s24, %s45_s24 }
  0x27   :  { %p1562_p3 = scmp.lt.s32.totalorder %s1560_s3, %s1556_s28 }
  0x29   :  { %p1563_p4 = por %p1562_p3, %p1561_p2 }
  0x2b   :  { %p1564_p5 = pnand %p1563_p4, %p1557_p1 }
  0x2d   :  { %1567 = shalt.err (!%p1564_p5)
}
  0x2e   :  { %47 = dma.hbm_to_vmem [thread:$0]  %s2133_s2, 16, %s45_s24, [#allocation6]  }
  0x2f   :  { %s1620_s10 = smov [#allocation10]  }
  0x30   :  { %s68_s11 = sshll.u32 %s1620_s10, 4  ;;  %s69_s11 = int_to_ptr.vmem [resolvable:$true] %s68_s11 }
  0x31   :  { %s1576_s12 = scalar_lea.vmem %s69_s11, 128  ;;  %p1581_p7 = scmp.lt.s32.totalorder %s69_s11, %s69_s11 }
  0x32   :  { %p1577_p6 = scmp.ne.s32.totalorder %s69_s11, %s1576_s12  ;;  %p1582_p8 = scmp.lt.s32.totalorder %s1576_s12, %s1576_s12 }
  0x34   :  { %p1583_p9 = por %p1582_p8, %p1581_p7 }
  0x36   :  { %p1584_p10 = pnand %p1583_p9, %p1577_p6 }
  0x38   :  { %1587 = shalt.err (!%p1584_p10)
}
  0x39   :  { %71 = dma.hbm_to_vmem [thread:$0]  %s2137_s6, 128, %s69_s11, [#allocation9]  }
  0x3a   :  { %1608 = dma.done.wait [#allocation3], 16  }
  0x3b   :  { %1609 = vsyncadd [#allocation3], 4294967280 }
  0x3c   :  { %1610 = dma.done.wait [#allocation6], 32  }
  0x3d   :  { %1611 = vsyncadd [#allocation6], 4294967264 }
  0x3e   :  { %1612 = dma.done.wait [#allocation9], 144  }
  0x3f   :  { %1613 = vsyncadd [#allocation9], 4294967152  ;;  %v152_v0 = vlaneseq  ;;  %v1621_v1 = vmov 0   ;;  %v98_v3 = vld [vmem:[%s2138_s7] sm:$0xff]  ;;  %v1726_v7 = vld [vmem:[#allocation10] sm:$0xff]  ;;  %v1622_v11 = vmov 1  }
  0x40   :  { %1204 = vset.pattern.permute.xlu1 %v1621_v1  ;;  %1203 = vset.pattern.permute.xlu0 %v1621_v1  ;;  %v1723_v4 = vld [vmem:[%s2136_s5] sm:$0xff]  ;;  %v1623_v12 = vmov 3   ;;  %v1624_v13 = vmov 2   ;;  %v1625_v14 = vmov 4   ;;  %v1626_v15 = vmov 5   ;;  %s1649_s19 = smov [#allocation11]  }
  0x41   :  { %v153_v2 = vshrl.u32 %v152_v0, 7  ;;  %101 = vperm.xlu0 %1203, %v98_v3   ;;  %129 = vperm.xlu1 %1204, %v1723_v4   ;;  %v97_v5 = vld [vmem:[#allocation2] sm:$0x1]  ;;  %v1627_v16 = vmov 6   ;;  %v1628_v17 = vmov 7   ;;  %v1629_v18 = vmov 8  }
  0x42   :  { %v1731_v8 = vld [vmem:[%s2135_s4] sm:$0xff]  ;;  %v150_v9 = vsub.f32 0.0, %v97_v5  ;;  %v1630_v19 = vmov 9   ;;  %v1631_v20 = vmov 10   ;;  %v1632_v21 = vmov 11   ;;  %s1149_s20 = sshll.u32 %s1649_s19, 4  ;;  %s1150_s20 = int_to_ptr.vmem [resolvable:$true] %s1149_s20 }
  0x43   :  { %v154_v6 = vsub.s32 0, %v153_v2  ;;  %v1633_v22 = vmov 12   ;;  %v1634_v23 = vmov 13   ;;  %v1635_v24 = vmov 14   ;;  %v1801_v41 = vld [vmem:[#allocation5] ss:$0 sm:$0xff]  ;;  %p1593_p12 = scmp.lt.s32.totalorder %s1150_s20, %s1150_s20 }
  0x44   :  { %v1636_v25 = vmov 15   ;;  %v1637_v26 = vmov 16   ;;  %v1638_v27 = vmov 17   ;;  %v1639_v28 = vmov 18   ;;  %v1805_v43 = vld [vmem:[#allocation7] ss:$0 sm:$0xff] }
  0x45   :  { %141 = vperm.xlu1 %1204, %v1726_v7   ;;  %117 = vperm.xlu0 %1203, %v1731_v8   ;;  %v155_v10 = vrot.slane %v150_v9, %v154_v6  ;;  %v1640_v29 = vmov 19   ;;  %v1641_v30 = vmov 20   ;;  %v1642_v31 = vmov 21   ;;  %v1813_v48 = vld [vmem:[#allocation8] ss:$0 sm:$0xff] }
  0x46   :  { %v1643_v32 = vmov 22   ;;  %v1644_v35 = vmov 23   ;;  %v1645_v39 = vmov 24   ;;  %v1646_v42 = vmov 25  }
  0x47   :  { %v1647_v49 = vmov 26   ;;  %vm1127_vm1 = vcmask 64512  }
  0x49   :  { %1205 = vset.pattern.permute.xlu1 %v1622_v11  ;;  %157 = vperm.xlu0 %1203, %v155_v10  }
  0x4a   :  { %165 = vperm.xlu1 %1205, %v155_v10  }
  0x4d   :  { %1208 = vset.pattern.permute.xlu0 %v1622_v11 }
  0x4e   :  { %1206 = vset.pattern.permute.xlu1 %v1623_v12  ;;  %194 = vperm.xlu0 %1208, %v1723_v4  }
  0x4f   :  { %181 = vperm.xlu1 %1206, %v155_v10  }
  0x52   :  { %1209 = vset.pattern.permute.xlu0 %v1624_v13 }
  0x53   :  { %1207 = vset.pattern.permute.xlu1 %v1622_v11  ;;  %173 = vperm.xlu0 %1209, %v155_v10  }
  0x54   :  { %189 = vperm.xlu1 %1207, %v1731_v8  }
  0x57   :  { %230 = vperm.xlu0 %1209, %v1723_v4  }
  0x58   :  { %199 = vperm.xlu1 %1207, %v1726_v7  }
  0x5b   :  { %1212 = vset.pattern.permute.xlu0 %v1623_v12 }
  0x5c   :  { %1210 = vset.pattern.permute.xlu1 %v1624_v13  ;;  %266 = vperm.xlu0 %1212, %v1723_v4  }
  0x5d   :  { %225 = vperm.xlu1 %1210, %v1731_v8  }
  0x60   :  { %1214 = vset.pattern.permute.xlu0 %v1625_v14 }
  0x61   :  { %235 = vperm.xlu1 %1210, %v1726_v7   ;;  %302 = vperm.xlu0 %1214, %v1723_v4  }
  0x65   :  { %1211 = vset.pattern.permute.xlu1 %v1623_v12  ;;  %1216 = vset.pattern.permute.xlu0 %v1626_v15 }
  0x66   :  { %261 = vperm.xlu1 %1211, %v1731_v8   ;;  %338 = vperm.xlu0 %1216, %v1723_v4  }
  0x6a   :  { %271 = vperm.xlu1 %1211, %v1726_v7   ;;  %1218 = vset.pattern.permute.xlu0 %v1627_v16 }
  0x6b   :  { %374 = vperm.xlu0 %1218, %v1723_v4  }
  0x6e   :  { %1213 = vset.pattern.permute.xlu1 %v1625_v14 }
  0x6f   :  { %297 = vperm.xlu1 %1213, %v1731_v8   ;;  %1220 = vset.pattern.permute.xlu0 %v1628_v17 }
  0x70   :  { %410 = vperm.xlu0 %1220, %v1723_v4  }
  0x73   :  { %307 = vperm.xlu1 %1213, %v1726_v7  }
  0x74   :  { %1222 = vset.pattern.permute.xlu0 %v1629_v18 }
  0x75   :  { %446 = vperm.xlu0 %1222, %v1723_v4  }
  0x77   :  { %1215 = vset.pattern.permute.xlu1 %v1626_v15 }
  0x78   :  { %333 = vperm.xlu1 %1215, %v1731_v8  }
  0x79   :  { %1224 = vset.pattern.permute.xlu0 %v1630_v19 }
  0x7a   :  { %482 = vperm.xlu0 %1224, %v1723_v4  }
  0x7c   :  { %343 = vperm.xlu1 %1215, %v1726_v7  }
  0x7e   :  { %1226 = vset.pattern.permute.xlu0 %v1631_v20 }
  0x7f   :  { %518 = vperm.xlu0 %1226, %v1723_v4  }
  0x80   :  { %1217 = vset.pattern.permute.xlu1 %v1627_v16 }
  0x81   :  { %369 = vperm.xlu1 %1217, %v1731_v8  }
  0x83   :  { %1228 = vset.pattern.permute.xlu0 %v1632_v21 }
  0x84   :  { %554 = vperm.xlu0 %1228, %v1723_v4  }
  0x85   :  { %379 = vperm.xlu1 %1217, %v1726_v7  }
  0x88   :  { %1230 = vset.pattern.permute.xlu0 %v1633_v22 }
  0x89   :  { %1219 = vset.pattern.permute.xlu1 %v1628_v17  ;;  %590 = vperm.xlu0 %1230, %v1723_v4  }
  0x8a   :  { %405 = vperm.xlu1 %1219, %v1731_v8  }
  0x8d   :  { %1232 = vset.pattern.permute.xlu0 %v1634_v23 }
  0x8e   :  { %415 = vperm.xlu1 %1219, %v1726_v7   ;;  %626 = vperm.xlu0 %1232, %v1723_v4  }
  0x92   :  { %1221 = vset.pattern.permute.xlu1 %v1629_v18  ;;  %1234 = vset.pattern.permute.xlu0 %v1635_v24 }
  0x93   :  { %441 = vperm.xlu1 %1221, %v1731_v8   ;;  %662 = vperm.xlu0 %1234, %v1723_v4  }
  0x97   :  { %451 = vperm.xlu1 %1221, %v1726_v7   ;;  %1236 = vset.pattern.permute.xlu0 %v1636_v25 }
  0x98   :  { %698 = vperm.xlu0 %1236, %v1723_v4  }
  0x9b   :  { %1223 = vset.pattern.permute.xlu1 %v1630_v19 }
  0x9c   :  { %477 = vperm.xlu1 %1223, %v1731_v8   ;;  %1238 = vset.pattern.permute.xlu0 %v1637_v26 }
  0x9d   :  { %734 = vperm.xlu0 %1238, %v1723_v4  }
  0xa0   :  { %487 = vperm.xlu1 %1223, %v1726_v7  }
  0xa1   :  { %1240 = vset.pattern.permute.xlu0 %v1638_v27 }
  0xa2   :  { %770 = vperm.xlu0 %1240, %v1723_v4  }
  0xa4   :  { %1225 = vset.pattern.permute.xlu1 %v1631_v20 }
  0xa5   :  { %513 = vperm.xlu1 %1225, %v1731_v8  }
  0xa6   :  { %1242 = vset.pattern.permute.xlu0 %v1639_v28 }
  0xa7   :  { %806 = vperm.xlu0 %1242, %v1723_v4  }
  0xa9   :  { %523 = vperm.xlu1 %1225, %v1726_v7  }
  0xab   :  { %1244 = vset.pattern.permute.xlu0 %v1640_v29 }
  0xac   :  { %842 = vperm.xlu0 %1244, %v1723_v4  }
  0xad   :  { %1227 = vset.pattern.permute.xlu1 %v1632_v21 }
  0xae   :  { %549 = vperm.xlu1 %1227, %v1731_v8  }
  0xb0   :  { %1246 = vset.pattern.permute.xlu0 %v1641_v30 }
  0xb1   :  { %878 = vperm.xlu0 %1246, %v1723_v4  }
  0xb2   :  { %559 = vperm.xlu1 %1227, %v1726_v7  }
  0xb5   :  { %1248 = vset.pattern.permute.xlu0 %v1642_v31 }
  0xb6   :  { %1229 = vset.pattern.permute.xlu1 %v1633_v22  ;;  %914 = vperm.xlu0 %1248, %v1723_v4  }
  0xb7   :  { %585 = vperm.xlu1 %1229, %v1731_v8  }
  0xba   :  { %1250 = vset.pattern.permute.xlu0 %v1643_v32 }
  0xbb   :  { %595 = vperm.xlu1 %1229, %v1726_v7   ;;  %950 = vperm.xlu0 %1250, %v1723_v4  }
  0xbc   :  { %v1789_v33 = vpop.permute.xlu0 %101  ;;  %v130_v34 = vpop.permute.xlu1 %129 }
  0xbd   :  { %v132_v47 = vadd.f32 %v1805_v43, %v130_v34 }
  0xbf   :  { %1231 = vset.pattern.permute.xlu1 %v1634_v23  ;;  %1252 = vset.pattern.permute.xlu0 %v1644_v35  ;;  %v146_v53 = vmul.f32 %v132_v47, %v132_v47 }
  0xc0   :  { %v142_v36 = vpop.permute.xlu1 %141  ;;  %621 = vperm.xlu1 %1231, %v1731_v8   ;;  %v118_v37 = vpop.permute.xlu0 %117  ;;  %986 = vperm.xlu0 %1252, %v1723_v4  }
  0xc1   :  { %v120_v46 = vadd.f32 %v1801_v41, %v118_v37  ;;  %v144_v54 = vadd.f32 %v1813_v48, %v142_v36 }
  0xc3   :  { %v145_v50 = vmul.f32 %v120_v46, %v120_v46  ;;  %v148_v61 = vmul.f32 %v144_v54, %v144_v54 }
  0xc4   :  { %631 = vperm.xlu1 %1231, %v1726_v7   ;;  %v1795_v38 = vpop.permute.xlu0 %157  ;;  %1254 = vset.pattern.permute.xlu0 %v1645_v39 }
  0xc5   :  { %v1798_v40 = vpop.permute.xlu1 %165  ;;  %1022 = vperm.xlu0 %1254, %v1723_v4   ;;  %v147_v57 = vadd.f32 %v146_v53, %v145_v50 }
  0xc7   :  { %v149_v0 = vadd.f32 %v148_v61, %v147_v57 }
  0xc8   :  { %1233 = vset.pattern.permute.xlu1 %v1635_v24 }
  0xc9   :  { %657 = vperm.xlu1 %1233, %v1731_v8   ;;  %1256 = vset.pattern.permute.xlu0 %v1646_v42  ;;  %v195_v45 = vpop.permute.xlu0 %194  ;;  %v160_v6 = vmul.f32 %v1795_v38, %v149_v0  ;;  %v168_v13 = vmul.f32 %v1798_v40, %v149_v0 }
  0xca   :  { %v1807_v44 = vpop.permute.xlu1 %181  ;;  %1058 = vperm.xlu0 %1256, %v1723_v4   ;;  %v197_v55 = vadd.f32 %v1805_v43, %v195_v45 }
  0xcb   :  { %v161_v17 = vmul.f32 1.442695, %v160_v6  ;;  %v169_v23 = vmul.f32 1.442695, %v168_v13  ;;  %v184_v57 = vmul.f32 %v1807_v44, %v149_v0 }
  0xcc   :  { %v204_v62 = vmul.f32 %v197_v55, %v197_v55 }
  0xcd   :  { %667 = vperm.xlu1 %1233, %v1726_v7   ;;  %1259 = vpow2.f32 %v161_v17 }
  0xce   :  { %1258 = vset.pattern.permute.xlu0 %v1647_v49  ;;  %v1817_v52 = vpop.permute.xlu0 %173  ;;  %1261 = vpow2.f32 %v169_v23 }
  0xcf   :  { %v190_v51 = vpop.permute.xlu1 %189  ;;  %1094 = vperm.xlu0 %1258, %v1723_v4   ;;  %v176_v16 = vmul.f32 %v1817_v52, %v149_v0 }
  0xd0   :  { %v192_v56 = vadd.f32 %v1801_v41, %v190_v51 }
  0xd1   :  { %1235 = vset.pattern.permute.xlu1 %v1636_v25  ;;  %v177_v34 = vmul.f32 1.442695, %v176_v16 }
  0xd2   :  { %693 = vperm.xlu1 %1235, %v1731_v8   ;;  %v231_v60 = vpop.permute.xlu0 %230  ;;  %v203_v63 = vmul.f32 %v192_v56, %v192_v56 }
  0xd3   :  { %v200_v58 = vpop.permute.xlu1 %199  ;;  %v233_v2 = vadd.f32 %v1805_v43, %v231_v60  ;;  %1263 = vpow2.f32 %v177_v34 }
  0xd4   :  { %v202_v59 = vadd.f32 %v1813_v48, %v200_v58  ;;  %v205_v4 = vadd.f32 %v204_v62, %v203_v63 }
  0xd5   :  { %v240_v11 = vmul.f32 %v233_v2, %v233_v2 }
  0xd6   :  { %703 = vperm.xlu1 %1235, %v1726_v7   ;;  %v206_v1 = vmul.f32 %v202_v59, %v202_v59 }
  0xd7   :  { %v267_v15 = vpop.permute.xlu0 %266 }
  0xd8   :  { %v226_v3 = vpop.permute.xlu1 %225  ;;  %v207_v9 = vadd.f32 %v206_v1, %v205_v4  ;;  %v269_v22 = vadd.f32 %v1805_v43, %v267_v15  ;;  %v185_v4 = vmul.f32 1.442695, %v184_v57 }
  0xd9   :  { %v228_v5 = vadd.f32 %v1801_v41, %v226_v3 }
  0xda   :  { %1237 = vset.pattern.permute.xlu1 %v1637_v26  ;;  %v208_v18 = vmul.f32 %v207_v9, %v1795_v38  ;;  %v212_v21 = vmul.f32 %v207_v9, %v1798_v40  ;;  %v216_v24 = vmul.f32 %v207_v9, %v1817_v52  ;;  %v220_v36 = vmul.f32 %v207_v9, %v1807_v44  ;;  %v1260_v23 = vpop.eup %1259 }
  0xdb   :  { %v239_v10 = vmul.f32 %v228_v5, %v228_v5  ;;  %729 = vperm.xlu1 %1237, %v1731_v8   ;;  %v276_v53 = vmul.f32 %v269_v22, %v269_v22 }
  0xdc   :  { %v236_v12 = vpop.permute.xlu1 %235  ;;  %v209_v45 = vmul.f32 1.442695, %v208_v18  ;;  %v213_v47 = vmul.f32 1.442695, %v212_v21  ;;  %v217_v54 = vmul.f32 1.442695, %v216_v24  ;;  %v303_v60 = vpop.permute.xlu0 %302 }
  0xdd   :  { %v238_v14 = vadd.f32 %v1813_v48, %v236_v12  ;;  %v241_v19 = vadd.f32 %v240_v11, %v239_v10  ;;  %v221_v58 = vmul.f32 1.442695, %v220_v36  ;;  %v305_v3 = vadd.f32 %v1805_v43, %v303_v60 }
  0xde   :  { %1265 = vpow2.f32 %v209_v45 }
  0xdf   :  { %v242_v20 = vmul.f32 %v238_v14, %v238_v14  ;;  %739 = vperm.xlu1 %1237, %v1726_v7   ;;  %1267 = vpow2.f32 %v213_v47  ;;  %v312_v15 = vmul.f32 %v305_v3, %v305_v3 }
  0xe0   :  { %1269 = vpow2.f32 %v217_v54 }
  0xe1   :  { %v243_v25 = vadd.f32 %v242_v20, %v241_v19  ;;  %v262_v26 = vpop.permute.xlu1 %261  ;;  %1271 = vpow2.f32 %v221_v58  ;;  %v339_v22 = vpop.permute.xlu0 %338 }
  0xe2   :  { %v264_v37 = vadd.f32 %v1801_v41, %v262_v26  ;;  %v341_v26 = vadd.f32 %v1805_v43, %v339_v22 }
  0xe3   :  { %v244_v46 = vmul.f32 %v243_v25, %v1795_v38  ;;  %1239 = vset.pattern.permute.xlu1 %v1638_v27  ;;  %v248_v50 = vmul.f32 %v243_v25, %v1798_v40  ;;  %v252_v55 = vmul.f32 %v243_v25, %v1817_v52  ;;  %v256_v61 = vmul.f32 %v243_v25, %v1807_v44  ;;  %v1262_v25 = vpop.eup %1261 }
  0xe4   :  { %v275_v51 = vmul.f32 %v264_v37, %v264_v37  ;;  %765 = vperm.xlu1 %1239, %v1731_v8   ;;  %v1264_v34 = vpop.eup %1263  ;;  %v348_v58 = vmul.f32 %v341_v26, %v341_v26 }
  0xe5   :  { %v272_v56 = vpop.permute.xlu1 %271  ;;  %v245_v27 = vmul.f32 1.442695, %v244_v46  ;;  %v249_v62 = vmul.f32 1.442695, %v248_v50  ;;  %v253_v2 = vmul.f32 1.442695, %v252_v55 }
  0xe6   :  { %v274_v59 = vadd.f32 %v1813_v48, %v272_v56  ;;  %v277_v63 = vadd.f32 %v276_v53, %v275_v51  ;;  %v257_v6 = vmul.f32 1.442695, %v256_v61  ;;  %v375_v54 = vpop.permute.xlu0 %374 }
  0xe7   :  { %1273 = vpow2.f32 %v245_v27  ;;  %v377_v3 = vadd.f32 %v1805_v43, %v375_v54 }
  0xe8   :  { %v278_v1 = vmul.f32 %v274_v59, %v274_v59  ;;  %775 = vperm.xlu1 %1239, %v1726_v7   ;;  %1275 = vpow2.f32 %v249_v62 }
  0xe9   :  { %1277 = vpow2.f32 %v253_v2 }
  0xea   :  { %v279_v0 = vadd.f32 %v278_v1, %v277_v63  ;;  %v298_v5 = vpop.permute.xlu1 %297  ;;  %1279 = vpow2.f32 %v185_v4 }
  0xeb   :  { %v300_v9 = vadd.f32 %v1801_v41, %v298_v5  ;;  %1281 = vpow2.f32 %v257_v6  ;;  %v1266_v45 = vpop.eup %1265 }
  0xec   :  { %v280_v10 = vmul.f32 %v279_v0, %v1795_v38  ;;  %v284_v11 = vmul.f32 %v279_v0, %v1798_v40  ;;  %v288_v12 = vmul.f32 %v279_v0, %v1817_v52  ;;  %1241 = vset.pattern.permute.xlu1 %v1639_v28  ;;  %v292_v13 = vmul.f32 %v279_v0, %v1807_v44  ;;  %v1268_v47 = vpop.eup %1267 }
  0xed   :  { %v311_v14 = vmul.f32 %v300_v9, %v300_v9  ;;  %801 = vperm.xlu1 %1241, %v1731_v8   ;;  %v1270_v55 = vpop.eup %1269  ;;  %v211_v0 = vadd.f32 %v1266_v45, %v1260_v23 }
  0xee   :  { %v281_v16 = vmul.f32 1.442695, %v280_v10  ;;  %v285_v17 = vmul.f32 1.442695, %v284_v11  ;;  %v289_v18 = vmul.f32 1.442695, %v288_v12  ;;  %v308_v19 = vpop.permute.xlu1 %307  ;;  %v1272_v59 = vpop.eup %1271  ;;  %v215_v10 = vadd.f32 %v1268_v47, %v1262_v25 }
  0xef   :  { %v293_v20 = vmul.f32 1.442695, %v292_v13  ;;  %v310_v21 = vadd.f32 %v1813_v48, %v308_v19  ;;  %v313_v28 = vadd.f32 %v312_v15, %v311_v14  ;;  %v219_v11 = vadd.f32 %v1270_v55, %v1264_v34 }
  0xf0   :  { %1283 = vpow2.f32 %v281_v16  ;;  %v384_v16 = vmul.f32 %v377_v3, %v377_v3 }
  0xf1   :  { %1285 = vpow2.f32 %v285_v17  ;;  %v314_v24 = vmul.f32 %v310_v21, %v310_v21  ;;  %811 = vperm.xlu1 %1241, %v1726_v7  }
  0xf2   :  { %1287 = vpow2.f32 %v289_v18 }
  0xf3   :  { %1289 = vpow2.f32 %v293_v20  ;;  %v315_v36 = vadd.f32 %v314_v24, %v313_v28  ;;  %v334_v37 = vpop.permute.xlu1 %333 }
  0xf4   :  { %v336_v46 = vadd.f32 %v1801_v41, %v334_v37  ;;  %v1274_v63 = vpop.eup %1273 }
  0xf5   :  { %v316_v50 = vmul.f32 %v315_v36, %v1795_v38  ;;  %v320_v51 = vmul.f32 %v315_v36, %v1798_v40  ;;  %v324_v53 = vmul.f32 %v315_v36, %v1817_v52  ;;  %1243 = vset.pattern.permute.xlu1 %v1640_v29  ;;  %v328_v56 = vmul.f32 %v315_v36, %v1807_v44  ;;  %v1276_v29 = vpop.eup %1275 }
  0xf6   :  { %v347_v57 = vmul.f32 %v336_v46, %v336_v46  ;;  %837 = vperm.xlu1 %1243, %v1731_v8   ;;  %v1278_v4 = vpop.eup %1277  ;;  %v247_v13 = vadd.f32 %v1274_v63, %v211_v0  ;;  %v251_v19 = vadd.f32 %v1276_v29, %v215_v10 }
  0xf7   :  { %v317_v60 = vmul.f32 1.442695, %v316_v50  ;;  %v321_v27 = vmul.f32 1.442695, %v320_v51  ;;  %v325_v61 = vmul.f32 1.442695, %v324_v53  ;;  %v344_v62 = vpop.permute.xlu1 %343  ;;  %v1280_v9 = vpop.eup %1279  ;;  %v255_v20 = vadd.f32 %v1278_v4, %v219_v11 }
  0xf8   :  { %v329_v1 = vmul.f32 1.442695, %v328_v56  ;;  %v346_v2 = vadd.f32 %v1813_v48, %v344_v62  ;;  %v349_v5 = vadd.f32 %v348_v58, %v347_v57  ;;  %v1282_v12 = vpop.eup %1281  ;;  %v223_v18 = vadd.f32 %v1280_v9, %v1272_v59  ;;  %v411_v58 = vpop.permute.xlu0 %410 }
  0xf9   :  { %1291 = vpow2.f32 %v317_v60  ;;  %v413_v60 = vadd.f32 %v1805_v43, %v411_v58 }
  0xfa   :  { %1293 = vpow2.f32 %v321_v27  ;;  %v350_v6 = vmul.f32 %v346_v2, %v346_v2  ;;  %847 = vperm.xlu1 %1243, %v1726_v7   ;;  %v259_v34 = vadd.f32 %v1282_v12, %v223_v18 }
  0xfb   :  { %1295 = vpow2.f32 %v325_v61  ;;  %v420_v10 = vmul.f32 %v413_v60, %v413_v60 }
  0xfc   :  { %1297 = vpow2.f32 %v329_v1  ;;  %v351_v14 = vadd.f32 %v350_v6, %v349_v5  ;;  %v370_v15 = vpop.permute.xlu1 %369 }
  0xfd   :  { %v1284_v17 = vpop.eup %1283  ;;  %v372_v21 = vadd.f32 %v1801_v41, %v370_v15 }
  0xfe   :  { %v1286_v22 = vpop.eup %1285  ;;  %v283_v23 = vadd.f32 %v1284_v17, %v247_v13  ;;  %v352_v28 = vmul.f32 %v351_v14, %v1795_v38  ;;  %v356_v24 = vmul.f32 %v351_v14, %v1798_v40  ;;  %v360_v25 = vmul.f32 %v351_v14, %v1817_v52  ;;  %1245 = vset.pattern.permute.xlu1 %v1641_v30 }
  0xff   :  { %v1288_v26 = vpop.eup %1287  ;;  %v287_v36 = vadd.f32 %v1286_v22, %v251_v19  ;;  %v364_v37 = vmul.f32 %v351_v14, %v1807_v44  ;;  %v383_v45 = vmul.f32 %v372_v21, %v372_v21  ;;  %873 = vperm.xlu1 %1245, %v1731_v8  }
 0x100   :  { %v1290_v46 = vpop.eup %1289  ;;  %v291_v47 = vadd.f32 %v1288_v26, %v255_v20  ;;  %v353_v50 = vmul.f32 1.442695, %v352_v28  ;;  %v357_v51 = vmul.f32 1.442695, %v356_v24  ;;  %v361_v53 = vmul.f32 1.442695, %v360_v25  ;;  %v380_v54 = vpop.permute.xlu1 %379 }
 0x101   :  { %v295_v55 = vadd.f32 %v1290_v46, %v259_v34  ;;  %v365_v56 = vmul.f32 1.442695, %v364_v37  ;;  %v382_v57 = vadd.f32 %v1813_v48, %v380_v54  ;;  %v385_v30 = vadd.f32 %v384_v16, %v383_v45  ;;  %v447_v20 = vpop.permute.xlu0 %446 }
 0x102   :  { %1299 = vpow2.f32 %v353_v50  ;;  %v449_v22 = vadd.f32 %v1805_v43, %v447_v20 }
 0x103   :  { %1301 = vpow2.f32 %v357_v51  ;;  %v386_v59 = vmul.f32 %v382_v57, %v382_v57  ;;  %883 = vperm.xlu1 %1245, %v1726_v7  }
 0x104   :  { %1303 = vpow2.f32 %v361_v53  ;;  %v456_v53 = vmul.f32 %v449_v22, %v449_v22 }
 0x105   :  { %1305 = vpow2.f32 %v365_v56  ;;  %v387_v27 = vadd.f32 %v386_v59, %v385_v30  ;;  %v406_v61 = vpop.permute.xlu1 %405 }
 0x106   :  { %v1292_v62 = vpop.eup %1291  ;;  %v408_v63 = vadd.f32 %v1801_v41, %v406_v61  ;;  %v483_v61 = vpop.permute.xlu0 %482 }
 0x107   :  { %v1294_v1 = vpop.eup %1293  ;;  %v319_v2 = vadd.f32 %v1292_v62, %v283_v23  ;;  %v388_v3 = vmul.f32 %v387_v27, %v1795_v38  ;;  %v392_v29 = vmul.f32 %v387_v27, %v1798_v40  ;;  %v396_v4 = vmul.f32 %v387_v27, %v1817_v52  ;;  %1247 = vset.pattern.permute.xlu1 %v1642_v31 }
 0x108   :  { %v1296_v0 = vpop.eup %1295  ;;  %v323_v5 = vadd.f32 %v1294_v1, %v287_v36  ;;  %v400_v6 = vmul.f32 %v387_v27, %v1807_v44  ;;  %v419_v9 = vmul.f32 %v408_v63, %v408_v63  ;;  %909 = vperm.xlu1 %1247, %v1731_v8   ;;  %v485_v63 = vadd.f32 %v1805_v43, %v483_v61 }
 0x109   :  { %v1298_v11 = vpop.eup %1297  ;;  %v327_v12 = vadd.f32 %v1296_v0, %v291_v47  ;;  %v389_v13 = vmul.f32 1.442695, %v388_v3  ;;  %v393_v14 = vmul.f32 1.442695, %v392_v29  ;;  %v397_v15 = vmul.f32 1.442695, %v396_v4  ;;  %v416_v16 = vpop.permute.xlu1 %415 }
 0x10a   :  { %v331_v17 = vadd.f32 %v1298_v11, %v295_v55  ;;  %v401_v18 = vmul.f32 1.442695, %v400_v6  ;;  %v418_v19 = vadd.f32 %v1813_v48, %v416_v16  ;;  %v421_v31 = vadd.f32 %v420_v10, %v419_v9 }
 0x10b   :  { %1307 = vpow2.f32 %v389_v13 }
 0x10c   :  { %1309 = vpow2.f32 %v393_v14  ;;  %v422_v21 = vmul.f32 %v418_v19, %v418_v19  ;;  %919 = vperm.xlu1 %1247, %v1726_v7   ;;  %v492_v14 = vmul.f32 %v485_v63, %v485_v63 }
 0x10d   :  { %1311 = vpow2.f32 %v397_v15 }
 0x10e   :  { %1313 = vpow2.f32 %v401_v18  ;;  %v423_v23 = vadd.f32 %v422_v21, %v421_v31  ;;  %v442_v28 = vpop.permute.xlu1 %441 }
 0x10f   :  { %v1300_v24 = vpop.eup %1299  ;;  %v444_v25 = vadd.f32 %v1801_v41, %v442_v28 }
 0x110   :  { %v1302_v26 = vpop.eup %1301  ;;  %v355_v34 = vadd.f32 %v1300_v24, %v319_v2  ;;  %v424_v36 = vmul.f32 %v423_v23, %v1795_v38  ;;  %v428_v37 = vmul.f32 %v423_v23, %v1798_v40  ;;  %v432_v45 = vmul.f32 %v423_v23, %v1817_v52  ;;  %1249 = vset.pattern.permute.xlu1 %v1643_v32 }
 0x111   :  { %v1304_v46 = vpop.eup %1303  ;;  %v359_v47 = vadd.f32 %v1302_v26, %v323_v5  ;;  %v436_v50 = vmul.f32 %v423_v23, %v1807_v44  ;;  %v455_v51 = vmul.f32 %v444_v25, %v444_v25  ;;  %945 = vperm.xlu1 %1249, %v1731_v8   ;;  %v519_v23 = vpop.permute.xlu0 %518 }
 0x112   :  { %v1306_v54 = vpop.eup %1305  ;;  %v363_v55 = vadd.f32 %v1304_v46, %v327_v12  ;;  %v425_v56 = vmul.f32 1.442695, %v424_v36  ;;  %v429_v57 = vmul.f32 1.442695, %v428_v37  ;;  %v433_v58 = vmul.f32 1.442695, %v432_v45  ;;  %v452_v30 = vpop.permute.xlu1 %451 }
 0x113   :  { %v367_v59 = vadd.f32 %v1306_v54, %v331_v17  ;;  %v437_v60 = vmul.f32 1.442695, %v436_v50  ;;  %v454_v27 = vadd.f32 %v1813_v48, %v452_v30  ;;  %v457_v32 = vadd.f32 %v456_v53, %v455_v51 }
 0x114   :  { %1315 = vpow2.f32 %v425_v56  ;;  %v521_v24 = vadd.f32 %v1805_v43, %v519_v23 }
 0x115   :  { %1317 = vpow2.f32 %v429_v57  ;;  %v458_v62 = vmul.f32 %v454_v27, %v454_v27  ;;  %955 = vperm.xlu1 %1249, %v1726_v7   ;;  %v555_v63 = vpop.permute.xlu0 %554 }
 0x116   :  { %1319 = vpow2.f32 %v433_v58  ;;  %v528_v56 = vmul.f32 %v521_v24, %v521_v24 }
 0x117   :  { %1321 = vpow2.f32 %v437_v60  ;;  %v459_v1 = vadd.f32 %v458_v62, %v457_v32  ;;  %v478_v2 = vpop.permute.xlu1 %477 }
 0x118   :  { %v1308_v3 = vpop.eup %1307  ;;  %v480_v29 = vadd.f32 %v1801_v41, %v478_v2  ;;  %v557_v2 = vadd.f32 %v1805_v43, %v555_v63 }
 0x119   :  { %v1310_v4 = vpop.eup %1309  ;;  %v391_v0 = vadd.f32 %v1308_v3, %v355_v34  ;;  %v460_v5 = vmul.f32 %v459_v1, %v1795_v38  ;;  %v464_v6 = vmul.f32 %v459_v1, %v1798_v40  ;;  %v468_v9 = vmul.f32 %v459_v1, %v1817_v52  ;;  %1251 = vset.pattern.permute.xlu1 %v1644_v35 }
 0x11a   :  { %v1312_v10 = vpop.eup %1311  ;;  %v395_v11 = vadd.f32 %v1310_v4, %v359_v47  ;;  %v472_v12 = vmul.f32 %v459_v1, %v1807_v44  ;;  %v491_v13 = vmul.f32 %v480_v29, %v480_v29  ;;  %981 = vperm.xlu1 %1251, %v1731_v8  }
 0x11b   :  { %v1314_v15 = vpop.eup %1313  ;;  %v399_v16 = vadd.f32 %v1312_v10, %v363_v55  ;;  %v461_v17 = vmul.f32 1.442695, %v460_v5  ;;  %v465_v18 = vmul.f32 1.442695, %v464_v6  ;;  %v469_v19 = vmul.f32 1.442695, %v468_v9  ;;  %v488_v20 = vpop.permute.xlu1 %487 }
 0x11c   :  { %v403_v31 = vadd.f32 %v1314_v15, %v367_v59  ;;  %v473_v21 = vmul.f32 1.442695, %v472_v12  ;;  %v490_v22 = vadd.f32 %v1813_v48, %v488_v20  ;;  %v493_v35 = vadd.f32 %v492_v14, %v491_v13 }
 0x11d   :  { %1323 = vpow2.f32 %v461_v17 }
 0x11e   :  { %1325 = vpow2.f32 %v465_v18  ;;  %v494_v28 = vmul.f32 %v490_v22, %v490_v22  ;;  %991 = vperm.xlu1 %1251, %v1726_v7  }
 0x11f   :  { %1327 = vpow2.f32 %v469_v19 }
 0x120   :  { %1329 = vpow2.f32 %v473_v21  ;;  %v495_v25 = vadd.f32 %v494_v28, %v493_v35  ;;  %v514_v26 = vpop.permute.xlu1 %513  ;;  %v591_v28 = vpop.permute.xlu0 %590 }
 0x121   :  { %v1316_v34 = vpop.eup %1315  ;;  %v516_v36 = vadd.f32 %v1801_v41, %v514_v26 }
 0x122   :  { %v1318_v37 = vpop.eup %1317  ;;  %v427_v45 = vadd.f32 %v1316_v34, %v391_v0  ;;  %v496_v46 = vmul.f32 %v495_v25, %v1795_v38  ;;  %v500_v47 = vmul.f32 %v495_v25, %v1798_v40  ;;  %v504_v50 = vmul.f32 %v495_v25, %v1817_v52  ;;  %1253 = vset.pattern.permute.xlu1 %v1645_v39 }
 0x123   :  { %v1320_v51 = vpop.eup %1319  ;;  %v431_v53 = vadd.f32 %v1318_v37, %v395_v11  ;;  %v508_v54 = vmul.f32 %v495_v25, %v1807_v44  ;;  %v527_v55 = vmul.f32 %v516_v36, %v516_v36  ;;  %1017 = vperm.xlu1 %1253, %v1731_v8  }
 0x124   :  { %v1322_v57 = vpop.eup %1321  ;;  %v435_v58 = vadd.f32 %v1320_v51, %v399_v16  ;;  %v497_v30 = vmul.f32 1.442695, %v496_v46  ;;  %v501_v59 = vmul.f32 1.442695, %v500_v47  ;;  %v505_v60 = vmul.f32 1.442695, %v504_v50  ;;  %v524_v27 = vpop.permute.xlu1 %523 }
 0x125   :  { %v439_v61 = vadd.f32 %v1322_v57, %v403_v31  ;;  %v509_v32 = vmul.f32 1.442695, %v508_v54  ;;  %v526_v62 = vadd.f32 %v1813_v48, %v524_v27  ;;  %v529_v39 = vadd.f32 %v528_v56, %v527_v55  ;;  %v1483_v56 = vld [vmem:[%s2135_s4] sm:$0xff] }
 0x126   :  { %1331 = vpow2.f32 %v497_v30  ;;  %v564_v16 = vmul.f32 %v557_v2, %v557_v2 }
 0x127   :  { %1333 = vpow2.f32 %v501_v59  ;;  %v530_v1 = vmul.f32 %v526_v62, %v526_v62  ;;  %1027 = vperm.xlu1 %1253, %v1726_v7   ;;  %v627_v62 = vpop.permute.xlu0 %626 }
 0x128   :  { %1335 = vpow2.f32 %v505_v60  ;;  %v629_v2 = vadd.f32 %v1805_v43, %v627_v62 }
 0x129   :  { %1337 = vpow2.f32 %v509_v32  ;;  %v531_v3 = vadd.f32 %v530_v1, %v529_v39  ;;  %v550_v29 = vpop.permute.xlu1 %549  ;;  %v1484_v1 = vld [vmem:[#allocation10] sm:$0xff] }
 0x12a   :  { %v1324_v4 = vpop.eup %1323  ;;  %v552_v0 = vadd.f32 %v1801_v41, %v550_v29 }
 0x12b   :  { %v1326_v5 = vpop.eup %1325  ;;  %v463_v6 = vadd.f32 %v1324_v4, %v427_v45  ;;  %v532_v9 = vmul.f32 %v531_v3, %v1795_v38  ;;  %v536_v10 = vmul.f32 %v531_v3, %v1798_v40  ;;  %v540_v11 = vmul.f32 %v531_v3, %v1817_v52  ;;  %1255 = vset.pattern.permute.xlu1 %v1646_v42 }
 0x12c   :  { %v1328_v12 = vpop.eup %1327  ;;  %v467_v13 = vadd.f32 %v1326_v5, %v431_v53  ;;  %v544_v14 = vmul.f32 %v531_v3, %v1807_v44  ;;  %v563_v15 = vmul.f32 %v552_v0, %v552_v0  ;;  %1053 = vperm.xlu1 %1255, %v1731_v8   ;;  %v593_v8 = vadd.f32 %v1805_v43, %v591_v28  ;;  %v663_v28 = vpop.permute.xlu0 %662 }
 0x12d   :  { %v1330_v17 = vpop.eup %1329  ;;  %v471_v18 = vadd.f32 %v1328_v12, %v435_v58  ;;  %v533_v19 = vmul.f32 1.442695, %v532_v9  ;;  %v537_v20 = vmul.f32 1.442695, %v536_v10  ;;  %v541_v31 = vmul.f32 1.442695, %v540_v11  ;;  %v560_v21 = vpop.permute.xlu1 %559 }
 0x12e   :  { %v475_v22 = vadd.f32 %v1330_v17, %v439_v61  ;;  %v545_v23 = vmul.f32 1.442695, %v544_v14  ;;  %v562_v35 = vadd.f32 %v1813_v48, %v560_v21  ;;  %v565_v42 = vadd.f32 %v564_v16, %v563_v15 }
 0x12f   :  { %1339 = vpow2.f32 %v533_v19  ;;  %v600_v55 = vmul.f32 %v593_v8, %v593_v8  ;;  %v636_v16 = vmul.f32 %v629_v2, %v629_v2  ;;  %v665_v8 = vadd.f32 %v1805_v43, %v663_v28 }
 0x130   :  { %1341 = vpow2.f32 %v537_v20  ;;  %v566_v24 = vmul.f32 %v562_v35, %v562_v35  ;;  %1063 = vperm.xlu1 %1255, %v1726_v7  }
 0x131   :  { %1343 = vpow2.f32 %v541_v31 }
 0x132   :  { %1345 = vpow2.f32 %v545_v23  ;;  %v567_v25 = vadd.f32 %v566_v24, %v565_v42  ;;  %v586_v26 = vpop.permute.xlu1 %585 }
 0x133   :  { %v1332_v34 = vpop.eup %1331  ;;  %v588_v36 = vadd.f32 %v1801_v41, %v586_v26 }
 0x134   :  { %v1334_v37 = vpop.eup %1333  ;;  %v499_v45 = vadd.f32 %v1332_v34, %v463_v6  ;;  %v568_v46 = vmul.f32 %v567_v25, %v1795_v38  ;;  %v572_v47 = vmul.f32 %v567_v25, %v1798_v40  ;;  %v576_v50 = vmul.f32 %v567_v25, %v1817_v52  ;;  %1257 = vset.pattern.permute.xlu1 %v1647_v49 }
 0x135   :  { %v1336_v7 = vpop.eup %1335  ;;  %v503_v51 = vadd.f32 %v1334_v37, %v467_v13  ;;  %v580_v53 = vmul.f32 %v567_v25, %v1807_v44  ;;  %v599_v54 = vmul.f32 %v588_v36, %v588_v36  ;;  %1089 = vperm.xlu1 %1257, %v1483_v56  }
 0x136   :  { %v1338_v57 = vpop.eup %1337  ;;  %v507_v58 = vadd.f32 %v1336_v7, %v471_v18  ;;  %v569_v30 = vmul.f32 1.442695, %v568_v46  ;;  %v573_v59 = vmul.f32 1.442695, %v572_v47  ;;  %v577_v60 = vmul.f32 1.442695, %v576_v50  ;;  %v596_v27 = vpop.permute.xlu1 %595 }
 0x137   :  { %v511_v61 = vadd.f32 %v1338_v57, %v475_v22  ;;  %v581_v32 = vmul.f32 1.442695, %v580_v53  ;;  %v598_v49 = vadd.f32 %v1813_v48, %v596_v27  ;;  %v601_v63 = vadd.f32 %v600_v55, %v599_v54 }
 0x138   :  { %1347 = vpow2.f32 %v569_v30  ;;  %v672_v55 = vmul.f32 %v665_v8, %v665_v8 }
 0x139   :  { %1349 = vpow2.f32 %v573_v59  ;;  %v602_v39 = vmul.f32 %v598_v49, %v598_v49  ;;  %1099 = vperm.xlu1 %1257, %v1484_v1   ;;  %v699_v49 = vpop.permute.xlu0 %698 }
 0x13a   :  { %1351 = vpow2.f32 %v577_v60 }
 0x13b   :  { %1353 = vpow2.f32 %v581_v32  ;;  %v603_v3 = vadd.f32 %v602_v39, %v601_v63  ;;  %v622_v29 = vpop.permute.xlu1 %621  ;;  %v701_v39 = vadd.f32 %v1805_v43, %v699_v49 }
 0x13c   :  { %v1340_v4 = vpop.eup %1339  ;;  %v624_v0 = vadd.f32 %v1801_v41, %v622_v29 }
 0x13d   :  { %v1342_v5 = vpop.eup %1341  ;;  %v535_v6 = vadd.f32 %v1340_v4, %v499_v45  ;;  %v604_v9 = vmul.f32 %v603_v3, %v1795_v38  ;;  %v608_v10 = vmul.f32 %v603_v3, %v1798_v40  ;;  %v612_v11 = vmul.f32 %v603_v3, %v1817_v52 }
 0x13e   :  { %v1344_v12 = vpop.eup %1343  ;;  %v539_v13 = vadd.f32 %v1342_v5, %v503_v51  ;;  %v616_v14 = vmul.f32 %v603_v3, %v1807_v44  ;;  %v635_v15 = vmul.f32 %v624_v0, %v624_v0  ;;  %v708_v43 = vmul.f32 %v701_v39, %v701_v39 }
 0x13f   :  { %v1346_v17 = vpop.eup %1345  ;;  %v543_v18 = vadd.f32 %v1344_v12, %v507_v58  ;;  %v605_v19 = vmul.f32 1.442695, %v604_v9  ;;  %v609_v20 = vmul.f32 1.442695, %v608_v10  ;;  %v613_v31 = vmul.f32 1.442695, %v612_v11  ;;  %v632_v21 = vpop.permute.xlu1 %631 }
 0x140   :  { %v547_v22 = vadd.f32 %v1346_v17, %v511_v61  ;;  %v617_v23 = vmul.f32 1.442695, %v616_v14  ;;  %v634_v35 = vadd.f32 %v1813_v48, %v632_v21  ;;  %v637_v42 = vadd.f32 %v636_v16, %v635_v15 }
 0x141   :  { %1355 = vpow2.f32 %v605_v19 }
 0x142   :  { %1357 = vpow2.f32 %v609_v20  ;;  %v638_v24 = vmul.f32 %v634_v35, %v634_v35 }
 0x143   :  { %1359 = vpow2.f32 %v613_v31 }
 0x144   :  { %1361 = vpow2.f32 %v617_v23  ;;  %v639_v25 = vadd.f32 %v638_v24, %v637_v42  ;;  %v658_v26 = vpop.permute.xlu1 %657 }
 0x145   :  { %v1348_v34 = vpop.eup %1347  ;;  %v660_v36 = vadd.f32 %v1801_v41, %v658_v26 }
 0x146   :  { %v1350_v37 = vpop.eup %1349  ;;  %v571_v45 = vadd.f32 %v1348_v34, %v535_v6  ;;  %v640_v46 = vmul.f32 %v639_v25, %v1795_v38  ;;  %v644_v47 = vmul.f32 %v639_v25, %v1798_v40  ;;  %v648_v50 = vmul.f32 %v639_v25, %v1817_v52 }
 0x147   :  { %v1352_v7 = vpop.eup %1351  ;;  %v575_v51 = vadd.f32 %v1350_v37, %v539_v13  ;;  %v652_v53 = vmul.f32 %v639_v25, %v1807_v44  ;;  %v671_v54 = vmul.f32 %v660_v36, %v660_v36 }
 0x148   :  { %v1354_v56 = vpop.eup %1353  ;;  %v579_v57 = vadd.f32 %v1352_v7, %v543_v18  ;;  %v641_v58 = vmul.f32 1.442695, %v640_v46  ;;  %v645_v30 = vmul.f32 1.442695, %v644_v47  ;;  %v649_v59 = vmul.f32 1.442695, %v648_v50  ;;  %v668_v60 = vpop.permute.xlu1 %667 }
 0x149   :  { %v583_v27 = vadd.f32 %v1354_v56, %v547_v22  ;;  %v653_v61 = vmul.f32 1.442695, %v652_v53  ;;  %v670_v32 = vadd.f32 %v1813_v48, %v668_v60  ;;  %v673_v62 = vadd.f32 %v672_v55, %v671_v54 }
 0x14a   :  { %1363 = vpow2.f32 %v641_v58 }
 0x14b   :  { %1365 = vpow2.f32 %v645_v30  ;;  %v674_v63 = vmul.f32 %v670_v32, %v670_v32 }
 0x14c   :  { %1367 = vpow2.f32 %v649_v59 }
 0x14d   :  { %1369 = vpow2.f32 %v653_v61  ;;  %v675_v1 = vadd.f32 %v674_v63, %v673_v62  ;;  %v694_v2 = vpop.permute.xlu1 %693 }
 0x14e   :  { %v1356_v3 = vpop.eup %1355  ;;  %v696_v29 = vadd.f32 %v1801_v41, %v694_v2 }
 0x14f   :  { %v1358_v4 = vpop.eup %1357  ;;  %v607_v0 = vadd.f32 %v1356_v3, %v571_v45  ;;  %v676_v5 = vmul.f32 %v675_v1, %v1795_v38  ;;  %v680_v6 = vmul.f32 %v675_v1, %v1798_v40  ;;  %v684_v9 = vmul.f32 %v675_v1, %v1817_v52 }
 0x150   :  { %v1360_v10 = vpop.eup %1359  ;;  %v611_v11 = vadd.f32 %v1358_v4, %v575_v51  ;;  %v688_v12 = vmul.f32 %v675_v1, %v1807_v44  ;;  %v707_v13 = vmul.f32 %v696_v29, %v696_v29 }
 0x151   :  { %v1362_v14 = vpop.eup %1361  ;;  %v615_v15 = vadd.f32 %v1360_v10, %v579_v57  ;;  %v677_v16 = vmul.f32 1.442695, %v676_v5  ;;  %v681_v17 = vmul.f32 1.442695, %v680_v6  ;;  %v685_v18 = vmul.f32 1.442695, %v684_v9  ;;  %v704_v41 = vpop.permute.xlu1 %703 }
 0x152   :  { %v619_v19 = vadd.f32 %v1362_v14, %v583_v27  ;;  %v689_v20 = vmul.f32 1.442695, %v688_v12  ;;  %v706_v31 = vadd.f32 %v1813_v48, %v704_v41  ;;  %v709_v21 = vadd.f32 %v708_v43, %v707_v13  ;;  %v1974_v12 = vld [vmem:[#allocation5] ss:$0 sm:$0xff]  ;;  %v1977_v43 = vld [vmem:[#allocation7] ss:$0 sm:$0xff] }
 0x153   :  { %1371 = vpow2.f32 %v677_v16  ;;  %v1980_v16 = vld [vmem:[#allocation8] ss:$0 sm:$0xff] }
 0x154   :  { %1373 = vpow2.f32 %v681_v17  ;;  %v710_v22 = vmul.f32 %v706_v31, %v706_v31 }
 0x155   :  { %1375 = vpow2.f32 %v685_v18 }
 0x156   :  { %1377 = vpow2.f32 %v689_v20  ;;  %v711_v23 = vadd.f32 %v710_v22, %v709_v21  ;;  %v730_v35 = vpop.permute.xlu1 %729 }
 0x157   :  { %v1364_v28 = vpop.eup %1363  ;;  %v732_v13 = vadd.f32 %v1974_v12, %v730_v35 }
 0x158   :  { %v1366_v42 = vpop.eup %1365  ;;  %v643_v24 = vadd.f32 %v1364_v28, %v607_v0  ;;  %v712_v8 = vmul.f32 %v711_v23, %v1795_v38  ;;  %v716_v25 = vmul.f32 %v711_v23, %v1798_v40  ;;  %v720_v26 = vmul.f32 %v711_v23, %v1817_v52  ;;  %v735_v0 = vpop.permute.xlu0 %734 }
 0x159   :  { %v1368_v34 = vpop.eup %1367  ;;  %v647_v36 = vadd.f32 %v1366_v42, %v611_v11  ;;  %v724_v48 = vmul.f32 %v711_v23, %v1807_v44  ;;  %v737_v14 = vadd.f32 %v1977_v43, %v735_v0  ;;  %v743_v41 = vmul.f32 %v732_v13, %v732_v13 }
 0x15a   :  { %v1370_v37 = vpop.eup %1369  ;;  %v651_v45 = vadd.f32 %v1368_v34, %v615_v15  ;;  %v713_v46 = vmul.f32 1.442695, %v712_v8  ;;  %v717_v47 = vmul.f32 1.442695, %v716_v25  ;;  %v721_v50 = vmul.f32 1.442695, %v720_v26  ;;  %v740_v7 = vpop.permute.xlu1 %739 }
 0x15b   :  { %v655_v51 = vadd.f32 %v1370_v37, %v619_v19  ;;  %v725_v53 = vmul.f32 1.442695, %v724_v48  ;;  %v742_v17 = vadd.f32 %v1980_v16, %v740_v7  ;;  %v744_v19 = vmul.f32 %v737_v14, %v737_v14 }
 0x15c   :  { %1379 = vpow2.f32 %v713_v46  ;;  %v771_v6 = vpop.permute.xlu0 %770 }
 0x15d   :  { %1381 = vpow2.f32 %v717_v47  ;;  %v773_v31 = vadd.f32 %v1977_v43, %v771_v6  ;;  %v746_v22 = vmul.f32 %v742_v17, %v742_v17  ;;  %v745_v28 = vadd.f32 %v744_v19, %v743_v41 }
 0x15e   :  { %1383 = vpow2.f32 %v721_v50 }
 0x15f   :  { %1385 = vpow2.f32 %v725_v53  ;;  %v766_v54 = vpop.permute.xlu1 %765  ;;  %v780_v8 = vmul.f32 %v773_v31, %v773_v31  ;;  %v747_v34 = vadd.f32 %v746_v22, %v745_v28 }
 0x160   :  { %v1372_v55 = vpop.eup %1371  ;;  %v807_v10 = vpop.permute.xlu0 %806  ;;  %v768_v20 = vadd.f32 %v1974_v12, %v766_v54 }
 0x161   :  { %v1374_v56 = vpop.eup %1373  ;;  %v679_v57 = vadd.f32 %v1372_v55, %v643_v24  ;;  %v809_v42 = vadd.f32 %v1977_v43, %v807_v10  ;;  %v748_v53 = vmul.f32 %v747_v34, %v1795_v38 }
 0x162   :  { %v1376_v58 = vpop.eup %1375  ;;  %v683_v30 = vadd.f32 %v1374_v56, %v647_v36  ;;  %v779_v24 = vmul.f32 %v768_v20, %v768_v20 }
 0x163   :  { %v1378_v59 = vpop.eup %1377  ;;  %v687_v60 = vadd.f32 %v1376_v58, %v651_v45  ;;  %v776_v27 = vpop.permute.xlu1 %775  ;;  %v816_v45 = vmul.f32 %v809_v42, %v809_v42  ;;  %v752_v58 = vmul.f32 %v747_v34, %v1798_v40 }
 0x164   :  { %v691_v61 = vadd.f32 %v1378_v59, %v655_v51  ;;  %v843_v15 = vpop.permute.xlu0 %842  ;;  %v778_v23 = vadd.f32 %v1980_v16, %v776_v27  ;;  %v781_v46 = vadd.f32 %v780_v8, %v779_v24  ;;  %v756_v27 = vmul.f32 %v747_v34, %v1817_v52 }
 0x165   :  { %v845_v7 = vadd.f32 %v1977_v43, %v843_v15  ;;  %v753_v10 = vmul.f32 1.442695, %v752_v58 }
 0x166   :  { %v782_v36 = vmul.f32 %v778_v23, %v778_v23  ;;  %v757_v41 = vmul.f32 1.442695, %v756_v27 }
 0x168   :  { %v802_v32 = vpop.permute.xlu1 %801  ;;  %v879_v21 = vpop.permute.xlu0 %878  ;;  %v783_v55 = vadd.f32 %v782_v36, %v781_v46 }
 0x169   :  { %v1380_v49 = vpop.eup %1379  ;;  %v804_v25 = vadd.f32 %v1974_v12, %v802_v32  ;;  %v881_v54 = vadd.f32 %v1977_v43, %v879_v21 }
 0x16a   :  { %v1382_v62 = vpop.eup %1381  ;;  %v1966_v63 = vadd.f32 %v1380_v49, %v679_v57  ;;  %v852_v49 = vmul.f32 %v845_v7, %v845_v7  ;;  %v788_v13 = vmul.f32 %v783_v55, %v1798_v40  ;;  %v792_v19 = vmul.f32 %v783_v55, %v1817_v52 }
 0x16b   :  { %v1384_v39 = vpop.eup %1383  ;;  %v1968_v1 = vadd.f32 %v1382_v62, %v683_v30  ;;  %v815_v47 = vmul.f32 %v804_v25, %v804_v25  ;;  %v749_v62 = vmul.f32 1.442695, %v748_v53  ;;  %v796_v22 = vmul.f32 %v783_v55, %v1807_v44 }
 0x16c   :  { %v1386_v2 = vpop.eup %1385  ;;  %v1970_v3 = vadd.f32 %v1384_v39, %v687_v60  ;;  %v812_v29 = vpop.permute.xlu1 %811  ;;  %v760_v39 = vmul.f32 %v747_v34, %v1807_v44  ;;  %v789_v8 = vmul.f32 1.442695, %v788_v13  ;;  %v793_v34 = vmul.f32 1.442695, %v792_v19 }
 0x16d   :  { %v1972_v4 = vadd.f32 %v1386_v2, %v691_v61  ;;  %v915_v26 = vpop.permute.xlu0 %914  ;;  %v814_v48 = vadd.f32 %v1980_v16, %v812_v29  ;;  %v817_v61 = vadd.f32 %v816_v45, %v815_v47  ;;  %v888_v2 = vmul.f32 %v881_v54, %v881_v54 }
 0x16e   :  { %v917_v30 = vadd.f32 %v1977_v43, %v915_v26  ;;  %v784_v29 = vmul.f32 %v783_v55, %v1795_v38  ;;  %1387 = vpow2.f32 %v749_v62  ;;  %v761_v21 = vmul.f32 1.442695, %v760_v39 }
 0x16f   :  { %v818_v56 = vmul.f32 %v814_v48, %v814_v48  ;;  %1389 = vpow2.f32 %v753_v10  ;;  %v797_v45 = vmul.f32 1.442695, %v796_v22 }
 0x170   :  { %v924_v14 = vmul.f32 %v917_v30, %v917_v30  ;;  %v785_v23 = vmul.f32 1.442695, %v784_v29  ;;  %1391 = vpow2.f32 %v757_v41 }
 0x171   :  { %v838_v5 = vpop.permute.xlu1 %837  ;;  %v951_v51 = vpop.permute.xlu0 %950  ;;  %v819_v0 = vadd.f32 %v818_v56, %v817_v61  ;;  %1393 = vpow2.f32 %v761_v21 }
 0x172   :  { %v840_v50 = vadd.f32 %v1974_v12, %v838_v5  ;;  %v953_v60 = vadd.f32 %v1977_v43, %v951_v51  ;;  %1395 = vpow2.f32 %v785_v23 }
 0x173   :  { %v820_v28 = vmul.f32 %v819_v0, %v1795_v38  ;;  %v824_v25 = vmul.f32 %v819_v0, %v1798_v40  ;;  %v832_v46 = vmul.f32 %v819_v0, %v1807_v44  ;;  %1397 = vpow2.f32 %v789_v8 }
 0x174   :  { %v851_v32 = vmul.f32 %v840_v50, %v840_v50  ;;  %v2002_v15 = vmul.f32 %v953_v60, %v953_v60  ;;  %1399 = vpow2.f32 %v793_v34 }
 0x175   :  { %v848_v9 = vpop.permute.xlu1 %847  ;;  %v821_v50 = vmul.f32 1.442695, %v820_v28  ;;  %v825_v53 = vmul.f32 1.442695, %v824_v25  ;;  %1401 = vpow2.f32 %v797_v45  ;;  %v833_v60 = vmul.f32 1.442695, %v832_v46 }
 0x176   :  { %v850_v57 = vadd.f32 %v1980_v16, %v848_v9  ;;  %v987_v9 = vpop.permute.xlu0 %986  ;;  %v853_v20 = vadd.f32 %v852_v49, %v851_v32 }
 0x177   :  { %1403 = vpow2.f32 %v821_v50 }
 0x178   :  { %v854_v5 = vmul.f32 %v850_v57, %v850_v57  ;;  %1405 = vpow2.f32 %v825_v53 }
 0x17a   :  { %v874_v11 = vpop.permute.xlu1 %873  ;;  %v855_v42 = vadd.f32 %v854_v5, %v853_v20  ;;  %v1023_v55 = vpop.permute.xlu0 %1022 }
 0x17b   :  { %v876_v6 = vadd.f32 %v1974_v12, %v874_v11  ;;  %v989_v11 = vadd.f32 %v1977_v43, %v987_v9  ;;  %v1025_v49 = vadd.f32 %v1977_v43, %v1023_v55  ;;  %v2024_v13 = vpop.eup %1387 }
 0x17c   :  { %v856_v7 = vmul.f32 %v855_v42, %v1795_v38  ;;  %v868_v39 = vmul.f32 %v855_v42, %v1807_v44  ;;  %v2029_v21 = vpop.eup %1389 }
 0x17d   :  { %v887_v24 = vmul.f32 %v876_v6, %v876_v6  ;;  %v996_v41 = vmul.f32 %v989_v11, %v989_v11  ;;  %v1032_v25 = vmul.f32 %v1025_v49, %v1025_v49 }
 0x17e   :  { %v884_v18 = vpop.permute.xlu1 %883  ;;  %v857_v61 = vmul.f32 1.442695, %v856_v7 }
 0x17f   :  { %v886_v31 = vadd.f32 %v1980_v16, %v884_v18  ;;  %v828_v18 = vmul.f32 %v819_v0, %v1817_v52  ;;  %v889_v51 = vadd.f32 %v888_v2, %v887_v24  ;;  %v2033_v24 = vpop.eup %1391 }
 0x180   :  { %v2036_v34 = vpop.eup %1393 }
 0x181   :  { %v890_v36 = vmul.f32 %v886_v31, %v886_v31  ;;  %v829_v56 = vmul.f32 1.442695, %v828_v18  ;;  %v2040_v46 = vpop.eup %1395 }
 0x183   :  { %v910_v35 = vpop.permute.xlu1 %909  ;;  %v891_v57 = vadd.f32 %v890_v36, %v889_v51  ;;  %1407 = vpow2.f32 %v829_v56  ;;  %v2043_v51 = vpop.eup %1397 }
 0x184   :  { %v912_v26 = vadd.f32 %v1974_v12, %v910_v35  ;;  %v860_v35 = vmul.f32 %v855_v42, %v1798_v40  ;;  %1409 = vpow2.f32 %v833_v60  ;;  %v2046_v55 = vpop.eup %1399 }
 0x185   :  { %v896_v6 = vmul.f32 %v891_v57, %v1798_v40  ;;  %1411 = vpow2.f32 %v857_v61  ;;  %v900_v20 = vmul.f32 %v891_v57, %v1817_v52  ;;  %v904_v31 = vmul.f32 %v891_v57, %v1807_v44 }
 0x186   :  { %v923_v54 = vmul.f32 %v912_v26, %v912_v26  ;;  %v861_v62 = vmul.f32 1.442695, %v860_v35 }
 0x187   :  { %v920_v37 = vpop.permute.xlu1 %919  ;;  %v897_v11 = vmul.f32 1.442695, %v896_v6  ;;  %v905_v50 = vmul.f32 1.442695, %v904_v31 }
 0x188   :  { %v922_v47 = vadd.f32 %v1980_v16, %v920_v37  ;;  %v864_v37 = vmul.f32 %v855_v42, %v1817_v52  ;;  %v925_v2 = vadd.f32 %v924_v14, %v923_v54  ;;  %1413 = vpow2.f32 %v861_v62 }
 0x189   :  { %v869_v14 = vmul.f32 1.442695, %v868_v39 }
 0x18a   :  { %v926_v27 = vmul.f32 %v922_v47, %v922_v47  ;;  %v865_v5 = vmul.f32 1.442695, %v864_v37  ;;  %v901_v47 = vmul.f32 1.442695, %v900_v20 }
 0x18c   :  { %v946_v59 = vpop.permute.xlu1 %945  ;;  %v927_v9 = vadd.f32 %v926_v27, %v925_v2  ;;  %1415 = vpow2.f32 %v865_v5 }
 0x18d   :  { %v948_v58 = vadd.f32 %v1974_v12, %v946_v59  ;;  %v892_v59 = vmul.f32 %v891_v57, %v1795_v38  ;;  %1417 = vpow2.f32 %v869_v14 }
 0x18e   :  { %v928_v8 = vmul.f32 %v927_v9, %v1795_v38  ;;  %v932_v18 = vmul.f32 %v927_v9, %v1798_v40  ;;  %v936_v7 = vmul.f32 %v927_v9, %v1817_v52  ;;  %v940_v53 = vmul.f32 %v927_v9, %v1807_v44 }
 0x18f   :  { %v959_v29 = vmul.f32 %v948_v58, %v948_v58  ;;  %v893_v22 = vmul.f32 1.442695, %v892_v59  ;;  %v2049_v58 = vpop.eup %1401 }
 0x190   :  { %v956_v17 = vpop.permute.xlu1 %955  ;;  %v929_v56 = vmul.f32 1.442695, %v928_v8  ;;  %v937_v49 = vmul.f32 1.442695, %v936_v7  ;;  %v941_v59 = vmul.f32 1.442695, %v940_v53 }
 0x191   :  { %v958_v32 = vadd.f32 %v1980_v16, %v956_v17  ;;  %v961_v23 = vadd.f32 %v2002_v15, %v959_v29  ;;  %v1059_v15 = vpop.permute.xlu0 %1058  ;;  %1419 = vpow2.f32 %v893_v22 }
 0x192   :  { %1421 = vpow2.f32 %v897_v11  ;;  %v1061_v57 = vadd.f32 %v1977_v43, %v1059_v15 }
 0x193   :  { %v962_v17 = vmul.f32 %v958_v32, %v958_v32  ;;  %v2052_v32 = vpop.eup %1403  ;;  %1423 = vpow2.f32 %v901_v47 }
 0x194   :  { %v2056_v2 = vpop.eup %1405  ;;  %1425 = vpow2.f32 %v905_v50 }
 0x195   :  { %v982_v48 = vpop.permute.xlu1 %981  ;;  %v963_v36 = vadd.f32 %v962_v17, %v961_v23  ;;  %v2059_v5 = vpop.eup %1407  ;;  %1427 = vpow2.f32 %v929_v56 }
 0x196   :  { %v984_v0 = vadd.f32 %v1974_v12, %v982_v48  ;;  %v1095_v17 = vpop.permute.xlu0 %1094 }
 0x197   :  { %v964_v60 = vmul.f32 %v963_v36, %v1795_v38  ;;  %v968_v62 = vmul.f32 %v963_v36, %v1798_v40  ;;  %v972_v29 = vmul.f32 %v963_v36, %v1817_v52  ;;  %v976_v6 = vmul.f32 %v963_v36, %v1807_v44 }
 0x198   :  { %v995_v28 = vmul.f32 %v984_v0, %v984_v0 }
 0x199   :  { %v992_v30 = vpop.permute.xlu1 %991  ;;  %v969_v23 = vmul.f32 1.442695, %v968_v62  ;;  %v973_v8 = vmul.f32 1.442695, %v972_v29 }
 0x19a   :  { %v994_v19 = vadd.f32 %v1980_v16, %v992_v30  ;;  %v997_v35 = vadd.f32 %v996_v41, %v995_v28  ;;  %v933_v30 = vmul.f32 1.442695, %v932_v18  ;;  %v2062_v41 = vpop.eup %1409  ;;  %v977_v18 = vmul.f32 1.442695, %v976_v6 }
 0x19b   :  { %v2065_v22 = vpop.eup %1411 }
 0x19c   :  { %v998_v48 = vmul.f32 %v994_v19, %v994_v19  ;;  %1429 = vpow2.f32 %v933_v30  ;;  %v965_v19 = vmul.f32 1.442695, %v964_v60  ;;  %v2069_v11 = vpop.eup %1413 }
 0x19d   :  { %1431 = vpow2.f32 %v937_v49  ;;  %v2074_v15 = vpop.eup %1415 }
 0x19e   :  { %v1018_v10 = vpop.permute.xlu1 %1017  ;;  %v999_v37 = vadd.f32 %v998_v48, %v997_v35  ;;  %1433 = vpow2.f32 %v941_v59  ;;  %v2078_v56 = vpop.eup %1417 }
 0x19f   :  { %v1020_v42 = vadd.f32 %v1974_v12, %v1018_v10  ;;  %v1068_v10 = vmul.f32 %v1061_v57, %v1061_v57  ;;  %1435 = vpow2.f32 %v965_v19  ;;  %v2082_v60 = vpop.eup %1419 }
 0x1a0   :  { %v1000_v14 = vmul.f32 %v999_v37, %v1795_v38  ;;  %v1004_v28 = vmul.f32 %v999_v37, %v1798_v40  ;;  %v1012_v36 = vmul.f32 %v999_v37, %v1807_v44  ;;  %1437 = vpow2.f32 %v969_v23  ;;  %v2085_v49 = vpop.eup %1421 }
 0x1a1   :  { %v1031_v54 = vmul.f32 %v1020_v42, %v1020_v42  ;;  %1439 = vpow2.f32 %v973_v8 }
 0x1a2   :  { %v1028_v26 = vpop.permute.xlu1 %1027  ;;  %v1001_v47 = vmul.f32 1.442695, %v1000_v14  ;;  %v1005_v7 = vmul.f32 1.442695, %v1004_v28  ;;  %1441 = vpow2.f32 %v977_v18  ;;  %v751_v14 = vadd.f32 %v2024_v13, %v1966_v63 }
 0x1a3   :  { %v1030_v45 = vadd.f32 %v1980_v16, %v1028_v26  ;;  %v1033_v0 = vadd.f32 %v1032_v25, %v1031_v54  ;;  %v1008_v25 = vmul.f32 %v999_v37, %v1817_v52  ;;  %v1097_v26 = vadd.f32 %v1977_v43, %v1095_v17 }
 0x1a4   :  { %v1013_v37 = vmul.f32 1.442695, %v1012_v36  ;;  %1443 = vpow2.f32 %v1001_v47  ;;  %v763_v63 = vadd.f32 %v2036_v34, %v1972_v4  ;;  %v787_v47 = vadd.f32 %v2040_v46, %v751_v14 }
 0x1a5   :  { %v1034_v27 = vmul.f32 %v1030_v45, %v1030_v45  ;;  %v1009_v43 = vmul.f32 1.442695, %v1008_v25  ;;  %1445 = vpow2.f32 %v1005_v7 }
 0x1a6   :  { %v823_v34 = vadd.f32 %v2052_v32, %v787_v47 }
 0x1a7   :  { %v1054_v61 = vpop.permute.xlu1 %1053  ;;  %v1035_v20 = vadd.f32 %v1034_v27, %v1033_v0  ;;  %1447 = vpow2.f32 %v1009_v43 }
 0x1a8   :  { %v1056_v39 = vadd.f32 %v1974_v12, %v1054_v61  ;;  %v1104_v61 = vmul.f32 %v1097_v26, %v1097_v26  ;;  %1449 = vpow2.f32 %v1013_v37  ;;  %v755_v26 = vadd.f32 %v2029_v21, %v1968_v1 }
 0x1a9   :  { %v1036_v50 = vmul.f32 %v1035_v20, %v1795_v38  ;;  %v1040_v53 = vmul.f32 %v1035_v20, %v1798_v40  ;;  %v1044_v57 = vmul.f32 %v1035_v20, %v1817_v52  ;;  %v1048_v27 = vmul.f32 %v1035_v20, %v1807_v44 }
 0x1aa   :  { %v1067_v9 = vmul.f32 %v1056_v39, %v1056_v39  ;;  %v859_v32 = vadd.f32 %v2065_v22, %v823_v34 }
 0x1ab   :  { %v1064_v31 = vpop.permute.xlu1 %1063  ;;  %v1037_v62 = vmul.f32 1.442695, %v1036_v50  ;;  %v1041_v29 = vmul.f32 1.442695, %v1040_v53  ;;  %v1049_v20 = vmul.f32 1.442695, %v1048_v27  ;;  %v791_v50 = vadd.f32 %v2043_v51, %v755_v26 }
 0x1ac   :  { %v1066_v42 = vadd.f32 %v1980_v16, %v1064_v31  ;;  %v1069_v48 = vadd.f32 %v1068_v10, %v1067_v9  ;;  %v1045_v9 = vmul.f32 1.442695, %v1044_v57 }
 0x1ad   :  { %1451 = vpow2.f32 %v1037_v62 }
 0x1ae   :  { %v1070_v45 = vmul.f32 %v1066_v42, %v1066_v42  ;;  %1453 = vpow2.f32 %v1041_v29 }
 0x1b0   :  { %v1071_v35 = vadd.f32 %v1070_v45, %v1069_v48  ;;  %v1090_v54 = vpop.permute.xlu1 %1089 }
 0x1b1   :  { %v1092_v30 = vadd.f32 %v1974_v12, %v1090_v54  ;;  %v2089_v12 = vpop.eup %1423  ;;  %1455 = vpow2.f32 %v1045_v9 }
 0x1b2   :  { %v1072_v39 = vmul.f32 %v1071_v35, %v1795_v38  ;;  %v1076_v0 = vmul.f32 %v1071_v35, %v1798_v40  ;;  %v1080_v10 = vmul.f32 %v1071_v35, %v1817_v52  ;;  %v2093_v19 = vpop.eup %1425  ;;  %v1084_v31 = vmul.f32 %v1071_v35, %v1807_v44 }
 0x1b3   :  { %v1103_v59 = vmul.f32 %v1092_v30, %v1092_v30  ;;  %v1428_v23 = vpop.eup %1427  ;;  %1457 = vpow2.f32 %v1049_v20 }
 0x1b4   :  { %v1100_v6 = vpop.permute.xlu1 %1099  ;;  %v1073_v28 = vmul.f32 1.442695, %v1072_v39  ;;  %v1430_v25 = vpop.eup %1429  ;;  %v1077_v18 = vmul.f32 1.442695, %v1076_v0  ;;  %v1081_v13 = vmul.f32 1.442695, %v1080_v10 }
 0x1b5   :  { %v1102_v17 = vadd.f32 %v1980_v16, %v1100_v6  ;;  %v1105_v42 = vadd.f32 %v1104_v61, %v1103_v59  ;;  %v759_v16 = vadd.f32 %v2033_v24, %v1970_v3  ;;  %v1432_v36 = vpop.eup %1431  ;;  %v1085_v7 = vmul.f32 1.442695, %v1084_v31 }
 0x1b6   :  { %v1434_v45 = vpop.eup %1433  ;;  %1459 = vpow2.f32 %v1073_v28 }
 0x1b7   :  { %v1106_v8 = vmul.f32 %v1102_v17, %v1102_v17  ;;  %v1436_v24 = vpop.eup %1435  ;;  %v795_v4 = vadd.f32 %v2046_v55, %v759_v16  ;;  %1461 = vpow2.f32 %v1077_v18 }
 0x1b8   :  { %v1438_v46 = vpop.eup %1437  ;;  %1463 = vpow2.f32 %v1081_v13 }
 0x1b9   :  { %v1107_v48 = vadd.f32 %v1106_v8, %v1105_v42  ;;  %v1440_v43 = vpop.eup %1439  ;;  %1465 = vpow2.f32 %v1085_v7  ;;  %v831_v55 = vadd.f32 %v2059_v5, %v795_v4 }
 0x1ba   :  { %v1442_v57 = vpop.eup %1441 }
 0x1bb   :  { %v1108_v1 = vmul.f32 %v1107_v48, %v1795_v38  ;;  %v1112_v3 = vmul.f32 %v1107_v48, %v1798_v40  ;;  %v1116_v21 = vmul.f32 %v1107_v48, %v1817_v52  ;;  %v1120_v53 = vmul.f32 %v1107_v48, %v1807_v44  ;;  %v1444_v30 = vpop.eup %1443 }
 0x1bc   :  { %v799_v38 = vadd.f32 %v2049_v58, %v763_v63  ;;  %v827_v40 = vadd.f32 %v2056_v2, %v791_v50  ;;  %v1446_v27 = vpop.eup %1445  ;;  %v867_v61 = vadd.f32 %v2074_v15, %v831_v55  ;;  %v895_v58 = vadd.f32 %v2082_v60, %v859_v32 }
 0x1bd   :  { %v1109_v51 = vmul.f32 1.442695, %v1108_v1  ;;  %v1113_v35 = vmul.f32 1.442695, %v1112_v3  ;;  %v1117_v54 = vmul.f32 1.442695, %v1116_v21  ;;  %v1448_v2 = vpop.eup %1447 }
 0x1be   :  { %v1121_v52 = vmul.f32 1.442695, %v1120_v53  ;;  %v835_v44 = vadd.f32 %v2062_v41, %v799_v38  ;;  %v863_v37 = vadd.f32 %v2069_v11, %v827_v40  ;;  %v1450_v22 = vpop.eup %1449  ;;  %v903_v39 = vadd.f32 %v2089_v12, %v867_v61 }
 0x1bf   :  { %1467 = vpow2.f32 %v1109_v51  ;;  %v931_v59 = vadd.f32 %v1428_v23, %v895_v58  ;;  %v1452_v41 = vpop.eup %1451  ;;  %v1648_v51 = vmov -1e+30  }
 0x1c0   :  { %1469 = vpow2.f32 %v1113_v35  ;;  %v871_v62 = vadd.f32 %v2078_v56, %v835_v44  ;;  %v899_v5 = vadd.f32 %v2085_v49, %v863_v37  ;;  %v1454_v0 = vpop.eup %1453  ;;  %v939_v6 = vadd.f32 %v1432_v36, %v903_v39 }
 0x1c1   :  { %1471 = vpow2.f32 %v1117_v54  ;;  %v967_v15 = vadd.f32 %v1436_v24, %v931_v59  ;;  %v1456_v9 = vpop.eup %1455  ;;  %v1163_v24 = vld [vmem:[%s2139_s8] ss:$0 sm:$0xff]  ;;  %s1588_s8 = scalar_lea.vmem %s1150_s20, 512 }
 0x1c2   :  { %1473 = vpow2.f32 %v1121_v52  ;;  %v907_v11 = vadd.f32 %v2093_v19, %v871_v62  ;;  %v935_v29 = vadd.f32 %v1430_v25, %v899_v5  ;;  %v1458_v17 = vpop.eup %1457  ;;  %v975_v14 = vadd.f32 %v1440_v43, %v939_v6  ;;  %p1589_p11 = scmp.ne.s32.totalorder %s1150_s20, %s1588_s8  ;;  %p1594_p13 = scmp.lt.s32.totalorder %s1588_s8, %s1588_s8 }
 0x1c3   :  { %v1003_v56 = vadd.f32 %v1444_v30, %v967_v15  ;;  %v1460_v20 = vpop.eup %1459  ;;  %vm107_vm0 = vcmp.eq.s32.totalorder %v1789_v33, %v1163_v24 }
 0x1c4   :  { %v943_v60 = vadd.f32 %v1434_v45, %v907_v11  ;;  %v971_v10 = vadd.f32 %v1438_v46, %v935_v29  ;;  %v1462_v28 = vpop.eup %1461  ;;  %v1011_v42 = vadd.f32 %v1448_v2, %v975_v14  ;;  %v108_v35 = vsel %vm107_vm0, 0.0, %v1648_v51  ;;  %p1595_p0 = por %p1594_p13, %p1593_p12 }
 0x1c5   :  { %v1039_v12 = vadd.f32 %v1452_v41, %v1003_v56  ;;  %v1464_v23 = vpop.eup %1463 }
 0x1c6   :  { %v979_v49 = vadd.f32 %v1442_v57, %v943_v60  ;;  %v1007_v31 = vadd.f32 %v1446_v27, %v971_v10  ;;  %v1466_v19 = vpop.eup %1465  ;;  %v1047_v25 = vadd.f32 %v1456_v9, %v1011_v42  ;;  %p1596_p1 = pnand %p1595_p0, %p1589_p11 }
 0x1c7   :  { %v1075_v16 = vadd.f32 %v1460_v20, %v1039_v12 }
 0x1c8   :  { %v1015_v8 = vadd.f32 %v1450_v22, %v979_v49  ;;  %v1043_v26 = vadd.f32 %v1454_v0, %v1007_v31  ;;  %v1083_v48 = vadd.f32 %v1464_v23, %v1047_v25 }
 0x1ca   :  { %v1051_v36 = vadd.f32 %v1458_v17, %v1015_v8  ;;  %v1079_v63 = vadd.f32 %v1462_v28, %v1043_v26 }
 0x1cc   :  { %v1468_v18 = vpop.eup %1467  ;;  %v1087_v50 = vadd.f32 %v1466_v19, %v1051_v36 }
 0x1cd   :  { %v1470_v13 = vpop.eup %1469  ;;  %v1111_v45 = vadd.f32 %v1468_v18, %v1075_v16 }
 0x1ce   :  { %v1472_v47 = vpop.eup %1471  ;;  %v1115_v7 = vadd.f32 %v1470_v13, %v1079_v63 }
 0x1cf   :  { %v1474_v1 = vpop.eup %1473  ;;  %v1119_v3 = vadd.f32 %v1472_v47, %v1083_v48  ;;  %1475 = vlog2.f32 %v1111_v45 }
 0x1d0   :  { %v1123_v21 = vadd.f32 %v1474_v1, %v1087_v50  ;;  %1477 = vlog2.f32 %v1115_v7 }
 0x1d1   :  { %1479 = vlog2.f32 %v1119_v3 }
 0x1d2   :  { %1481 = vlog2.f32 %v1123_v21 }
 0x1dc   :  { %v1476_v4 = vpop.eup %1475 }
 0x1dd   :  { %v1478_v34 = vpop.eup %1477  ;;  %v1125_v53 = vmul.f32 0.6931472, %v1476_v4 }
 0x1de   :  { %v1480_v46 = vpop.eup %1479  ;;  %v1130_v54 = vmul.f32 0.6931472, %v1478_v34 }
 0x1df   :  { %v1482_v43 = vpop.eup %1481  ;;  %v1126_v38 = vadd.f32 %v1125_v53, %v108_v35  ;;  %v1135_v40 = vmul.f32 0.6931472, %v1480_v46 }
 0x1e0   :  { %v1131_v52 = vadd.f32 %v1130_v54, %v108_v35  ;;  %v1140_v57 = vmul.f32 0.6931472, %v1482_v43 }
 0x1e1   :  { %1128 = vst.msk [vmem:[#allocation11] sm:$0xff] %vm1127_vm1, %v1126_v38  ;;  %v1136_v55 = vadd.f32 %v1135_v40, %v108_v35 }
 0x1e2   :  { %1133 = vst.msk [vmem:[#allocation11 + $0x8] sm:$0xff] %vm1127_vm1, %v1131_v52  ;;  %v1141_v32 = vadd.f32 %v1140_v57, %v108_v35 }
 0x1e3   :  { %1138 = vst.msk [vmem:[#allocation11 + $0x10] sm:$0xff] %vm1127_vm1, %v1136_v55 }
 0x1e4   :  { %1143 = vst.msk [vmem:[#allocation11 + $0x18] sm:$0xff] %vm1127_vm1, %v1141_v32 }
 0x1e5   :  { %1599 = shalt.err (!%p1596_p1)
}
 0x1e6   :  { %s1650_s21 = smov 128   ;;  %s1651_s22 = smov 8  }
 0x1e7   :  { %1155 = dma.vmem_to_hbm [thread:$0]  %s1150_s20, 512, %s2140_s9, [#allocation4], %s1650_s21, %s1650_s21, %s1651_s22  }
 0x1e8   :  { %1614 = dma.done.wait [#allocation4], 512  }
 0x1e9   :  { %1615 = vsyncadd [#allocation4], 4294966784 }
 0x1ea   :  { %1159 = vsyncpa [#allocation3], 1 }
 0x1eb   :  { %1160 = vsyncpa [#allocation6], 1 }
 0x1ec   :  { %1161 = vsyncpa [#allocation9], 1 }
 0x1ed   :  { %1162 = vsyncpa [#allocation4], 1 }

</bundles_post_ra>
